<compile_context>
chip_gen: v7x
topology: tpu7x:2x2x1
jax: 0.10.0
libtpu: 0.0.40
codegen_flags: <defaults>
</compile_context>

<pallas_src>
import functools
import math

import jax
import jax.numpy as jnp
from jax.experimental import pallas as pl
from jax.experimental.pallas import tpu as pltpu  # noqa: F401  (kept for parity; no scratch needed)

D_FF = 2048          # PyTorch TransformerEncoderLayer default dim_feedforward
LN_EPS = 1e-5        # PyTorch default layer_norm_eps
N_FEAT = 93          # input feature size


# --------------------------------------------------------------------------
# Fused whole-model Pallas kernel
# --------------------------------------------------------------------------
def _fused_model_kernel(
    # inputs
    x_ref, emb_wt_ref, emb_b_ref,
    qkv_wt_ref, qkv_b_ref, out_wt_ref, out_b_ref,
    ln1_g_ref, ln1_b_ref,
    ff1_wt_ref, ff1_b_ref, ff2_wt_ref, ff2_b_ref,
    ln2_g_ref, ln2_b_ref,
    head_wt_ref, head_b_ref,
    # output: (M, 10) = [stroke | player | hand | point(3) | serve(4)]
    out_ref,
    *, S, B, D, H, L):
    f32 = jnp.float32
    hd = D // H
    M = B * S

    def layernorm(z, g, b):
        mu = jnp.mean(z, axis=-1, keepdims=True)
        c = z - mu
        var = jnp.mean(c * c, axis=-1, keepdims=True)
        return c * jax.lax.rsqrt(var + LN_EPS) * g + b

    def softmax_last(t, approx):
        t = t - jnp.max(t, axis=-1, keepdims=True)
        e = jnp.exp(t)
        return e * pl.reciprocal(jnp.sum(e, axis=-1, keepdims=True), approx=approx)

    # ---- linear embedding: (M, 93) @ (93, D) + b ----
    h = jnp.dot(x_ref[...], emb_wt_ref[...], preferred_element_type=f32) + emb_b_ref[...]

    # ---- transformer encoder layers (post-norm, relu, no dropout at eval) ----
    for l in range(L):
        # fused QKV projection over all rows: (M, D) @ (D, 3D); 1/sqrt(hd)
        # already folded into the Q portion of weight and bias.
        qkv = jnp.dot(h, qkv_wt_ref[l], preferred_element_type=f32) + qkv_b_ref[l]
        q = qkv[:, 0:D]
        k = qkv[:, D:2 * D]
        v = qkv[:, 2 * D:3 * D]

        # per-head attention, batched over the batch dim with 3-D einsums.
        # (M, hd) -> (B, S, hd) reshapes split rows exactly at the 8-row
        # sublane tile (S = 8), so they are cheap retiles, not relayouts.
        o_heads = []
        for hh in range(H):
            lo = hh * hd
            qh = q[:, lo:lo + hd].reshape(B, S, hd)
            kh = k[:, lo:lo + hd].reshape(B, S, hd)
            vh = v[:, lo:lo + hd].reshape(B, S, hd)
            s = jnp.einsum('bqd,bkd->bqk', qh, kh,
                           preferred_element_type=f32)          # (B, S, S)
            p = softmax_last(s, approx=True)
            o = jnp.einsum('bqk,bkd->bqd', p, vh,
                           preferred_element_type=f32)          # (B, S, hd)
            o_heads.append(o.reshape(M, hd))
        o_cat = jnp.concatenate(o_heads, axis=-1)                # (M, D)

        # fused out_proj: one (D, D) matmul over all rows (K = D dense).
        attn = jnp.dot(o_cat, out_wt_ref[l], preferred_element_type=f32) + out_b_ref[l]

        x1 = layernorm(h + attn, ln1_g_ref[l], ln1_b_ref[l])

        # feed-forward: the (M, D_FF) intermediate never leaves VMEM/vregs.
        ff = jnp.dot(x1, ff1_wt_ref[l], preferred_element_type=f32) + ff1_b_ref[l]
        ff = jnp.maximum(ff, 0.0)
        ff = jnp.dot(ff, ff2_wt_ref[l], preferred_element_type=f32) + ff2_b_ref[l]
        h = layernorm(x1 + ff, ln2_g_ref[l], ln2_b_ref[l])

    # ---- output heads: ONE (D, 10) matmul, activations on column slices,
    #      a single store of the lane-dense (M, 10) slab ----
    logits = jnp.dot(h, head_wt_ref[...], preferred_element_type=f32) + head_b_ref[...]
    bin_p = jax.nn.sigmoid(logits[:, 0:3])           # stroke | player | hand
    point_p = softmax_last(logits[:, 3:6], approx=False)
    serve_p = softmax_last(logits[:, 6:10], approx=False)
    out_ref[...] = jnp.concatenate([bin_p, point_p, serve_p], axis=-1)


# --------------------------------------------------------------------------
# Forward wrapper (thin JAX glue: one transpose in, one transpose out)
# --------------------------------------------------------------------------
def model_1_forward(x, kp, n_head):
    """x: (S, B, 93) f32. Returns the 5-tuple of head outputs (PyTorch order)."""
    S, B, F = x.shape
    D = kp["emb_wt"].shape[1]
    L = kp["qkv_wt"].shape[0]
    H = n_head
    M = B * S
    C = kp["head_wt"].shape[1]                       # 10 for void_let_serve=True

    # batch-major rows so each batch's sequence is a contiguous 8-row block.
    xb = x.transpose(1, 0, 2).reshape(M, F)

    kernel = functools.partial(_fused_model_kernel, S=S, B=B, D=D, H=H, L=L)
    y = pl.pallas_call(
        kernel,
        out_shape=jax.ShapeDtypeStruct((M, C), jnp.float32),
    )(
        xb, kp["emb_wt"], kp["emb_b"],
        kp["qkv_wt"], kp["qkv_b"], kp["out_wt"], kp["out_b"],
        kp["ln1_g"], kp["ln1_b"],
        kp["ff1_wt"], kp["ff1_b"], kp["ff2_wt"], kp["ff2_b"],
        kp["ln2_g"], kp["ln2_b"],
        kp["head_wt"], kp["head_b"],
    )

    y = y.reshape(B, S, C).transpose(1, 0, 2)        # (S, B, 10)
    y_stroke = y[..., 0:1]
    y_player = y[..., 1:2]
    y_hand = y[..., 2:3]
    y_point = y[..., 3:6]
    y_serve = y[..., 6:10]
    # TODO(synk): adapt_output_1 (return_as_one=True) is host-side label formatting; not kernelized.
    return y_stroke, y_player, y_hand, y_point, y_serve


# --------------------------------------------------------------------------
# One-time parameter re-layout (off the hot path): pre-transpose, fuse QKV
# (fold 1/sqrt(hd) into the Q block), keep out_proj dense, fuse all 5 heads.
# --------------------------------------------------------------------------
def prepare_params(params, n_head):
    D = params["emb_w"].shape[0]
    H = n_head
    hd = D // H
    scale = 1.0 / math.sqrt(hd)
    layers = params["layers"]

    def stack(fn):
        return jnp.stack([fn(lp) for lp in layers], axis=0)

    def qkv_wt(lp):
        w = lp["in_proj_w"]                          # (3D, D), rows = [q; k; v]
        w = w.at[:D].multiply(scale)                 # fold 1/sqrt(hd) into Q
        return w.T                                   # (D, 3D) for x @ W^T

    def qkv_b(lp):
        b = lp["in_proj_b"]
        b = b.at[:D].multiply(scale)
        return b.reshape(1, 3 * D)

    kp = {
        "emb_wt": params["emb_w"].T,                                  # (93, D)
        "emb_b": params["emb_b"].reshape(1, D),
        "qkv_wt": stack(qkv_wt),                                      # (L, D, 3D)
        "qkv_b": stack(qkv_b),                                        # (L, 1, 3D)
        "out_wt": stack(lambda lp: lp["out_proj_w"].T),               # (L, D, D)
        "out_b": stack(lambda lp: lp["out_proj_b"].reshape(1, D)),
        "ln1_g": stack(lambda lp: lp["ln1_g"].reshape(1, D)),
        "ln1_b": stack(lambda lp: lp["ln1_b"].reshape(1, D)),
        "ff1_wt": stack(lambda lp: lp["ff1_w"].T),                    # (L, D, D_FF)
        "ff1_b": stack(lambda lp: lp["ff1_b"].reshape(1, D_FF)),
        "ff2_wt": stack(lambda lp: lp["ff2_w"].T),                    # (L, D_FF, D)
        "ff2_b": stack(lambda lp: lp["ff2_b"].reshape(1, D)),
        "ln2_g": stack(lambda lp: lp["ln2_g"].reshape(1, D)),
        "ln2_b": stack(lambda lp: lp["ln2_b"].reshape(1, D)),
        # fused heads: [stroke(1) | player(1) | hand(1) | point(3) | serve(4)]
        "head_wt": jnp.concatenate(
            [params["stroke_w"], params["player_w"], params["hand_w"],
             params["point_w"], params["serve_w"]], axis=0).T,        # (D, 10)
        "head_b": jnp.concatenate(
            [params["stroke_b"], params["player_b"], params["hand_b"],
             params["point_b"], params["serve_b"]], axis=0).reshape(1, -1),
    }
    return kp


# --------------------------------------------------------------------------
# Deterministic parameter init (shapes from Model_1.__init__, void_let_serve=True)
# --------------------------------------------------------------------------
def _lin(key, out_f, in_f, scale=0.02):
    kw, kb = jax.random.split(key)
    w = jax.random.normal(kw, (out_f, in_f), jnp.float32) * scale
    b = jax.random.normal(kb, (out_f,), jnp.float32) * scale
    return w, b


def init_params(key, d_model, num_layers):
    keys = jax.random.split(key, 8 + num_layers)
    params = {}
    params["emb_w"], params["emb_b"] = _lin(keys[0], d_model, N_FEAT)
    params["stroke_w"], params["stroke_b"] = _lin(keys[1], 1, d_model)
    params["player_w"], params["player_b"] = _lin(keys[2], 1, d_model)
    params["hand_w"], params["hand_b"] = _lin(keys[3], 1, d_model)
    params["point_w"], params["point_b"] = _lin(keys[4], 3, d_model)
    params["serve_w"], params["serve_b"] = _lin(keys[5], 4, d_model)   # void_let_serve=True -> 4
    layers = []
    for li in range(num_layers):
        lk = jax.random.split(keys[8 + li], 4)
        lp = {}
        lp["in_proj_w"], lp["in_proj_b"] = _lin(lk[0], 3 * d_model, d_model)
        lp["out_proj_w"], lp["out_proj_b"] = _lin(lk[1], d_model, d_model)
        lp["ff1_w"], lp["ff1_b"] = _lin(lk[2], D_FF, d_model)
        lp["ff2_w"], lp["ff2_b"] = _lin(lk[3], d_model, D_FF)
        lp["ln1_g"] = jnp.ones((d_model,), jnp.float32)
        lp["ln1_b"] = jnp.zeros((d_model,), jnp.float32)
        lp["ln2_g"] = jnp.ones((d_model,), jnp.float32)
        lp["ln2_b"] = jnp.zeros((d_model,), jnp.float32)
        layers.append(lp)
    params["layers"] = layers
    return params


# --------------------------------------------------------------------------
if __name__ == "__main__":
    SEQ, BATCH = 8, 2
    D_MODEL, N_HEAD, NUM_LAYERS = 32, 4, 2

    root = jax.random.PRNGKey(0)
    pkey, xkey = jax.random.split(root)
    params = init_params(pkey, D_MODEL, NUM_LAYERS)
    kparams = prepare_params(params, N_HEAD)        # one-time weight re-layout
    # input: (seq_len, batch, 93)  -- PyTorch batch_first=False convention
    x = jax.random.normal(xkey, (SEQ, BATCH, N_FEAT), dtype=jnp.float32)

    fwd = jax.jit(functools.partial(model_1_forward, n_head=N_HEAD))
    outs = fwd(x, kparams)
    jax.block_until_ready(outs)
    y_stroke, y_player, y_hand, y_point, y_serve = outs

    assert y_stroke.shape == (SEQ, BATCH, 1)
    assert y_player.shape == (SEQ, BATCH, 1)
    assert y_hand.shape == (SEQ, BATCH, 1)
    assert y_point.shape == (SEQ, BATCH, 3)
    assert y_serve.shape == (SEQ, BATCH, 4)
    assert bool(jnp.all(jnp.isfinite(y_stroke)))
    assert bool(jnp.all(jnp.isfinite(y_point)))
    assert bool(jnp.all(jnp.isfinite(y_serve)))
    assert bool(jnp.allclose(jnp.sum(y_point, axis=-1), 1.0, atol=1e-5))
    assert bool(jnp.allclose(jnp.sum(y_serve, axis=-1), 1.0, atol=1e-5))
    assert bool(jnp.all((y_stroke >= 0.0) & (y_stroke <= 1.0)))

    print("KERNEL_OK")
</pallas_src>

<mosaic_0001>
module attributes {stable_mosaic.version = 11 : i64} {
  func.func @_fused_model_kernel(%arg0: memref<16x93xf32, #tpu.memory_space<vmem>>, %arg1: memref<93x32xf32, #tpu.memory_space<vmem>>, %arg2: memref<1x32xf32, #tpu.memory_space<vmem>>, %arg3: memref<2x32x96xf32, #tpu.memory_space<vmem>>, %arg4: memref<2x1x96xf32, #tpu.memory_space<vmem>>, %arg5: memref<2x32x32xf32, #tpu.memory_space<vmem>>, %arg6: memref<2x1x32xf32, #tpu.memory_space<vmem>>, %arg7: memref<2x1x32xf32, #tpu.memory_space<vmem>>, %arg8: memref<2x1x32xf32, #tpu.memory_space<vmem>>, %arg9: memref<2x32x2048xf32, #tpu.memory_space<vmem>>, %arg10: memref<2x1x2048xf32, #tpu.memory_space<vmem>>, %arg11: memref<2x2048x32xf32, #tpu.memory_space<vmem>>, %arg12: memref<2x1x32xf32, #tpu.memory_space<vmem>>, %arg13: memref<2x1x32xf32, #tpu.memory_space<vmem>>, %arg14: memref<2x1x32xf32, #tpu.memory_space<vmem>>, %arg15: memref<32x10xf32, #tpu.memory_space<vmem>>, %arg16: memref<1x10xf32, #tpu.memory_space<vmem>>, %arg17: memref<16x10xf32, #tpu.memory_space<vmem>>) attributes {dimension_semantics = [], scalar_prefetch = 0 : i64, scratch_operands = 0 : i64, tpu.core_type = #tpu.core_type<tc>} {
    %c0 = arith.constant 0 : index
    %c0_0 = arith.constant 0 : index
    %0 = vector.load %arg0[%c0, %c0_0] : memref<16x93xf32, #tpu.memory_space<vmem>>, vector<16x93xf32>
    %c0_1 = arith.constant 0 : index
    %c0_2 = arith.constant 0 : index
    %1 = vector.load %arg1[%c0_1, %c0_2] : memref<93x32xf32, #tpu.memory_space<vmem>>, vector<93x32xf32>
    %cst = arith.constant dense<0.000000e+00> : vector<16x32xf32>
    %2 = tpu.matmul %0, %1, %cst {dimension_numbers = #tpu.dot_dimension_numbers<[1], [0], [0], [1], [0, 0, 1, 1], [], []>} : vector<16x93xf32>, vector<93x32xf32>, vector<16x32xf32> -> vector<16x32xf32>
    %c0_3 = arith.constant 0 : index
    %c0_4 = arith.constant 0 : index
    %3 = vector.load %arg2[%c0_3, %c0_4] : memref<1x32xf32, #tpu.memory_space<vmem>>, vector<1x32xf32>
    %4 = vector.broadcast %3 : vector<1x32xf32> to vector<16x32xf32>
    %5 = arith.addf %2, %4 : vector<16x32xf32>
    %c0_5 = arith.constant 0 : index
    %c0_6 = arith.constant 0 : index
    %c0_7 = arith.constant 0 : index
    %6 = vector.load %arg3[%c0_5, %c0_6, %c0_7] : memref<2x32x96xf32, #tpu.memory_space<vmem>>, vector<1x32x96xf32>
    %7 = vector.shape_cast %6 : vector<1x32x96xf32> to vector<32x96xf32>
    %cst_8 = arith.constant dense<0.000000e+00> : vector<16x96xf32>
    %8 = tpu.matmul %5, %7, %cst_8 {dimension_numbers = #tpu.dot_dimension_numbers<[1], [0], [0], [1], [0, 0, 1, 1], [], []>} : vector<16x32xf32>, vector<32x96xf32>, vector<16x96xf32> -> vector<16x96xf32>
    %c0_9 = arith.constant 0 : index
    %c0_10 = arith.constant 0 : index
    %c0_11 = arith.constant 0 : index
    %9 = vector.load %arg4[%c0_9, %c0_10, %c0_11] : memref<2x1x96xf32, #tpu.memory_space<vmem>>, vector<1x1x96xf32>
    %10 = vector.shape_cast %9 : vector<1x1x96xf32> to vector<1x96xf32>
    %11 = vector.broadcast %10 : vector<1x96xf32> to vector<16x96xf32>
    %12 = arith.addf %8, %11 : vector<16x96xf32>
    %13 = vector.extract_strided_slice %12 {offsets = [0, 0], sizes = [16, 32], strides = [1, 1]} : vector<16x96xf32> to vector<16x32xf32>
    %14 = vector.extract_strided_slice %12 {offsets = [0, 32], sizes = [16, 32], strides = [1, 1]} : vector<16x96xf32> to vector<16x32xf32>
    %15 = vector.extract_strided_slice %12 {offsets = [0, 64], sizes = [16, 32], strides = [1, 1]} : vector<16x96xf32> to vector<16x32xf32>
    %16 = vector.extract_strided_slice %13 {offsets = [0, 0], sizes = [16, 8], strides = [1, 1]} : vector<16x32xf32> to vector<16x8xf32>
    %17 = vector.shape_cast %16 : vector<16x8xf32> to vector<2x8x8xf32>
    %18 = vector.extract_strided_slice %14 {offsets = [0, 0], sizes = [16, 8], strides = [1, 1]} : vector<16x32xf32> to vector<16x8xf32>
    %19 = vector.shape_cast %18 : vector<16x8xf32> to vector<2x8x8xf32>
    %20 = vector.extract_strided_slice %15 {offsets = [0, 0], sizes = [16, 8], strides = [1, 1]} : vector<16x32xf32> to vector<16x8xf32>
    %21 = vector.shape_cast %20 : vector<16x8xf32> to vector<2x8x8xf32>
    "tpu.trace_start"() <{level = 10 : i32, message = "bqd,bkd->bqk"}> : () -> ()
    %cst_12 = arith.constant dense<0.000000e+00> : vector<2x8x8xf32>
    %22 = tpu.matmul %17, %19, %cst_12 {dimension_numbers = #tpu.dot_dimension_numbers<[2], [2], [1], [1], [0, 0, 0, 1, 1, 1], [0], [0]>} : vector<2x8x8xf32>, vector<2x8x8xf32>, vector<2x8x8xf32> -> vector<2x8x8xf32>
    "tpu.trace_stop"() : () -> ()
    %cst_13 = arith.constant dense<0xFF800000> : vector<2x8xf32>
    %23 = vector.multi_reduction <maximumf>, %22, %cst_13 [2] : vector<2x8x8xf32> to vector<2x8xf32>
    %24 = vector.shape_cast %23 : vector<2x8xf32> to vector<2x8x1xf32>
    %25 = vector.broadcast %24 : vector<2x8x1xf32> to vector<2x8x8xf32>
    %26 = arith.subf %22, %25 : vector<2x8x8xf32>
    %27 = math.exp %26 : vector<2x8x8xf32>
    %cst_14 = arith.constant dense<0.000000e+00> : vector<2x8xf32>
    %28 = vector.multi_reduction <add>, %27, %cst_14 [2] : vector<2x8x8xf32> to vector<2x8xf32>
    %29 = vector.shape_cast %28 : vector<2x8xf32> to vector<2x8x1xf32>
    %30 = tpu.reciprocal %29 {approx = true} : vector<2x8x1xf32> -> vector<2x8x1xf32>
    %31 = vector.broadcast %30 : vector<2x8x1xf32> to vector<2x8x8xf32>
    %32 = arith.mulf %27, %31 : vector<2x8x8xf32>
    "tpu.trace_start"() <{level = 10 : i32, message = "bqk,bkd->bqd"}> : () -> ()
    %cst_15 = arith.constant dense<0.000000e+00> : vector<2x8x8xf32>
    %33 = tpu.matmul %32, %21, %cst_15 {dimension_numbers = #tpu.dot_dimension_numbers<[2], [1], [1], [2], [0, 0, 0, 1, 1, 2], [0], [0]>} : vector<2x8x8xf32>, vector<2x8x8xf32>, vector<2x8x8xf32> -> vector<2x8x8xf32>
    "tpu.trace_stop"() : () -> ()
    %34 = vector.shape_cast %33 : vector<2x8x8xf32> to vector<16x8xf32>
    %35 = vector.extract_strided_slice %13 {offsets = [0, 8], sizes = [16, 8], strides = [1, 1]} : vector<16x32xf32> to vector<16x8xf32>
    %36 = vector.shape_cast %35 : vector<16x8xf32> to vector<2x8x8xf32>
    %37 = vector.extract_strided_slice %14 {offsets = [0, 8], sizes = [16, 8], strides = [1, 1]} : vector<16x32xf32> to vector<16x8xf32>
    %38 = vector.shape_cast %37 : vector<16x8xf32> to vector<2x8x8xf32>
    %39 = vector.extract_strided_slice %15 {offsets = [0, 8], sizes = [16, 8], strides = [1, 1]} : vector<16x32xf32> to vector<16x8xf32>
    %40 = vector.shape_cast %39 : vector<16x8xf32> to vector<2x8x8xf32>
    "tpu.trace_start"() <{level = 10 : i32, message = "bqd,bkd->bqk"}> : () -> ()
    %cst_16 = arith.constant dense<0.000000e+00> : vector<2x8x8xf32>
    %41 = tpu.matmul %36, %38, %cst_16 {dimension_numbers = #tpu.dot_dimension_numbers<[2], [2], [1], [1], [0, 0, 0, 1, 1, 1], [0], [0]>} : vector<2x8x8xf32>, vector<2x8x8xf32>, vector<2x8x8xf32> -> vector<2x8x8xf32>
    "tpu.trace_stop"() : () -> ()
    %cst_17 = arith.constant dense<0xFF800000> : vector<2x8xf32>
    %42 = vector.multi_reduction <maximumf>, %41, %cst_17 [2] : vector<2x8x8xf32> to vector<2x8xf32>
    %43 = vector.shape_cast %42 : vector<2x8xf32> to vector<2x8x1xf32>
    %44 = vector.broadcast %43 : vector<2x8x1xf32> to vector<2x8x8xf32>
    %45 = arith.subf %41, %44 : vector<2x8x8xf32>
    %46 = math.exp %45 : vector<2x8x8xf32>
    %cst_18 = arith.constant dense<0.000000e+00> : vector<2x8xf32>
    %47 = vector.multi_reduction <add>, %46, %cst_18 [2] : vector<2x8x8xf32> to vector<2x8xf32>
    %48 = vector.shape_cast %47 : vector<2x8xf32> to vector<2x8x1xf32>
    %49 = tpu.reciprocal %48 {approx = true} : vector<2x8x1xf32> -> vector<2x8x1xf32>
    %50 = vector.broadcast %49 : vector<2x8x1xf32> to vector<2x8x8xf32>
    %51 = arith.mulf %46, %50 : vector<2x8x8xf32>
    "tpu.trace_start"() <{level = 10 : i32, message = "bqk,bkd->bqd"}> : () -> ()
    %cst_19 = arith.constant dense<0.000000e+00> : vector<2x8x8xf32>
    %52 = tpu.matmul %51, %40, %cst_19 {dimension_numbers = #tpu.dot_dimension_numbers<[2], [1], [1], [2], [0, 0, 0, 1, 1, 2], [0], [0]>} : vector<2x8x8xf32>, vector<2x8x8xf32>, vector<2x8x8xf32> -> vector<2x8x8xf32>
    "tpu.trace_stop"() : () -> ()
    %53 = vector.shape_cast %52 : vector<2x8x8xf32> to vector<16x8xf32>
    %54 = vector.extract_strided_slice %13 {offsets = [0, 16], sizes = [16, 8], strides = [1, 1]} : vector<16x32xf32> to vector<16x8xf32>
    %55 = vector.shape_cast %54 : vector<16x8xf32> to vector<2x8x8xf32>
    %56 = vector.extract_strided_slice %14 {offsets = [0, 16], sizes = [16, 8], strides = [1, 1]} : vector<16x32xf32> to vector<16x8xf32>
    %57 = vector.shape_cast %56 : vector<16x8xf32> to vector<2x8x8xf32>
    %58 = vector.extract_strided_slice %15 {offsets = [0, 16], sizes = [16, 8], strides = [1, 1]} : vector<16x32xf32> to vector<16x8xf32>
    %59 = vector.shape_cast %58 : vector<16x8xf32> to vector<2x8x8xf32>
    "tpu.trace_start"() <{level = 10 : i32, message = "bqd,bkd->bqk"}> : () -> ()
    %cst_20 = arith.constant dense<0.000000e+00> : vector<2x8x8xf32>
    %60 = tpu.matmul %55, %57, %cst_20 {dimension_numbers = #tpu.dot_dimension_numbers<[2], [2], [1], [1], [0, 0, 0, 1, 1, 1], [0], [0]>} : vector<2x8x8xf32>, vector<2x8x8xf32>, vector<2x8x8xf32> -> vector<2x8x8xf32>
    "tpu.trace_stop"() : () -> ()
    %cst_21 = arith.constant dense<0xFF800000> : vector<2x8xf32>
    %61 = vector.multi_reduction <maximumf>, %60, %cst_21 [2] : vector<2x8x8xf32> to vector<2x8xf32>
    %62 = vector.shape_cast %61 : vector<2x8xf32> to vector<2x8x1xf32>
    %63 = vector.broadcast %62 : vector<2x8x1xf32> to vector<2x8x8xf32>
    %64 = arith.subf %60, %63 : vector<2x8x8xf32>
    %65 = math.exp %64 : vector<2x8x8xf32>
    %cst_22 = arith.constant dense<0.000000e+00> : vector<2x8xf32>
    %66 = vector.multi_reduction <add>, %65, %cst_22 [2] : vector<2x8x8xf32> to vector<2x8xf32>
    %67 = vector.shape_cast %66 : vector<2x8xf32> to vector<2x8x1xf32>
    %68 = tpu.reciprocal %67 {approx = true} : vector<2x8x1xf32> -> vector<2x8x1xf32>
    %69 = vector.broadcast %68 : vector<2x8x1xf32> to vector<2x8x8xf32>
    %70 = arith.mulf %65, %69 : vector<2x8x8xf32>
    "tpu.trace_start"() <{level = 10 : i32, message = "bqk,bkd->bqd"}> : () -> ()
    %cst_23 = arith.constant dense<0.000000e+00> : vector<2x8x8xf32>
    %71 = tpu.matmul %70, %59, %cst_23 {dimension_numbers = #tpu.dot_dimension_numbers<[2], [1], [1], [2], [0, 0, 0, 1, 1, 2], [0], [0]>} : vector<2x8x8xf32>, vector<2x8x8xf32>, vector<2x8x8xf32> -> vector<2x8x8xf32>
    "tpu.trace_stop"() : () -> ()
    %72 = vector.shape_cast %71 : vector<2x8x8xf32> to vector<16x8xf32>
    %73 = vector.extract_strided_slice %13 {offsets = [0, 24], sizes = [16, 8], strides = [1, 1]} : vector<16x32xf32> to vector<16x8xf32>
    %74 = vector.shape_cast %73 : vector<16x8xf32> to vector<2x8x8xf32>
    %75 = vector.extract_strided_slice %14 {offsets = [0, 24], sizes = [16, 8], strides = [1, 1]} : vector<16x32xf32> to vector<16x8xf32>
    %76 = vector.shape_cast %75 : vector<16x8xf32> to vector<2x8x8xf32>
    %77 = vector.extract_strided_slice %15 {offsets = [0, 24], sizes = [16, 8], strides = [1, 1]} : vector<16x32xf32> to vector<16x8xf32>
    %78 = vector.shape_cast %77 : vector<16x8xf32> to vector<2x8x8xf32>
    "tpu.trace_start"() <{level = 10 : i32, message = "bqd,bkd->bqk"}> : () -> ()
    %cst_24 = arith.constant dense<0.000000e+00> : vector<2x8x8xf32>
    %79 = tpu.matmul %74, %76, %cst_24 {dimension_numbers = #tpu.dot_dimension_numbers<[2], [2], [1], [1], [0, 0, 0, 1, 1, 1], [0], [0]>} : vector<2x8x8xf32>, vector<2x8x8xf32>, vector<2x8x8xf32> -> vector<2x8x8xf32>
    "tpu.trace_stop"() : () -> ()
    %cst_25 = arith.constant dense<0xFF800000> : vector<2x8xf32>
    %80 = vector.multi_reduction <maximumf>, %79, %cst_25 [2] : vector<2x8x8xf32> to vector<2x8xf32>
    %81 = vector.shape_cast %80 : vector<2x8xf32> to vector<2x8x1xf32>
    %82 = vector.broadcast %81 : vector<2x8x1xf32> to vector<2x8x8xf32>
    %83 = arith.subf %79, %82 : vector<2x8x8xf32>
    %84 = math.exp %83 : vector<2x8x8xf32>
    %cst_26 = arith.constant dense<0.000000e+00> : vector<2x8xf32>
    %85 = vector.multi_reduction <add>, %84, %cst_26 [2] : vector<2x8x8xf32> to vector<2x8xf32>
    %86 = vector.shape_cast %85 : vector<2x8xf32> to vector<2x8x1xf32>
    %87 = tpu.reciprocal %86 {approx = true} : vector<2x8x1xf32> -> vector<2x8x1xf32>
    %88 = vector.broadcast %87 : vector<2x8x1xf32> to vector<2x8x8xf32>
    %89 = arith.mulf %84, %88 : vector<2x8x8xf32>
    "tpu.trace_start"() <{level = 10 : i32, message = "bqk,bkd->bqd"}> : () -> ()
    %cst_27 = arith.constant dense<0.000000e+00> : vector<2x8x8xf32>
    %90 = tpu.matmul %89, %78, %cst_27 {dimension_numbers = #tpu.dot_dimension_numbers<[2], [1], [1], [2], [0, 0, 0, 1, 1, 2], [0], [0]>} : vector<2x8x8xf32>, vector<2x8x8xf32>, vector<2x8x8xf32> -> vector<2x8x8xf32>
    "tpu.trace_stop"() : () -> ()
    %91 = vector.shape_cast %90 : vector<2x8x8xf32> to vector<16x8xf32>
    %92 = tpu.concatenate %34, %53, %72, %91 in 1 : vector<16x8xf32>, vector<16x8xf32>, vector<16x8xf32>, vector<16x8xf32> -> vector<16x32xf32>
    %c0_28 = arith.constant 0 : index
    %c0_29 = arith.constant 0 : index
    %c0_30 = arith.constant 0 : index
    %93 = vector.load %arg5[%c0_28, %c0_29, %c0_30] : memref<2x32x32xf32, #tpu.memory_space<vmem>>, vector<1x32x32xf32>
    %94 = vector.shape_cast %93 : vector<1x32x32xf32> to vector<32x32xf32>
    %cst_31 = arith.constant dense<0.000000e+00> : vector<16x32xf32>
    %95 = tpu.matmul %92, %94, %cst_31 {dimension_numbers = #tpu.dot_dimension_numbers<[1], [0], [0], [1], [0, 0, 1, 1], [], []>} : vector<16x32xf32>, vector<32x32xf32>, vector<16x32xf32> -> vector<16x32xf32>
    %c0_32 = arith.constant 0 : index
    %c0_33 = arith.constant 0 : index
    %c0_34 = arith.constant 0 : index
    %96 = vector.load %arg6[%c0_32, %c0_33, %c0_34] : memref<2x1x32xf32, #tpu.memory_space<vmem>>, vector<1x1x32xf32>
    %97 = vector.shape_cast %96 : vector<1x1x32xf32> to vector<1x32xf32>
    %98 = vector.broadcast %97 : vector<1x32xf32> to vector<16x32xf32>
    %99 = arith.addf %95, %98 : vector<16x32xf32>
    %100 = arith.addf %5, %99 : vector<16x32xf32>
    %c0_35 = arith.constant 0 : index
    %c0_36 = arith.constant 0 : index
    %c0_37 = arith.constant 0 : index
    %101 = vector.load %arg7[%c0_35, %c0_36, %c0_37] : memref<2x1x32xf32, #tpu.memory_space<vmem>>, vector<1x1x32xf32>
    %102 = vector.shape_cast %101 : vector<1x1x32xf32> to vector<1x32xf32>
    %c0_38 = arith.constant 0 : index
    %c0_39 = arith.constant 0 : index
    %c0_40 = arith.constant 0 : index
    %103 = vector.load %arg8[%c0_38, %c0_39, %c0_40] : memref<2x1x32xf32, #tpu.memory_space<vmem>>, vector<1x1x32xf32>
    %104 = vector.shape_cast %103 : vector<1x1x32xf32> to vector<1x32xf32>
    %cst_41 = arith.constant dense<0.000000e+00> : vector<16xf32>
    %105 = vector.multi_reduction <add>, %100, %cst_41 [1] : vector<16x32xf32> to vector<16xf32>
    %106 = vector.shape_cast %105 : vector<16xf32> to vector<16x1xf32>
    %cst_42 = arith.constant 3.200000e+01 : f32
    %107 = vector.broadcast %cst_42 : f32 to vector<16x1xf32>
    %108 = arith.divf %106, %107 : vector<16x1xf32>
    %109 = vector.broadcast %108 : vector<16x1xf32> to vector<16x32xf32>
    %110 = arith.subf %100, %109 : vector<16x32xf32>
    %111 = arith.mulf %110, %110 : vector<16x32xf32>
    %cst_43 = arith.constant dense<0.000000e+00> : vector<16xf32>
    %112 = vector.multi_reduction <add>, %111, %cst_43 [1] : vector<16x32xf32> to vector<16xf32>
    %113 = vector.shape_cast %112 : vector<16xf32> to vector<16x1xf32>
    %cst_44 = arith.constant 3.200000e+01 : f32
    %114 = vector.broadcast %cst_44 : f32 to vector<16x1xf32>
    %115 = arith.divf %113, %114 : vector<16x1xf32>
    %cst_45 = arith.constant 9.99999974E-6 : f32
    %116 = vector.broadcast %cst_45 : f32 to vector<16x1xf32>
    %117 = arith.addf %115, %116 : vector<16x1xf32>
    %118 = math.rsqrt %117 : vector<16x1xf32>
    %119 = vector.broadcast %118 : vector<16x1xf32> to vector<16x32xf32>
    %120 = arith.mulf %110, %119 : vector<16x32xf32>
    %121 = vector.broadcast %102 : vector<1x32xf32> to vector<16x32xf32>
    %122 = arith.mulf %120, %121 : vector<16x32xf32>
    %123 = vector.broadcast %104 : vector<1x32xf32> to vector<16x32xf32>
    %124 = arith.addf %122, %123 : vector<16x32xf32>
    %c0_46 = arith.constant 0 : index
    %c0_47 = arith.constant 0 : index
    %c0_48 = arith.constant 0 : index
    %125 = vector.load %arg9[%c0_46, %c0_47, %c0_48] : memref<2x32x2048xf32, #tpu.memory_space<vmem>>, vector<1x32x2048xf32>
    %126 = vector.shape_cast %125 : vector<1x32x2048xf32> to vector<32x2048xf32>
    %cst_49 = arith.constant dense<0.000000e+00> : vector<16x2048xf32>
    %127 = tpu.matmul %124, %126, %cst_49 {dimension_numbers = #tpu.dot_dimension_numbers<[1], [0], [0], [1], [0, 0, 1, 1], [], []>} : vector<16x32xf32>, vector<32x2048xf32>, vector<16x2048xf32> -> vector<16x2048xf32>
    %c0_50 = arith.constant 0 : index
    %c0_51 = arith.constant 0 : index
    %c0_52 = arith.constant 0 : index
    %128 = vector.load %arg10[%c0_50, %c0_51, %c0_52] : memref<2x1x2048xf32, #tpu.memory_space<vmem>>, vector<1x1x2048xf32>
    %129 = vector.shape_cast %128 : vector<1x1x2048xf32> to vector<1x2048xf32>
    %130 = vector.broadcast %129 : vector<1x2048xf32> to vector<16x2048xf32>
    %131 = arith.addf %127, %130 : vector<16x2048xf32>
    %cst_53 = arith.constant 0.000000e+00 : f32
    %132 = vector.broadcast %cst_53 : f32 to vector<16x2048xf32>
    %133 = arith.maximumf %131, %132 : vector<16x2048xf32>
    %c0_54 = arith.constant 0 : index
    %c0_55 = arith.constant 0 : index
    %c0_56 = arith.constant 0 : index
    %134 = vector.load %arg11[%c0_54, %c0_55, %c0_56] : memref<2x2048x32xf32, #tpu.memory_space<vmem>>, vector<1x2048x32xf32>
    %135 = vector.shape_cast %134 : vector<1x2048x32xf32> to vector<2048x32xf32>
    %cst_57 = arith.constant dense<0.000000e+00> : vector<16x32xf32>
    %136 = tpu.matmul %133, %135, %cst_57 {dimension_numbers = #tpu.dot_dimension_numbers<[1], [0], [0], [1], [0, 0, 1, 1], [], []>} : vector<16x2048xf32>, vector<2048x32xf32>, vector<16x32xf32> -> vector<16x32xf32>
    %c0_58 = arith.constant 0 : index
    %c0_59 = arith.constant 0 : index
    %c0_60 = arith.constant 0 : index
    %137 = vector.load %arg12[%c0_58, %c0_59, %c0_60] : memref<2x1x32xf32, #tpu.memory_space<vmem>>, vector<1x1x32xf32>
    %138 = vector.shape_cast %137 : vector<1x1x32xf32> to vector<1x32xf32>
    %139 = vector.broadcast %138 : vector<1x32xf32> to vector<16x32xf32>
    %140 = arith.addf %136, %139 : vector<16x32xf32>
    %141 = arith.addf %124, %140 : vector<16x32xf32>
    %c0_61 = arith.constant 0 : index
    %c0_62 = arith.constant 0 : index
    %c0_63 = arith.constant 0 : index
    %142 = vector.load %arg13[%c0_61, %c0_62, %c0_63] : memref<2x1x32xf32, #tpu.memory_space<vmem>>, vector<1x1x32xf32>
    %143 = vector.shape_cast %142 : vector<1x1x32xf32> to vector<1x32xf32>
    %c0_64 = arith.constant 0 : index
    %c0_65 = arith.constant 0 : index
    %c0_66 = arith.constant 0 : index
    %144 = vector.load %arg14[%c0_64, %c0_65, %c0_66] : memref<2x1x32xf32, #tpu.memory_space<vmem>>, vector<1x1x32xf32>
    %145 = vector.shape_cast %144 : vector<1x1x32xf32> to vector<1x32xf32>
    %cst_67 = arith.constant dense<0.000000e+00> : vector<16xf32>
    %146 = vector.multi_reduction <add>, %141, %cst_67 [1] : vector<16x32xf32> to vector<16xf32>
    %147 = vector.shape_cast %146 : vector<16xf32> to vector<16x1xf32>
    %cst_68 = arith.constant 3.200000e+01 : f32
    %148 = vector.broadcast %cst_68 : f32 to vector<16x1xf32>
    %149 = arith.divf %147, %148 : vector<16x1xf32>
    %150 = vector.broadcast %149 : vector<16x1xf32> to vector<16x32xf32>
    %151 = arith.subf %141, %150 : vector<16x32xf32>
    %152 = arith.mulf %151, %151 : vector<16x32xf32>
    %cst_69 = arith.constant dense<0.000000e+00> : vector<16xf32>
    %153 = vector.multi_reduction <add>, %152, %cst_69 [1] : vector<16x32xf32> to vector<16xf32>
    %154 = vector.shape_cast %153 : vector<16xf32> to vector<16x1xf32>
    %cst_70 = arith.constant 3.200000e+01 : f32
    %155 = vector.broadcast %cst_70 : f32 to vector<16x1xf32>
    %156 = arith.divf %154, %155 : vector<16x1xf32>
    %cst_71 = arith.constant 9.99999974E-6 : f32
    %157 = vector.broadcast %cst_71 : f32 to vector<16x1xf32>
    %158 = arith.addf %156, %157 : vector<16x1xf32>
    %159 = math.rsqrt %158 : vector<16x1xf32>
    %160 = vector.broadcast %159 : vector<16x1xf32> to vector<16x32xf32>
    %161 = arith.mulf %151, %160 : vector<16x32xf32>
    %162 = vector.broadcast %143 : vector<1x32xf32> to vector<16x32xf32>
    %163 = arith.mulf %161, %162 : vector<16x32xf32>
    %164 = vector.broadcast %145 : vector<1x32xf32> to vector<16x32xf32>
    %165 = arith.addf %163, %164 : vector<16x32xf32>
    %c1 = arith.constant 1 : index
    %c0_72 = arith.constant 0 : index
    %c0_73 = arith.constant 0 : index
    %166 = vector.load %arg3[%c1, %c0_72, %c0_73] : memref<2x32x96xf32, #tpu.memory_space<vmem>>, vector<1x32x96xf32>
    %167 = vector.shape_cast %166 : vector<1x32x96xf32> to vector<32x96xf32>
    %cst_74 = arith.constant dense<0.000000e+00> : vector<16x96xf32>
    %168 = tpu.matmul %165, %167, %cst_74 {dimension_numbers = #tpu.dot_dimension_numbers<[1], [0], [0], [1], [0, 0, 1, 1], [], []>} : vector<16x32xf32>, vector<32x96xf32>, vector<16x96xf32> -> vector<16x96xf32>
    %c1_75 = arith.constant 1 : index
    %c0_76 = arith.constant 0 : index
    %c0_77 = arith.constant 0 : index
    %169 = vector.load %arg4[%c1_75, %c0_76, %c0_77] : memref<2x1x96xf32, #tpu.memory_space<vmem>>, vector<1x1x96xf32>
    %170 = vector.shape_cast %169 : vector<1x1x96xf32> to vector<1x96xf32>
    %171 = vector.broadcast %170 : vector<1x96xf32> to vector<16x96xf32>
    %172 = arith.addf %168, %171 : vector<16x96xf32>
    %173 = vector.extract_strided_slice %172 {offsets = [0, 0], sizes = [16, 32], strides = [1, 1]} : vector<16x96xf32> to vector<16x32xf32>
    %174 = vector.extract_strided_slice %172 {offsets = [0, 32], sizes = [16, 32], strides = [1, 1]} : vector<16x96xf32> to vector<16x32xf32>
    %175 = vector.extract_strided_slice %172 {offsets = [0, 64], sizes = [16, 32], strides = [1, 1]} : vector<16x96xf32> to vector<16x32xf32>
    %176 = vector.extract_strided_slice %173 {offsets = [0, 0], sizes = [16, 8], strides = [1, 1]} : vector<16x32xf32> to vector<16x8xf32>
    %177 = vector.shape_cast %176 : vector<16x8xf32> to vector<2x8x8xf32>
    %178 = vector.extract_strided_slice %174 {offsets = [0, 0], sizes = [16, 8], strides = [1, 1]} : vector<16x32xf32> to vector<16x8xf32>
    %179 = vector.shape_cast %178 : vector<16x8xf32> to vector<2x8x8xf32>
    %180 = vector.extract_strided_slice %175 {offsets = [0, 0], sizes = [16, 8], strides = [1, 1]} : vector<16x32xf32> to vector<16x8xf32>
    %181 = vector.shape_cast %180 : vector<16x8xf32> to vector<2x8x8xf32>
    "tpu.trace_start"() <{level = 10 : i32, message = "bqd,bkd->bqk"}> : () -> ()
    %cst_78 = arith.constant dense<0.000000e+00> : vector<2x8x8xf32>
    %182 = tpu.matmul %177, %179, %cst_78 {dimension_numbers = #tpu.dot_dimension_numbers<[2], [2], [1], [1], [0, 0, 0, 1, 1, 1], [0], [0]>} : vector<2x8x8xf32>, vector<2x8x8xf32>, vector<2x8x8xf32> -> vector<2x8x8xf32>
    "tpu.trace_stop"() : () -> ()
    %cst_79 = arith.constant dense<0xFF800000> : vector<2x8xf32>
    %183 = vector.multi_reduction <maximumf>, %182, %cst_79 [2] : vector<2x8x8xf32> to vector<2x8xf32>
    %184 = vector.shape_cast %183 : vector<2x8xf32> to vector<2x8x1xf32>
    %185 = vector.broadcast %184 : vector<2x8x1xf32> to vector<2x8x8xf32>
    %186 = arith.subf %182, %185 : vector<2x8x8xf32>
    %187 = math.exp %186 : vector<2x8x8xf32>
    %cst_80 = arith.constant dense<0.000000e+00> : vector<2x8xf32>
    %188 = vector.multi_reduction <add>, %187, %cst_80 [2] : vector<2x8x8xf32> to vector<2x8xf32>
    %189 = vector.shape_cast %188 : vector<2x8xf32> to vector<2x8x1xf32>
    %190 = tpu.reciprocal %189 {approx = true} : vector<2x8x1xf32> -> vector<2x8x1xf32>
    %191 = vector.broadcast %190 : vector<2x8x1xf32> to vector<2x8x8xf32>
    %192 = arith.mulf %187, %191 : vector<2x8x8xf32>
    "tpu.trace_start"() <{level = 10 : i32, message = "bqk,bkd->bqd"}> : () -> ()
    %cst_81 = arith.constant dense<0.000000e+00> : vector<2x8x8xf32>
    %193 = tpu.matmul %192, %181, %cst_81 {dimension_numbers = #tpu.dot_dimension_numbers<[2], [1], [1], [2], [0, 0, 0, 1, 1, 2], [0], [0]>} : vector<2x8x8xf32>, vector<2x8x8xf32>, vector<2x8x8xf32> -> vector<2x8x8xf32>
    "tpu.trace_stop"() : () -> ()
    %194 = vector.shape_cast %193 : vector<2x8x8xf32> to vector<16x8xf32>
    %195 = vector.extract_strided_slice %173 {offsets = [0, 8], sizes = [16, 8], strides = [1, 1]} : vector<16x32xf32> to vector<16x8xf32>
    %196 = vector.shape_cast %195 : vector<16x8xf32> to vector<2x8x8xf32>
    %197 = vector.extract_strided_slice %174 {offsets = [0, 8], sizes = [16, 8], strides = [1, 1]} : vector<16x32xf32> to vector<16x8xf32>
    %198 = vector.shape_cast %197 : vector<16x8xf32> to vector<2x8x8xf32>
    %199 = vector.extract_strided_slice %175 {offsets = [0, 8], sizes = [16, 8], strides = [1, 1]} : vector<16x32xf32> to vector<16x8xf32>
    %200 = vector.shape_cast %199 : vector<16x8xf32> to vector<2x8x8xf32>
    "tpu.trace_start"() <{level = 10 : i32, message = "bqd,bkd->bqk"}> : () -> ()
    %cst_82 = arith.constant dense<0.000000e+00> : vector<2x8x8xf32>
    %201 = tpu.matmul %196, %198, %cst_82 {dimension_numbers = #tpu.dot_dimension_numbers<[2], [2], [1], [1], [0, 0, 0, 1, 1, 1], [0], [0]>} : vector<2x8x8xf32>, vector<2x8x8xf32>, vector<2x8x8xf32> -> vector<2x8x8xf32>
    "tpu.trace_stop"() : () -> ()
    %cst_83 = arith.constant dense<0xFF800000> : vector<2x8xf32>
    %202 = vector.multi_reduction <maximumf>, %201, %cst_83 [2] : vector<2x8x8xf32> to vector<2x8xf32>
    %203 = vector.shape_cast %202 : vector<2x8xf32> to vector<2x8x1xf32>
    %204 = vector.broadcast %203 : vector<2x8x1xf32> to vector<2x8x8xf32>
    %205 = arith.subf %201, %204 : vector<2x8x8xf32>
    %206 = math.exp %205 : vector<2x8x8xf32>
    %cst_84 = arith.constant dense<0.000000e+00> : vector<2x8xf32>
    %207 = vector.multi_reduction <add>, %206, %cst_84 [2] : vector<2x8x8xf32> to vector<2x8xf32>
    %208 = vector.shape_cast %207 : vector<2x8xf32> to vector<2x8x1xf32>
    %209 = tpu.reciprocal %208 {approx = true} : vector<2x8x1xf32> -> vector<2x8x1xf32>
    %210 = vector.broadcast %209 : vector<2x8x1xf32> to vector<2x8x8xf32>
    %211 = arith.mulf %206, %210 : vector<2x8x8xf32>
    "tpu.trace_start"() <{level = 10 : i32, message = "bqk,bkd->bqd"}> : () -> ()
    %cst_85 = arith.constant dense<0.000000e+00> : vector<2x8x8xf32>
    %212 = tpu.matmul %211, %200, %cst_85 {dimension_numbers = #tpu.dot_dimension_numbers<[2], [1], [1], [2], [0, 0, 0, 1, 1, 2], [0], [0]>} : vector<2x8x8xf32>, vector<2x8x8xf32>, vector<2x8x8xf32> -> vector<2x8x8xf32>
    "tpu.trace_stop"() : () -> ()
    %213 = vector.shape_cast %212 : vector<2x8x8xf32> to vector<16x8xf32>
    %214 = vector.extract_strided_slice %173 {offsets = [0, 16], sizes = [16, 8], strides = [1, 1]} : vector<16x32xf32> to vector<16x8xf32>
    %215 = vector.shape_cast %214 : vector<16x8xf32> to vector<2x8x8xf32>
    %216 = vector.extract_strided_slice %174 {offsets = [0, 16], sizes = [16, 8], strides = [1, 1]} : vector<16x32xf32> to vector<16x8xf32>
    %217 = vector.shape_cast %216 : vector<16x8xf32> to vector<2x8x8xf32>
    %218 = vector.extract_strided_slice %175 {offsets = [0, 16], sizes = [16, 8], strides = [1, 1]} : vector<16x32xf32> to vector<16x8xf32>
    %219 = vector.shape_cast %218 : vector<16x8xf32> to vector<2x8x8xf32>
    "tpu.trace_start"() <{level = 10 : i32, message = "bqd,bkd->bqk"}> : () -> ()
    %cst_86 = arith.constant dense<0.000000e+00> : vector<2x8x8xf32>
    %220 = tpu.matmul %215, %217, %cst_86 {dimension_numbers = #tpu.dot_dimension_numbers<[2], [2], [1], [1], [0, 0, 0, 1, 1, 1], [0], [0]>} : vector<2x8x8xf32>, vector<2x8x8xf32>, vector<2x8x8xf32> -> vector<2x8x8xf32>
    "tpu.trace_stop"() : () -> ()
    %cst_87 = arith.constant dense<0xFF800000> : vector<2x8xf32>
    %221 = vector.multi_reduction <maximumf>, %220, %cst_87 [2] : vector<2x8x8xf32> to vector<2x8xf32>
    %222 = vector.shape_cast %221 : vector<2x8xf32> to vector<2x8x1xf32>
    %223 = vector.broadcast %222 : vector<2x8x1xf32> to vector<2x8x8xf32>
    %224 = arith.subf %220, %223 : vector<2x8x8xf32>
    %225 = math.exp %224 : vector<2x8x8xf32>
    %cst_88 = arith.constant dense<0.000000e+00> : vector<2x8xf32>
    %226 = vector.multi_reduction <add>, %225, %cst_88 [2] : vector<2x8x8xf32> to vector<2x8xf32>
    %227 = vector.shape_cast %226 : vector<2x8xf32> to vector<2x8x1xf32>
    %228 = tpu.reciprocal %227 {approx = true} : vector<2x8x1xf32> -> vector<2x8x1xf32>
    %229 = vector.broadcast %228 : vector<2x8x1xf32> to vector<2x8x8xf32>
    %230 = arith.mulf %225, %229 : vector<2x8x8xf32>
    "tpu.trace_start"() <{level = 10 : i32, message = "bqk,bkd->bqd"}> : () -> ()
    %cst_89 = arith.constant dense<0.000000e+00> : vector<2x8x8xf32>
    %231 = tpu.matmul %230, %219, %cst_89 {dimension_numbers = #tpu.dot_dimension_numbers<[2], [1], [1], [2], [0, 0, 0, 1, 1, 2], [0], [0]>} : vector<2x8x8xf32>, vector<2x8x8xf32>, vector<2x8x8xf32> -> vector<2x8x8xf32>
    "tpu.trace_stop"() : () -> ()
    %232 = vector.shape_cast %231 : vector<2x8x8xf32> to vector<16x8xf32>
    %233 = vector.extract_strided_slice %173 {offsets = [0, 24], sizes = [16, 8], strides = [1, 1]} : vector<16x32xf32> to vector<16x8xf32>
    %234 = vector.shape_cast %233 : vector<16x8xf32> to vector<2x8x8xf32>
    %235 = vector.extract_strided_slice %174 {offsets = [0, 24], sizes = [16, 8], strides = [1, 1]} : vector<16x32xf32> to vector<16x8xf32>
    %236 = vector.shape_cast %235 : vector<16x8xf32> to vector<2x8x8xf32>
    %237 = vector.extract_strided_slice %175 {offsets = [0, 24], sizes = [16, 8], strides = [1, 1]} : vector<16x32xf32> to vector<16x8xf32>
    %238 = vector.shape_cast %237 : vector<16x8xf32> to vector<2x8x8xf32>
    "tpu.trace_start"() <{level = 10 : i32, message = "bqd,bkd->bqk"}> : () -> ()
    %cst_90 = arith.constant dense<0.000000e+00> : vector<2x8x8xf32>
    %239 = tpu.matmul %234, %236, %cst_90 {dimension_numbers = #tpu.dot_dimension_numbers<[2], [2], [1], [1], [0, 0, 0, 1, 1, 1], [0], [0]>} : vector<2x8x8xf32>, vector<2x8x8xf32>, vector<2x8x8xf32> -> vector<2x8x8xf32>
    "tpu.trace_stop"() : () -> ()
    %cst_91 = arith.constant dense<0xFF800000> : vector<2x8xf32>
    %240 = vector.multi_reduction <maximumf>, %239, %cst_91 [2] : vector<2x8x8xf32> to vector<2x8xf32>
    %241 = vector.shape_cast %240 : vector<2x8xf32> to vector<2x8x1xf32>
    %242 = vector.broadcast %241 : vector<2x8x1xf32> to vector<2x8x8xf32>
    %243 = arith.subf %239, %242 : vector<2x8x8xf32>
    %244 = math.exp %243 : vector<2x8x8xf32>
    %cst_92 = arith.constant dense<0.000000e+00> : vector<2x8xf32>
    %245 = vector.multi_reduction <add>, %244, %cst_92 [2] : vector<2x8x8xf32> to vector<2x8xf32>
    %246 = vector.shape_cast %245 : vector<2x8xf32> to vector<2x8x1xf32>
    %247 = tpu.reciprocal %246 {approx = true} : vector<2x8x1xf32> -> vector<2x8x1xf32>
    %248 = vector.broadcast %247 : vector<2x8x1xf32> to vector<2x8x8xf32>
    %249 = arith.mulf %244, %248 : vector<2x8x8xf32>
    "tpu.trace_start"() <{level = 10 : i32, message = "bqk,bkd->bqd"}> : () -> ()
    %cst_93 = arith.constant dense<0.000000e+00> : vector<2x8x8xf32>
    %250 = tpu.matmul %249, %238, %cst_93 {dimension_numbers = #tpu.dot_dimension_numbers<[2], [1], [1], [2], [0, 0, 0, 1, 1, 2], [0], [0]>} : vector<2x8x8xf32>, vector<2x8x8xf32>, vector<2x8x8xf32> -> vector<2x8x8xf32>
    "tpu.trace_stop"() : () -> ()
    %251 = vector.shape_cast %250 : vector<2x8x8xf32> to vector<16x8xf32>
    %252 = tpu.concatenate %194, %213, %232, %251 in 1 : vector<16x8xf32>, vector<16x8xf32>, vector<16x8xf32>, vector<16x8xf32> -> vector<16x32xf32>
    %c1_94 = arith.constant 1 : index
    %c0_95 = arith.constant 0 : index
    %c0_96 = arith.constant 0 : index
    %253 = vector.load %arg5[%c1_94, %c0_95, %c0_96] : memref<2x32x32xf32, #tpu.memory_space<vmem>>, vector<1x32x32xf32>
    %254 = vector.shape_cast %253 : vector<1x32x32xf32> to vector<32x32xf32>
    %cst_97 = arith.constant dense<0.000000e+00> : vector<16x32xf32>
    %255 = tpu.matmul %252, %254, %cst_97 {dimension_numbers = #tpu.dot_dimension_numbers<[1], [0], [0], [1], [0, 0, 1, 1], [], []>} : vector<16x32xf32>, vector<32x32xf32>, vector<16x32xf32> -> vector<16x32xf32>
    %c1_98 = arith.constant 1 : index
    %c0_99 = arith.constant 0 : index
    %c0_100 = arith.constant 0 : index
    %256 = vector.load %arg6[%c1_98, %c0_99, %c0_100] : memref<2x1x32xf32, #tpu.memory_space<vmem>>, vector<1x1x32xf32>
    %257 = vector.shape_cast %256 : vector<1x1x32xf32> to vector<1x32xf32>
    %258 = vector.broadcast %257 : vector<1x32xf32> to vector<16x32xf32>
    %259 = arith.addf %255, %258 : vector<16x32xf32>
    %260 = arith.addf %165, %259 : vector<16x32xf32>
    %c1_101 = arith.constant 1 : index
    %c0_102 = arith.constant 0 : index
    %c0_103 = arith.constant 0 : index
    %261 = vector.load %arg7[%c1_101, %c0_102, %c0_103] : memref<2x1x32xf32, #tpu.memory_space<vmem>>, vector<1x1x32xf32>
    %262 = vector.shape_cast %261 : vector<1x1x32xf32> to vector<1x32xf32>
    %c1_104 = arith.constant 1 : index
    %c0_105 = arith.constant 0 : index
    %c0_106 = arith.constant 0 : index
    %263 = vector.load %arg8[%c1_104, %c0_105, %c0_106] : memref<2x1x32xf32, #tpu.memory_space<vmem>>, vector<1x1x32xf32>
    %264 = vector.shape_cast %263 : vector<1x1x32xf32> to vector<1x32xf32>
    %cst_107 = arith.constant dense<0.000000e+00> : vector<16xf32>
    %265 = vector.multi_reduction <add>, %260, %cst_107 [1] : vector<16x32xf32> to vector<16xf32>
    %266 = vector.shape_cast %265 : vector<16xf32> to vector<16x1xf32>
    %cst_108 = arith.constant 3.200000e+01 : f32
    %267 = vector.broadcast %cst_108 : f32 to vector<16x1xf32>
    %268 = arith.divf %266, %267 : vector<16x1xf32>
    %269 = vector.broadcast %268 : vector<16x1xf32> to vector<16x32xf32>
    %270 = arith.subf %260, %269 : vector<16x32xf32>
    %271 = arith.mulf %270, %270 : vector<16x32xf32>
    %cst_109 = arith.constant dense<0.000000e+00> : vector<16xf32>
    %272 = vector.multi_reduction <add>, %271, %cst_109 [1] : vector<16x32xf32> to vector<16xf32>
    %273 = vector.shape_cast %272 : vector<16xf32> to vector<16x1xf32>
    %cst_110 = arith.constant 3.200000e+01 : f32
    %274 = vector.broadcast %cst_110 : f32 to vector<16x1xf32>
    %275 = arith.divf %273, %274 : vector<16x1xf32>
    %cst_111 = arith.constant 9.99999974E-6 : f32
    %276 = vector.broadcast %cst_111 : f32 to vector<16x1xf32>
    %277 = arith.addf %275, %276 : vector<16x1xf32>
    %278 = math.rsqrt %277 : vector<16x1xf32>
    %279 = vector.broadcast %278 : vector<16x1xf32> to vector<16x32xf32>
    %280 = arith.mulf %270, %279 : vector<16x32xf32>
    %281 = vector.broadcast %262 : vector<1x32xf32> to vector<16x32xf32>
    %282 = arith.mulf %280, %281 : vector<16x32xf32>
    %283 = vector.broadcast %264 : vector<1x32xf32> to vector<16x32xf32>
    %284 = arith.addf %282, %283 : vector<16x32xf32>
    %c1_112 = arith.constant 1 : index
    %c0_113 = arith.constant 0 : index
    %c0_114 = arith.constant 0 : index
    %285 = vector.load %arg9[%c1_112, %c0_113, %c0_114] : memref<2x32x2048xf32, #tpu.memory_space<vmem>>, vector<1x32x2048xf32>
    %286 = vector.shape_cast %285 : vector<1x32x2048xf32> to vector<32x2048xf32>
    %cst_115 = arith.constant dense<0.000000e+00> : vector<16x2048xf32>
    %287 = tpu.matmul %284, %286, %cst_115 {dimension_numbers = #tpu.dot_dimension_numbers<[1], [0], [0], [1], [0, 0, 1, 1], [], []>} : vector<16x32xf32>, vector<32x2048xf32>, vector<16x2048xf32> -> vector<16x2048xf32>
    %c1_116 = arith.constant 1 : index
    %c0_117 = arith.constant 0 : index
    %c0_118 = arith.constant 0 : index
    %288 = vector.load %arg10[%c1_116, %c0_117, %c0_118] : memref<2x1x2048xf32, #tpu.memory_space<vmem>>, vector<1x1x2048xf32>
    %289 = vector.shape_cast %288 : vector<1x1x2048xf32> to vector<1x2048xf32>
    %290 = vector.broadcast %289 : vector<1x2048xf32> to vector<16x2048xf32>
    %291 = arith.addf %287, %290 : vector<16x2048xf32>
    %cst_119 = arith.constant 0.000000e+00 : f32
    %292 = vector.broadcast %cst_119 : f32 to vector<16x2048xf32>
    %293 = arith.maximumf %291, %292 : vector<16x2048xf32>
    %c1_120 = arith.constant 1 : index
    %c0_121 = arith.constant 0 : index
    %c0_122 = arith.constant 0 : index
    %294 = vector.load %arg11[%c1_120, %c0_121, %c0_122] : memref<2x2048x32xf32, #tpu.memory_space<vmem>>, vector<1x2048x32xf32>
    %295 = vector.shape_cast %294 : vector<1x2048x32xf32> to vector<2048x32xf32>
    %cst_123 = arith.constant dense<0.000000e+00> : vector<16x32xf32>
    %296 = tpu.matmul %293, %295, %cst_123 {dimension_numbers = #tpu.dot_dimension_numbers<[1], [0], [0], [1], [0, 0, 1, 1], [], []>} : vector<16x2048xf32>, vector<2048x32xf32>, vector<16x32xf32> -> vector<16x32xf32>
    %c1_124 = arith.constant 1 : index
    %c0_125 = arith.constant 0 : index
    %c0_126 = arith.constant 0 : index
    %297 = vector.load %arg12[%c1_124, %c0_125, %c0_126] : memref<2x1x32xf32, #tpu.memory_space<vmem>>, vector<1x1x32xf32>
    %298 = vector.shape_cast %297 : vector<1x1x32xf32> to vector<1x32xf32>
    %299 = vector.broadcast %298 : vector<1x32xf32> to vector<16x32xf32>
    %300 = arith.addf %296, %299 : vector<16x32xf32>
    %301 = arith.addf %284, %300 : vector<16x32xf32>
    %c1_127 = arith.constant 1 : index
    %c0_128 = arith.constant 0 : index
    %c0_129 = arith.constant 0 : index
    %302 = vector.load %arg13[%c1_127, %c0_128, %c0_129] : memref<2x1x32xf32, #tpu.memory_space<vmem>>, vector<1x1x32xf32>
    %303 = vector.shape_cast %302 : vector<1x1x32xf32> to vector<1x32xf32>
    %c1_130 = arith.constant 1 : index
    %c0_131 = arith.constant 0 : index
    %c0_132 = arith.constant 0 : index
    %304 = vector.load %arg14[%c1_130, %c0_131, %c0_132] : memref<2x1x32xf32, #tpu.memory_space<vmem>>, vector<1x1x32xf32>
    %305 = vector.shape_cast %304 : vector<1x1x32xf32> to vector<1x32xf32>
    %cst_133 = arith.constant dense<0.000000e+00> : vector<16xf32>
    %306 = vector.multi_reduction <add>, %301, %cst_133 [1] : vector<16x32xf32> to vector<16xf32>
    %307 = vector.shape_cast %306 : vector<16xf32> to vector<16x1xf32>
    %cst_134 = arith.constant 3.200000e+01 : f32
    %308 = vector.broadcast %cst_134 : f32 to vector<16x1xf32>
    %309 = arith.divf %307, %308 : vector<16x1xf32>
    %310 = vector.broadcast %309 : vector<16x1xf32> to vector<16x32xf32>
    %311 = arith.subf %301, %310 : vector<16x32xf32>
    %312 = arith.mulf %311, %311 : vector<16x32xf32>
    %cst_135 = arith.constant dense<0.000000e+00> : vector<16xf32>
    %313 = vector.multi_reduction <add>, %312, %cst_135 [1] : vector<16x32xf32> to vector<16xf32>
    %314 = vector.shape_cast %313 : vector<16xf32> to vector<16x1xf32>
    %cst_136 = arith.constant 3.200000e+01 : f32
    %315 = vector.broadcast %cst_136 : f32 to vector<16x1xf32>
    %316 = arith.divf %314, %315 : vector<16x1xf32>
    %cst_137 = arith.constant 9.99999974E-6 : f32
    %317 = vector.broadcast %cst_137 : f32 to vector<16x1xf32>
    %318 = arith.addf %316, %317 : vector<16x1xf32>
    %319 = math.rsqrt %318 : vector<16x1xf32>
    %320 = vector.broadcast %319 : vector<16x1xf32> to vector<16x32xf32>
    %321 = arith.mulf %311, %320 : vector<16x32xf32>
    %322 = vector.broadcast %303 : vector<1x32xf32> to vector<16x32xf32>
    %323 = arith.mulf %321, %322 : vector<16x32xf32>
    %324 = vector.broadcast %305 : vector<1x32xf32> to vector<16x32xf32>
    %325 = arith.addf %323, %324 : vector<16x32xf32>
    %c0_138 = arith.constant 0 : index
    %c0_139 = arith.constant 0 : index
    %326 = vector.load %arg15[%c0_138, %c0_139] : memref<32x10xf32, #tpu.memory_space<vmem>>, vector<32x10xf32>
    %cst_140 = arith.constant dense<0.000000e+00> : vector<16x10xf32>
    %327 = tpu.matmul %325, %326, %cst_140 {dimension_numbers = #tpu.dot_dimension_numbers<[1], [0], [0], [1], [0, 0, 1, 1], [], []>} : vector<16x32xf32>, vector<32x10xf32>, vector<16x10xf32> -> vector<16x10xf32>
    %c0_141 = arith.constant 0 : index
    %c0_142 = arith.constant 0 : index
    %328 = vector.load %arg16[%c0_141, %c0_142] : memref<1x10xf32, #tpu.memory_space<vmem>>, vector<1x10xf32>
    %329 = vector.broadcast %328 : vector<1x10xf32> to vector<16x10xf32>
    %330 = arith.addf %327, %329 : vector<16x10xf32>
    %331 = vector.extract_strided_slice %330 {offsets = [0, 0], sizes = [16, 3], strides = [1, 1]} : vector<16x10xf32> to vector<16x3xf32>
    %332 = arith.negf %331 : vector<16x3xf32>
    %333 = math.exp %332 : vector<16x3xf32>
    %cst_143 = arith.constant 1.000000e+00 : f32
    %334 = vector.broadcast %cst_143 : f32 to vector<16x3xf32>
    %335 = arith.addf %334, %333 : vector<16x3xf32>
    %336 = arith.divf %334, %335 : vector<16x3xf32>
    %337 = vector.extract_strided_slice %330 {offsets = [0, 3], sizes = [16, 3], strides = [1, 1]} : vector<16x10xf32> to vector<16x3xf32>
    %cst_144 = arith.constant dense<0xFF800000> : vector<16xf32>
    %338 = vector.multi_reduction <maximumf>, %337, %cst_144 [1] : vector<16x3xf32> to vector<16xf32>
    %339 = vector.shape_cast %338 : vector<16xf32> to vector<16x1xf32>
    %340 = vector.broadcast %339 : vector<16x1xf32> to vector<16x3xf32>
    %341 = arith.subf %337, %340 : vector<16x3xf32>
    %342 = math.exp %341 : vector<16x3xf32>
    %cst_145 = arith.constant dense<0.000000e+00> : vector<16xf32>
    %343 = vector.multi_reduction <add>, %342, %cst_145 [1] : vector<16x3xf32> to vector<16xf32>
    %344 = vector.shape_cast %343 : vector<16xf32> to vector<16x1xf32>
    %345 = tpu.reciprocal %344 : vector<16x1xf32> -> vector<16x1xf32>
    %346 = vector.broadcast %345 : vector<16x1xf32> to vector<16x3xf32>
    %347 = arith.mulf %342, %346 : vector<16x3xf32>
    %348 = vector.extract_strided_slice %330 {offsets = [0, 6], sizes = [16, 4], strides = [1, 1]} : vector<16x10xf32> to vector<16x4xf32>
    %cst_146 = arith.constant dense<0xFF800000> : vector<16xf32>
    %349 = vector.multi_reduction <maximumf>, %348, %cst_146 [1] : vector<16x4xf32> to vector<16xf32>
    %350 = vector.shape_cast %349 : vector<16xf32> to vector<16x1xf32>
    %351 = vector.broadcast %350 : vector<16x1xf32> to vector<16x4xf32>
    %352 = arith.subf %348, %351 : vector<16x4xf32>
    %353 = math.exp %352 : vector<16x4xf32>
    %cst_147 = arith.constant dense<0.000000e+00> : vector<16xf32>
    %354 = vector.multi_reduction <add>, %353, %cst_147 [1] : vector<16x4xf32> to vector<16xf32>
    %355 = vector.shape_cast %354 : vector<16xf32> to vector<16x1xf32>
    %356 = tpu.reciprocal %355 : vector<16x1xf32> -> vector<16x1xf32>
    %357 = vector.broadcast %356 : vector<16x1xf32> to vector<16x4xf32>
    %358 = arith.mulf %353, %357 : vector<16x4xf32>
    %359 = tpu.concatenate %336, %347, %358 in 1 : vector<16x3xf32>, vector<16x3xf32>, vector<16x4xf32> -> vector<16x10xf32>
    %c0_148 = arith.constant 0 : index
    %c0_149 = arith.constant 0 : index
    %360 = vector.load %arg17[%c0_148, %c0_149] : memref<16x10xf32, #tpu.memory_space<vmem>>, vector<16x10xf32>
    tpu.vector_store %arg17[%c0_148, %c0_149], %359 {strides = array<i32>} : memref<16x10xf32, #tpu.memory_space<vmem>>, vector<16x10xf32>,
    return
  }
}

</mosaic_0001>

<bundles_post_ra>
// kernel: model_1_forward.1
= control target key start
LH: loop header
LB: loop body
LE: loop exit
PB: predicated region body
PF: predicated region fallthrough
CT: control target
= control target key end

     0   :  { %vm77_vm0 = vcmask 760832   ;;  %vm84_vm1 = vcmask 1044480   ;;  %vm9173_vm2 = vmmov 1   ;;  %vm174_vm4 = vcmask 261120   ;;  %s9176_s21 = smov 96   ;;  %s9177_s22 = smov 64   ;;  %s12138_s1 = inlined_call_operand.vmem [shape: f32[93,32], index: 1, kind: input, shape index: {}]   ;;  %s12139_s0 = inlined_call_operand.vmem [shape: f32[16,93], index: 0, kind: input, shape index: {}]   ;;  %s12140_s3 = inlined_call_operand.vmem [shape: f32[2,32,96], index: 3, kind: input, shape index: {}]   ;;  %s12141_s2 = inlined_call_operand.vmem [shape: f32[1,32], index: 2, kind: input, shape index: {}]   ;;  %s12142_s4 = inlined_call_operand.vmem [shape: f32[2,1,96], index: 4, kind: input, shape index: {}]   ;;  %s12143_s5 = inlined_call_operand.vmem [shape: f32[2,32,32], index: 5, kind: input, shape index: {}]   ;;  %s12144_s6 = inlined_call_operand.vmem [shape: f32[2,1,32], index: 6, kind: input, shape index: {}]   ;;  %s12145_s9 = inlined_call_operand.vmem [shape: f32[2,32,2048], index: 9, kind: input, shape index: {}]   ;;  %s12146_s7 = inlined_call_operand.vmem [shape: f32[2,1,32], index: 7, kind: input, shape index: {}]   ;;  %s12147_s8 = inlined_call_operand.vmem [shape: f32[2,1,32], index: 8, kind: input, shape index: {}]   ;;  %s12148_s11 = inlined_call_operand.vmem [shape: f32[2,2048,32], index: 11, kind: input, shape index: {}]   ;;  %s12149_s10 = inlined_call_operand.vmem [shape: f32[2,1,2048], index: 10, kind: input, shape index: {}]   ;;  %s12150_s12 = inlined_call_operand.vmem [shape: f32[2,1,32], index: 12, kind: input, shape index: {}]   ;;  %s12151_s13 = inlined_call_operand.vmem [shape: f32[2,1,32], index: 13, kind: input, shape index: {}]   ;;  %s12152_s14 = inlined_call_operand.vmem [shape: f32[2,1,32], index: 14, kind: input, shape index: {}]   ;;  %s12153_s15 = inlined_call_operand.vmem [shape: f32[32,10], index: 15, kind: input, shape index: {}]   ;;  %s12154_s16 = inlined_call_operand.vmem [shape: f32[1,10], index: 16, kind: input, shape index: {}]   ;;  %s12155_s17 = inlined_call_operand.vmem [shape: f32[16,10], index: 17, kind: output, shape index: {}]  }
   0x1   :  { %12178 = sst [smem:[#allocation2_spill]] %s12138_s1  ;;  %v163_v10 = vld [vmem:[%s12140_s3] sm:$0xff]  ;;  %v164_v11 = vld [vmem:[%s12140_s3 + $0x8] sm:$0xff]  ;;  %vm8365_vm3 = vmpackc.low %vm84_vm1, %vm9173_vm2  ;;  %v9174_v31 = vmov 0.0   ;;  %vm9175_vm5 = vmmov 0   ;;  %vm259_vm6 = vcmask 64512  }
   0x2   :  { %12179 = sst [smem:[#allocation3_spill]] %s12139_s0  ;;  %s12180_s26 = sld [smem:[#allocation2_spill]]  ;;  %v8370_v14 = vpack.c.bf16 %v164_v11, %v163_v10  ;;  %v165_v23 = vld [vmem:[%s12140_s3 + $0x10] sm:$0xff]  ;;  %v166_v24 = vld [vmem:[%s12140_s3 + $0x18] sm:$0xff]  ;;  %v6938_v26 = vld [vmem:[%s12141_s2] ss:$0 sm:$0xff] }
   0x3   :  { %s12181_s24 = sld [smem:[#allocation3_spill]]  ;;  %v8374_v25 = vpack.c.bf16 %v166_v24, %v165_v23  ;;  %v6942_v32 = vld [vmem:[%s12142_s4] ss:$0 sm:$0xff]  ;;  %s9178_s23 = smov 88   ;;  %vm1604_vm7 = vcmask 195584   ;;  %vm1601_vm8 = vcmask 130048  }
   0x4   :  { %8371 = vmatprep.subr.bf16.mxu1 %v8370_v14  ;;  %s9179_s25 = smov 120   ;;  %s12176_s27 = smov 56   ;;  %vm6862_vm9 = vcmask 48152   ;;  %vm6894_vm10 = vcmask 80944   ;;  %vm6883_vm11 = vcmask 23552   ;;  %vm6915_vm12 = vcmask 31744  }
   0x5   :  { %8373 = vmatpush3.bf16.msra.mxu1 %v8370_v14  ;;  %s12172_s28 = smov 112   ;;  %s12174_s29 = smov 80   ;;  %vm6928_vm13 = vcmask 48128   ;;  %vm6931_vm14 = vcmask 80896  }
   0x6   :  { %8375 = vmatprep.subr.bf16.mxu1 %v8374_v25  ;;  %s12170_s1 = smov 48   ;;  %s12166_s30 = smov 72  }
   0x7   :  { %s12164_s18 = smov 104   ;;  %s12160_s19 = smov 8  }
   0x8   :  { %v58_v0 = vld [vmem:[%s12180_s26] sm:$0xff]  ;;  %v59_v1 = vld [vmem:[%s12180_s26 + $0x8] sm:$0xff]  ;;  %v60_v2 = vld [vmem:[%s12180_s26 + $0x10] sm:$0xff]  ;;  %s12158_s0 = smov 16   ;;  %s12168_s20 = smov 24  }
   0x9   :  { %v8344_v3 = vpack.c.bf16 %v59_v1, %v58_v0  ;;  %v61_v4 = vld [vmem:[%s12180_s26 + $0x18] sm:$0xff]  ;;  %v62_v6 = vld [vmem:[%s12180_s26 + $0x20] sm:$0xff]  ;;  %v63_v7 = vld [vmem:[%s12180_s26 + $0x28] sm:$0xff]  ;;  %8377 = vmatpush3.bf16.msra.mxu1 %v8374_v25 }
   0xa   :  { %v8348_v5 = vpack.c.bf16 %v61_v4, %v60_v2  ;;  %v56_v8 = vld [vmem:[%s12181_s24] sm:$0xff]  ;;  %v8352_v9 = vpack.c.bf16 %v63_v7, %v62_v6  ;;  %v64_v12 = vld [vmem:[%s12180_s26 + $0x30] sm:$0xff]  ;;  %v65_v13 = vld [vmem:[%s12180_s26 + $0x38] sm:$0xff]  ;;  %8140 = vmatprep.subr.mxu1 %v9174_v31 }
   0xb   :  { %8345 = vmatprep.subr.bf16.mxu0 %v8344_v3  ;;  %8126 = vmatprep.mubr.msk.f32.mxu0 %vm77_vm0, %v56_v8  ;;  %v8356_v15 = vpack.c.bf16 %v65_v13, %v64_v12  ;;  %v66_v16 = vld [vmem:[%s12180_s26 + $0x40] sm:$0xff]  ;;  %v67_v17 = vld [vmem:[%s12180_s26 + $0x48] sm:$0xff]  ;;  %v68_v19 = vld [vmem:[%s12180_s26 + $0x50] sm:$0xff] }
   0xc   :  { %8347 = vmatpush3.bf16.msra.mxu0 %v8344_v3  ;;  %v8360_v18 = vpack.c.bf16 %v67_v17, %v66_v16  ;;  %v69_v20 = vld [vmem:[%s12180_s26 + $0x58] sm:$0x1f]  ;;  %v57_v22 = vld [vmem:[%s12181_s24 + $0x8] sm:$0xff]  ;;  %s12162_s26 = smov 40  }
   0xd   :  { %8349 = vmatprep.subr.bf16.mxu0 %v8348_v5  ;;  %v8364_v21 = vpack.c.bf16 %v69_v20, %v68_v19 }
  0x10   :  { %8351 = vmatpush3.bf16.msra.mxu0 %v8348_v5 }
  0x11   :  { %8353 = vmatprep.subr.bf16.mxu0 %v8352_v9 }
  0x14   :  { %8355 = vmatpush3.bf16.msra.mxu0 %v8352_v9 }
  0x15   :  { %8357 = vmatprep.subr.bf16.mxu0 %v8356_v15 }
  0x18   :  { %8359 = vmatpush3.bf16.msra.mxu0 %v8356_v15 }
  0x19   :  { %8361 = vmatprep.subr.bf16.mxu0 %v8360_v18 }
  0x1c   :  { %8363 = vmatpush3.bf16.msra.mxu0 %v8360_v18 }
  0x1d   :  { %8366 = vmatprep.subr.msk.bf16.mxu0 %vm8365_vm3, %v8364_v21 }
  0x20   :  { %8369 = vmatpush3.bf16.msk.msra.mxu0 %vm8365_vm3, %v8364_v21 }
  0x21   :  { %8160 = vmatprep.subr.mxu0 %v9174_v31 }
  0x23   :  { %8127 = vmatmul.mubr.msk.f32.vlgmr.msra.gmra.mrb[0].mxu0 %vm77_vm0, %v57_v22 }
  0x24   :  { %8162 = vmatprep.mubr.msk.f32.mxu0 %vm9175_vm5, %v9174_v31 }
  0xf6   :  { %v8128_v27 = vpop.f32.mrb[0].mxu0 }
  0xf7   :  { %v154_v28 = vpop.f32.mrb[1].mxu0  ;;  %v9343_v30 = vadd.f32 %v8128_v27, %v6938_v26 }
  0xf8   :  { %v9341_v29 = vadd.f32 %v6938_v26, %v154_v28 }
  0xfa   :  { %8137 = vmatprep.mubr.msk.f32.mxu1 %vm174_vm4, %v9341_v29 }
  0xfb   :  { %8138 = vmatmul.mubr.msk.f32.vlgmr.msra.gmra.mrb[0].mxu1 %vm174_vm4, %v9343_v30 }
  0xfc   :  { %8142 = vmatprep.mubr.msk.f32.mxu1 %vm9175_vm5, %v9174_v31 }
 0x1ce   :  { %v8139_v33 = vpop.f32.mrb[0].mxu1 }
 0x1cf   :  { %v247_v34 = vpop.f32.mrb[1].mxu1  ;;  %v9362_v36 = vadd.f32 %v8139_v33, %v6942_v32 }
 0x1d0   :  { %v9358_v35 = vadd.f32 %v6942_v32, %v247_v34 }
 0x1d2   :  { %257 = vrot.lane.b32.xlu0 %v9358_v35, %s9176_s21 }
 0x1d6   :  { %335 = vrot.lane.b32.xlu0 %v9362_v36, %s9176_s21 }
 0x244   :  { %v258_v37 = vpop.permute.xlu0 %257 }
 0x245   :  { %8141 = vmatpush3.xpose.msk.msra.mxu1 %vm259_vm6, %v258_v37 }
 0x246   :  { %8145 = vmatprep.subr.mxu1 %v9174_v31 }
 0x248   :  { %8143 = vmatmul.mubr.msk.f32.vlgmr.msra.gmra.mrb[2].mxu1 %vm259_vm6, %v9358_v35  ;;  %v336_v38 = vpop.permute.xlu0 %335 }
 0x249   :  { %8146 = vmatpush3.xpose.msk.msra.mxu1 %vm259_vm6, %v336_v38  ;;  %8147 = vmatprep.mubr.msk.f32.mxu1 %vm9175_vm5, %v9174_v31 }
 0x24a   :  { %8150 = vmatprep.subr.mxu1 %v9174_v31 }
 0x24c   :  { %8148 = vmatmul.mubr.msk.f32.vlgmr.msra.gmra.mrb[4].mxu1 %vm259_vm6, %v9362_v36 }
 0x24d   :  { %8152 = vmatprep.mubr.msk.f32.mxu1 %vm9175_vm5, %v9174_v31 }
 0x31b   :  { %v330_v39 = vpop.f32.mrb[2].mxu1 }
 0x31c   :  { %v8144_v40 = vpop.f32.mrb[3].mxu1  ;;  %v411_v41 = vsel %vm259_vm6, %v330_v39, -inf }
 0x31d   :  { %412 = vmax.xlane.f32.xlu1 %v411_v41 }
 0x31f   :  { %v407_v42 = vpop.f32.mrb[4].mxu1 }
 0x320   :  { %v8149_v43 = vpop.f32.mrb[5].mxu1  ;;  %v414_v44 = vsel %vm259_vm6, %v407_v42, -inf }
 0x321   :  { %415 = vmax.xlane.f32.xlu1 %v414_v44 }
 0x332   :  { %433 = vrot.lane.b32.xlu1 %v9358_v35, %s9177_s22 }
 0x336   :  { %509 = vrot.lane.b32.xlu1 %v9362_v36, %s9177_s22 }
 0x33a   :  { %587 = vrot.lane.b32.xlu1 %v9358_v35, %s9178_s23 }
 0x33e   :  { %665 = vrot.lane.b32.xlu1 %v9362_v36, %s9178_s23 }
 0x3aa   :  { %v413_v45 = vpop.xlane.xlu1 %412 }
 0x3ab   :  { %v417_v46 = vsub.f32 %v330_v39, %v413_v45 }
 0x3ad   :  { %v419_v47 = vmul.f32 1.442695, %v417_v46 }
 0x3ae   :  { %v416_v48 = vpop.xlane.xlu1 %415 }
 0x3af   :  { %9069 = vpow2.f32 %v419_v47  ;;  %v418_v49 = vsub.f32 %v407_v42, %v416_v48 }
 0x3b1   :  { %v421_v50 = vmul.f32 1.442695, %v418_v49 }
 0x3b2   :  { %v434_v51 = vpop.permute.xlu1 %433 }
 0x3b3   :  { %9071 = vpow2.f32 %v421_v50  ;;  %8151 = vmatpush3.msra.mxu1 %v434_v51 }
 0x3b4   :  { %8155 = vmatprep.subr.mxu1 %v9174_v31 }
 0x3b6   :  { %v510_v52 = vpop.permute.xlu1 %509 }
 0x3b9   :  { %v9070_v53 = vpop.eup %9069 }
 0x3ba   :  { %v588_v54 = vpop.permute.xlu1 %587  ;;  %v423_v55 = vsel %vm259_vm6, %v9070_v53, 0.0 }
 0x3bb   :  { %424 = vadd.xlane.f32.xlu0 %v423_v55  ;;  %8161 = vmatpush3.xpose.msk.msra.mxu0 %vm259_vm6, %v588_v54 }
 0x3bc   :  { %8170 = vmatprep.subr.mxu0 %v9174_v31 }
 0x3bd   :  { %v9072_v56 = vpop.eup %9071 }
 0x3be   :  { %v426_v57 = vsel %vm259_vm6, %v9072_v56, 0.0  ;;  %v666_v58 = vpop.permute.xlu1 %665 }
 0x3bf   :  { %427 = vadd.xlane.f32.xlu1 %v426_v57 }
 0x3d0   :  { %663 = vrot.lane.b32.xlu1 %v9362_v36, %s9179_s25 }
 0x3d1   :  { %585 = vrot.lane.b32.xlu0 %v9358_v35, %s9179_s25 }
 0x448   :  { %v425_v59 = vpop.xlane.xlu0 %424 }
 0x449   :  { %9073 = vrcp.f32 %v425_v59 }
 0x44c   :  { %v428_v60 = vpop.xlane.xlu1 %427  ;;  %v586_v61 = vpop.permute.xlu0 %585 }
 0x44d   :  { %9075 = vrcp.f32 %v428_v60  ;;  %8163 = vmatmul.mubr.msk.f32.vlgmr.msra.gmra.mrb[2].mxu0 %vm259_vm6, %v586_v61 }
 0x44e   :  { %8172 = vmatprep.mubr.msk.f32.mxu0 %vm9175_vm5, %v9174_v31 }
 0x450   :  { %v664_v2 = vpop.permute.xlu1 %663 }
 0x453   :  { %v9074_v62 = vpop.eup %9073 }
 0x454   :  { %v431_v63 = vmul.f32 %v9074_v62, %v9070_v53 }
 0x456   :  { %8153 = vmatmul.mubr.msk.f32.vlgmr.msra.gmra.mrb[6].mxu1 %vm259_vm6, %v431_v63 }
 0x457   :  { %v9076_v0 = vpop.eup %9075  ;;  %8156 = vmatpush3.msra.mxu1 %v510_v52  ;;  %8157 = vmatprep.mubr.msk.f32.mxu1 %vm9175_vm5, %v9174_v31 }
 0x458   :  { %v432_v1 = vmul.f32 %v9076_v0, %v9072_v56  ;;  %8165 = vmatprep.subr.mxu1 %v9174_v31 }
 0x45a   :  { %8158 = vmatmul.mubr.msk.f32.vlgmr.msra.gmra.mrb[8].mxu1 %vm259_vm6, %v432_v1 }
 0x45b   :  { %8167 = vmatprep.mubr.msk.f32.mxu1 %vm9175_vm5, %v9174_v31 }
 0x45e   :  { %8166 = vmatpush3.xpose.msk.msra.mxu1 %vm259_vm6, %v666_v58 }
 0x45f   :  { %8175 = vmatprep.subr.mxu1 %v9174_v31 }
 0x461   :  { %8168 = vmatmul.mubr.msk.f32.vlgmr.msra.gmra.mrb[10].mxu1 %vm259_vm6, %v664_v2 }
 0x462   :  { %8177 = vmatprep.mubr.msk.f32.mxu1 %vm9175_vm5, %v9174_v31 }
 0x520   :  { %v659_v3 = vpop.f32.mrb[2].mxu0 }
 0x521   :  { %v8164_v4 = vpop.f32.mrb[3].mxu0  ;;  %v741_v5 = vsel %vm259_vm6, %v659_v3, -inf }
 0x522   :  { %742 = vmax.xlane.f32.xlu1 %v741_v5 }
 0x529   :  { %v9413_v6 = vpop.f32.mrb[6].mxu1 }
 0x52a   :  { %v8154_v7 = vpop.f32.mrb[7].mxu1 }
 0x52d   :  { %v9415_v8 = vpop.f32.mrb[8].mxu1 }
 0x52e   :  { %v8159_v9 = vpop.f32.mrb[9].mxu1 }
 0x534   :  { %v737_v10 = vpop.f32.mrb[10].mxu1 }
 0x535   :  { %v8169_v11 = vpop.f32.mrb[11].mxu1  ;;  %v744_v12 = vsel %vm259_vm6, %v737_v10, -inf }
 0x536   :  { %745 = vmax.xlane.f32.xlu0 %v744_v12 }
 0x54c   :  { %839 = vrot.lane.b32.xlu0 %v9362_v36, %s12176_s27 }
 0x550   :  { %915 = vrot.lane.b32.xlu0 %v9358_v35, %s12172_s28 }
 0x5af   :  { %v743_v13 = vpop.xlane.xlu1 %742 }
 0x5b0   :  { %v747_v14 = vsub.f32 %v659_v3, %v743_v13 }
 0x5b2   :  { %v749_v15 = vmul.f32 1.442695, %v747_v14 }
 0x5b4   :  { %9077 = vpow2.f32 %v749_v15 }
 0x5be   :  { %v9078_v16 = vpop.eup %9077 }
 0x5bf   :  { %v753_v17 = vsel %vm259_vm6, %v9078_v16, 0.0 }
 0x5c0   :  { %754 = vadd.xlane.f32.xlu1 %v753_v17 }
 0x5c3   :  { %v746_v18 = vpop.xlane.xlu0 %745 }
 0x5c4   :  { %v748_v20 = vsub.f32 %v737_v10, %v746_v18 }
 0x5c6   :  { %v751_v21 = vmul.f32 1.442695, %v748_v20 }
 0x5c7   :  { %v840_v19 = vpop.permute.xlu0 %839 }
 0x5c8   :  { %8176 = vmatpush3.msra.mxu1 %v840_v19  ;;  %9079 = vpow2.f32 %v751_v21 }
 0x5c9   :  { %8185 = vmatprep.subr.mxu1 %v9174_v31 }
 0x5cb   :  { %v916_v32 = vpop.permute.xlu0 %915 }
 0x5d1   :  { %763 = vrot.lane.b32.xlu1 %v9358_v35, %s12176_s27  ;;  %s12190_s27 = smov 16  }
 0x5d2   :  { %v9080_v22 = vpop.eup %9079 }
 0x5d3   :  { %v756_v23 = vsel %vm259_vm6, %v9080_v22, 0.0 }
 0x5d5   :  { %917 = vrot.lane.b32.xlu1 %v9358_v35, %s12174_s29 }
 0x5d9   :  { %995 = vrot.lane.b32.xlu1 %v9362_v36, %s12174_s29  ;;  %s12191_s29 = smov 24  }
 0x5fd   :  { %757 = vadd.xlane.f32.xlu1 %v756_v23 }
 0x60e   :  { %993 = vrot.lane.b32.xlu1 %v9362_v36, %s12172_s28 }
 0x64d   :  { %v755_v24 = vpop.xlane.xlu1 %754 }
 0x64e   :  { %9081 = vrcp.f32 %v755_v24 }
 0x651   :  { %v764_v25 = vpop.permute.xlu1 %763 }
 0x652   :  { %8171 = vmatpush3.msra.mxu0 %v764_v25 }
 0x653   :  { %8180 = vmatprep.subr.mxu0 %v9174_v31 }
 0x655   :  { %v918_v28 = vpop.permute.xlu1 %917 }
 0x658   :  { %v9082_v26 = vpop.eup %9081 }
 0x659   :  { %v761_v27 = vmul.f32 %v9082_v26, %v9078_v16  ;;  %v996_v33 = vpop.permute.xlu1 %995 }
 0x65b   :  { %8173 = vmatmul.mubr.msk.f32.vlgmr.msra.gmra.mrb[4].mxu0 %vm259_vm6, %v761_v27 }
 0x65c   :  { %8181 = vmatpush3.xpose.msk.msra.mxu0 %vm259_vm6, %v918_v28  ;;  %8182 = vmatprep.mubr.msk.f32.mxu0 %vm9175_vm5, %v9174_v31 }
 0x65d   :  { %8190 = vmatprep.subr.mxu0 %v9174_v31 }
 0x65f   :  { %8183 = vmatmul.mubr.msk.f32.vlgmr.msra.gmra.mrb[6].mxu0 %vm259_vm6, %v916_v32 }
 0x660   :  { %8192 = vmatprep.mubr.msk.f32.mxu0 %vm9175_vm5, %v9174_v31 }
 0x68a   :  { %v758_v34 = vpop.xlane.xlu1 %757 }
 0x68b   :  { %9083 = vrcp.f32 %v758_v34 }
 0x68e   :  { %v994_v39 = vpop.permute.xlu1 %993 }
 0x695   :  { %v9084_v37 = vpop.eup %9083 }
 0x696   :  { %v762_v38 = vmul.f32 %v9084_v37, %v9080_v22 }
 0x698   :  { %8178 = vmatmul.mubr.msk.f32.vlgmr.msra.gmra.mrb[12].mxu1 %vm259_vm6, %v762_v38 }
 0x699   :  { %8186 = vmatpush3.xpose.msk.msra.mxu1 %vm259_vm6, %v996_v33  ;;  %8187 = vmatprep.mubr.msk.f32.mxu1 %vm9175_vm5, %v9174_v31 }
 0x69a   :  { %8195 = vmatprep.subr.mxu1 %v9174_v31 }
 0x69c   :  { %8188 = vmatmul.mubr.msk.f32.vlgmr.msra.gmra.mrb[14].mxu1 %vm259_vm6, %v994_v39 }
 0x69d   :  { %8197 = vmatprep.mubr.msk.f32.mxu1 %vm9175_vm5, %v9174_v31 }
 0x72e   :  { %v9450_v40 = vpop.f32.mrb[4].mxu0 }
 0x72f   :  { %v8174_v41 = vpop.f32.mrb[5].mxu0 }
 0x732   :  { %v989_v42 = vpop.f32.mrb[6].mxu0 }
 0x733   :  { %v8184_v43 = vpop.f32.mrb[7].mxu0  ;;  %v1071_v44 = vsel %vm259_vm6, %v989_v42, -inf }
 0x734   :  { %1072 = vmax.xlane.f32.xlu0 %v1071_v44  ;;  %v1609_v43 = vld [vmem:[%s12143_s5 + $0x10] sm:$0xff] }
 0x76b   :  { %v9453_v45 = vpop.f32.mrb[12].mxu1 }
 0x76c   :  { %v8179_v46 = vpop.f32.mrb[13].mxu1 }
 0x76f   :  { %v1067_v47 = vpop.f32.mrb[14].mxu1 }
 0x770   :  { %v8189_v48 = vpop.f32.mrb[15].mxu1  ;;  %v1074_v49 = vsel %vm259_vm6, %v1067_v47, -inf }
 0x771   :  { %1075 = vmax.xlane.f32.xlu1 %v1074_v49 }
 0x782   :  { %1093 = vrot.lane.b32.xlu1 %v9358_v35, %s12170_s1 }
 0x786   :  { %1247 = vrot.lane.b32.xlu1 %v9358_v35, %s12166_s30 }
 0x78a   :  { %1325 = vrot.lane.b32.xlu1 %v9362_v36, %s12166_s30  ;;  %s12188_s30 = smov 40  }
 0x78e   :  { %1323 = vrot.lane.b32.xlu1 %v9362_v36, %s12164_s18 }
 0x7c1   :  { %v1073_v50 = vpop.xlane.xlu0 %1072 }
 0x7c2   :  { %v1077_v51 = vsub.f32 %v989_v42, %v1073_v50  ;;  %v1608_v42 = vld [vmem:[%s12143_s5 + $0x8] sm:$0xff] }
 0x7c4   :  { %v1079_v52 = vmul.f32 1.442695, %v1077_v51 }
 0x7c6   :  { %9085 = vpow2.f32 %v1079_v52 }
 0x7d0   :  { %v9086_v53 = vpop.eup %9085 }
 0x7d1   :  { %v1083_v54 = vsel %vm259_vm6, %v9086_v53, 0.0 }
 0x7d2   :  { %1084 = vadd.xlane.f32.xlu0 %v1083_v54 }
 0x7e8   :  { %1169 = vrot.lane.b32.xlu0 %v9362_v36, %s12170_s1 }
 0x7fe   :  { %v1076_v55 = vpop.xlane.xlu1 %1075 }
 0x7ff   :  { %v1078_v56 = vsub.f32 %v1067_v47, %v1076_v55 }
 0x801   :  { %v1081_v57 = vmul.f32 1.442695, %v1078_v56 }
 0x802   :  { %v1094_v58 = vpop.permute.xlu1 %1093 }
 0x803   :  { %9087 = vpow2.f32 %v1081_v57  ;;  %8191 = vmatpush3.msra.mxu0 %v1094_v58 }
 0x804   :  { %8200 = vmatprep.subr.mxu0 %v9174_v31 }
 0x806   :  { %v1248_v1 = vpop.permute.xlu1 %1247 }
 0x80a   :  { %v1326_v5 = vpop.permute.xlu1 %1325 }
 0x80d   :  { %v9088_v59 = vpop.eup %9087 }
 0x80e   :  { %v1086_v60 = vsel %vm259_vm6, %v9088_v59, 0.0  ;;  %v1324_v9 = vpop.permute.xlu1 %1323 }
 0x80f   :  { %1087 = vadd.xlane.f32.xlu0 %v1086_v60 }
 0x825   :  { %1245 = vrot.lane.b32.xlu0 %v9358_v35, %s12164_s18  ;;  %s12189_s18 = smov 8  }
 0x85f   :  { %v1085_v61 = vpop.xlane.xlu0 %1084 }
 0x860   :  { %9089 = vrcp.f32 %v1085_v61 }
 0x863   :  { %v1170_v62 = vpop.permute.xlu0 %1169 }
 0x864   :  { %8196 = vmatpush3.msra.mxu1 %v1170_v62 }
 0x865   :  { %8205 = vmatprep.subr.mxu1 %v9174_v31 }
 0x86a   :  { %v9090_v63 = vpop.eup %9089 }
 0x86b   :  { %v1091_v0 = vmul.f32 %v9090_v63, %v9086_v53 }
 0x86d   :  { %8193 = vmatmul.mubr.msk.f32.vlgmr.msra.gmra.mrb[8].mxu0 %vm259_vm6, %v1091_v0 }
 0x86e   :  { %8201 = vmatpush3.xpose.msk.msra.mxu0 %vm259_vm6, %v1248_v1  ;;  %8202 = vmatprep.mubr.msk.f32.mxu0 %vm9175_vm5, %v9174_v31 }
 0x86f   :  { %8210 = vmatprep.subr.mxu0 %v9174_v31 }
 0x89c   :  { %v1088_v2 = vpop.xlane.xlu0 %1087 }
 0x89d   :  { %9091 = vrcp.f32 %v1088_v2 }
 0x8a0   :  { %v1246_v3 = vpop.permute.xlu0 %1245 }
 0x8a1   :  { %8203 = vmatmul.mubr.msk.f32.vlgmr.msra.gmra.mrb[10].mxu0 %vm259_vm6, %v1246_v3 }
 0x8a2   :  { %8212 = vmatprep.mubr.msk.f32.mxu0 %vm9175_vm5, %v9174_v31 }
 0x8a7   :  { %v9092_v4 = vpop.eup %9091 }
 0x8a8   :  { %v1092_v7 = vmul.f32 %v9092_v4, %v9088_v59 }
 0x8aa   :  { %8198 = vmatmul.mubr.msk.f32.vlgmr.msra.gmra.mrb[16].mxu1 %vm259_vm6, %v1092_v7 }
 0x8ab   :  { %8206 = vmatpush3.xpose.msk.msra.mxu1 %vm259_vm6, %v1326_v5  ;;  %8207 = vmatprep.mubr.msk.f32.mxu1 %vm9175_vm5, %v9174_v31 }
 0x8ac   :  { %8215 = vmatprep.subr.mxu1 %v9174_v31 }
 0x8ae   :  { %8208 = vmatmul.mubr.msk.f32.vlgmr.msra.gmra.mrb[18].mxu1 %vm259_vm6, %v1324_v9 }
 0x8af   :  { %8217 = vmatprep.mubr.msk.f32.mxu1 %vm9175_vm5, %v9174_v31 }
 0x940   :  { %v1165_v10 = vpop.f32.mrb[8].mxu0 }
 0x941   :  { %v8194_v11 = vpop.f32.mrb[9].mxu0 }
 0x974   :  { %v1319_v12 = vpop.f32.mrb[10].mxu0 }
 0x975   :  { %v8204_v13 = vpop.f32.mrb[11].mxu0  ;;  %v1401_v14 = vsel %vm259_vm6, %v1319_v12, -inf }
 0x976   :  { %1402 = vmax.xlane.f32.xlu0 %v1401_v14 }
 0x97d   :  { %v1241_v15 = vpop.f32.mrb[16].mxu1 }
 0x97e   :  { %v8199_v16 = vpop.f32.mrb[17].mxu1 }
 0x97f   :  { %v1747_v16 = vld [vmem:[%s12145_s9 + $0x8] sm:$0xff] }
 0x981   :  { %v1397_v17 = vpop.f32.mrb[18].mxu1 }
 0x982   :  { %v8209_v18 = vpop.f32.mrb[19].mxu1  ;;  %v1404_v19 = vsel %vm259_vm6, %v1397_v17, -inf }
 0x983   :  { %1405 = vmax.xlane.f32.xlu1 %v1404_v19  ;;  %v1749_v18 = vld [vmem:[%s12145_s9 + $0x18] sm:$0xff] }
 0x994   :  { %1423 = vrot.lane.b32.xlu1 %v9358_v35, %s12162_s26 }
 0x998   :  { %1577 = vrot.lane.b32.xlu1 %v9450_v40, %s12160_s19 }
 0x99c   :  { %1579 = vrot.lane.b32.xlu1 %v9453_v45, %s12160_s19  ;;  %v1610_v45 = vld [vmem:[%s12143_s5 + $0x18] sm:$0xff] }
 0x99d   :  { %v8382_v46 = vpack.c.bf16 %v1610_v45, %v1609_v43  ;;  %v1751_v43 = vld [vmem:[%s12145_s9 + $0x28] sm:$0xff]  ;;  %v1753_v45 = vld [vmem:[%s12145_s9 + $0x38] sm:$0xff] }
 0x9a0   :  { %1587 = vrot.lane.b32.xlu1 %v1241_v15, %s12158_s0 }
 0xa03   :  { %v1403_v20 = vpop.xlane.xlu0 %1402 }
 0xa04   :  { %v1407_v21 = vsub.f32 %v1319_v12, %v1403_v20  ;;  %v1765_v20 = vld [vmem:[%s12145_s9 + $0x98] sm:$0xff] }
 0xa06   :  { %v1409_v22 = vmul.f32 1.442695, %v1407_v21  ;;  %v1746_v21 = vld [vmem:[%s12145_s9] sm:$0xff] }
 0xa08   :  { %9093 = vpow2.f32 %v1409_v22  ;;  %v1762_v22 = vld [vmem:[%s12145_s9 + $0x80] sm:$0xff] }
 0xa10   :  { %v1406_v23 = vpop.xlane.xlu1 %1405 }
 0xa11   :  { %v1408_v24 = vsub.f32 %v1397_v17, %v1406_v23  ;;  %v1763_v17 = vld [vmem:[%s12145_s9 + $0x88] sm:$0xff]  ;;  %v8394_v23 = vpack.c.bf16 %v1765_v20, %v1749_v18  ;;  %v1754_v20 = vld [vmem:[%s12145_s9 + $0x40] sm:$0xff] }
 0xa12   :  { %v9094_v25 = vpop.eup %9093  ;;  %v8386_v19 = vpack.c.bf16 %v1763_v17, %v1747_v16  ;;  %v1757_v16 = vld [vmem:[%s12145_s9 + $0x58] sm:$0xff] }
 0xa13   :  { %v1411_v26 = vmul.f32 1.442695, %v1408_v24  ;;  %v1413_v35 = vsel %vm259_vm6, %v9094_v25, 0.0  ;;  %v8388_v24 = vpack.c.bf16 %v1762_v22, %v1746_v21  ;;  %v1773_v17 = vld [vmem:[%s12145_s9 + $0xd8] sm:$0xff]  ;;  %v1770_v22 = vld [vmem:[%s12145_s9 + $0xc0] sm:$0xff] }
 0xa14   :  { %v1424_v27 = vpop.permute.xlu1 %1423  ;;  %1414 = vadd.xlane.f32.xlu0 %v1413_v35 }
 0xa15   :  { %9095 = vpow2.f32 %v1411_v26  ;;  %8211 = vmatpush3.msra.mxu0 %v1424_v27  ;;  %v1764_v26 = vld [vmem:[%s12145_s9 + $0x90] sm:$0xff]  ;;  %v1779_v27 = vld [vmem:[%s12145_s9 + $0x108] sm:$0xff] }
 0xa18   :  { %v1578_v51 = vpop.permute.xlu1 %1577 }
 0xa19   :  { %v1599_v53 = vsel %vm259_vm6, %v9413_v6, %v1578_v51  ;;  %v6969_v6 = vld [vmem:[%s12144_s6] ss:$0 sm:$0xff] }
 0xa1c   :  { %v1580_v57 = vpop.permute.xlu1 %1579 }
 0xa1d   :  { %v1600_v59 = vsel %vm259_vm6, %v9415_v8, %v1580_v57  ;;  %v1750_v57 = vld [vmem:[%s12145_s9 + $0x20] sm:$0xff] }
 0xa1f   :  { %v9096_v28 = vpop.eup %9095 }
 0xa20   :  { %v1416_v32 = vsel %vm259_vm6, %v9096_v28, 0.0  ;;  %v1588_v58 = vpop.permute.xlu1 %1587 }
 0xa21   :  { %1417 = vadd.xlane.f32.xlu0 %v1416_v32  ;;  %v1603_v60 = vsel %vm1601_vm8, %v1600_v59, %v1588_v58  ;;  %v1781_v32 = vld [vmem:[%s12145_s9 + $0x118] sm:$0xff]  ;;  %v1766_v59 = vld [vmem:[%s12145_s9 + $0xa0] sm:$0xff] }
 0xa37   :  { %1499 = vrot.lane.b32.xlu0 %v9362_v36, %s12162_s26  ;;  %v1607_v36 = vld [vmem:[%s12143_s5] sm:$0xff] }
 0xa38   :  { %v8378_v44 = vpack.c.bf16 %v1608_v42, %v1607_v36  ;;  %v1796_v36 = vld [vmem:[%s12145_s9 + $0x190] sm:$0xff] }
 0xa3a   :  { %8379 = vmatprep.subr.bf16.mxu0 %v8378_v44 }
 0xa3b   :  { %1585 = vrot.lane.b32.xlu0 %v1165_v10, %s12158_s0 }
 0xaa1   :  { %v1415_v33 = vpop.xlane.xlu0 %1414 }
 0xaa2   :  { %9097 = vrcp.f32 %v1415_v33 }
 0xaac   :  { %v9098_v34 = vpop.eup %9097 }
 0xaad   :  { %v1421_v37 = vmul.f32 %v9098_v34, %v9094_v25  ;;  %v1748_v25 = vld [vmem:[%s12145_s9 + $0x10] sm:$0xff]  ;;  %v1797_v34 = vld [vmem:[%s12145_s9 + $0x198] sm:$0xff] }
 0xaae   :  { %v1418_v38 = vpop.xlane.xlu0 %1417  ;;  %v8396_v35 = vpack.c.bf16 %v1764_v26, %v1748_v25  ;;  %v8426_v26 = vpack.c.bf16 %v1773_v17, %v1757_v16  ;;  %v2599_v16 = vld [vmem:[%s12148_s11 + $0x198] sm:$0xff] }
 0xaaf   :  { %9099 = vrcp.f32 %v1418_v38  ;;  %8213 = vmatmul.mubr.msk.f32.vlgmr.msra.gmra.mrb[12].mxu0 %vm259_vm6, %v1421_v37  ;;  %v1778_v37 = vld [vmem:[%s12145_s9 + $0x100] sm:$0xff] }
 0xab0   :  { %8381 = vmatpush3.bf16.msra.mxu0 %v8378_v44  ;;  %v1794_v38 = vld [vmem:[%s12145_s9 + $0x180] sm:$0xff]  ;;  %v1767_v44 = vld [vmem:[%s12145_s9 + $0xa8] sm:$0xff] }
 0xab1   :  { %8383 = vmatprep.subr.bf16.mxu0 %v8382_v46 }
 0xab2   :  { %v1500_v39 = vpop.permute.xlu0 %1499 }
 0xab3   :  { %8216 = vmatpush3.msra.mxu1 %v1500_v39  ;;  %v8398_v39 = vpack.c.bf16 %v1797_v34, %v1781_v32  ;;  %v1805_v32 = vld [vmem:[%s12145_s9 + $0x1d8] sm:$0xff] }
 0xab4   :  { %8385 = vmatpush3.bf16.msra.mxu0 %v8382_v46  ;;  %8387 = vmatprep.subr.bf16.mxu1 %v8386_v19  ;;  %v8402_v46 = vpack.c.bf16 %v1767_v44, %v1751_v43  ;;  %v1775_v43 = vld [vmem:[%s12145_s9 + $0xe8] sm:$0xff]  ;;  %v1761_v44 = vld [vmem:[%s12145_s9 + $0x78] sm:$0xff] }
 0xab5   :  { %8395 = vmatprep.subr.bf16.mxu0 %v8394_v23  ;;  %v1756_v23 = vld [vmem:[%s12145_s9 + $0x50] sm:$0xff] }
 0xab6   :  { %v1586_v52 = vpop.permute.xlu0 %1585 }
 0xab7   :  { %v1602_v54 = vsel %vm1601_vm8, %v1599_v53, %v1586_v52 }
 0xab9   :  { %v9100_v40 = vpop.eup %9099 }
 0xaba   :  { %v1422_v41 = vmul.f32 %v9100_v40, %v9096_v28  ;;  %v1795_v28 = vld [vmem:[%s12145_s9 + $0x188] sm:$0xff]  ;;  %v8392_v40 = vpack.c.bf16 %v1794_v38, %v1778_v37  ;;  %v1786_v37 = vld [vmem:[%s12145_s9 + $0x140] sm:$0xff] }
 0xabb   :  { %v8390_v33 = vpack.c.bf16 %v1795_v28, %v1779_v27  ;;  %v1803_v27 = vld [vmem:[%s12145_s9 + $0x1c8] sm:$0xff]  ;;  %v1789_v28 = vld [vmem:[%s12145_s9 + $0x158] sm:$0xff]  ;;  %v1802_v38 = vld [vmem:[%s12145_s9 + $0x1c0] sm:$0xff] }
 0xabc   :  { %8218 = vmatmul.mubr.msk.f32.vlgmr.msra.gmra.mrb[20].mxu1 %vm259_vm6, %v1422_v41  ;;  %v1780_v41 = vld [vmem:[%s12145_s9 + $0x110] sm:$0xff] }
 0xabd   :  { %1964 = vmatprep.mubr.f32.mxu1 %v9174_v31  ;;  %8389 = vmatpush1.bf16.msra.mxu1 %v8388_v24  ;;  %v8400_v42 = vpack.c.bf16 %v1796_v36, %v1780_v41  ;;  %v1772_v24 = vld [vmem:[%s12145_s9 + $0xd0] sm:$0xff]  ;;  %v8430_v36 = vpack.c.bf16 %v1805_v32, %v1789_v28  ;;  %v2601_v28 = vld [vmem:[%s12148_s11 + $0x1a8] sm:$0xff] }
 0xabe   :  { %8391 = vmatprep.subr.bf16.mxu1 %v8390_v33  ;;  %v8420_v33 = vpack.c.bf16 %v1770_v22, %v1754_v20  ;;  %v8428_v34 = vpack.c.bf16 %v1772_v24, %v1756_v23  ;;  %v2551_v20 = vld [vmem:[%s12148_s11 + $0x18] sm:$0xff]  ;;  %v2582_v24 = vld [vmem:[%s12148_s11 + $0x110] sm:$0xff] }
 0xac1   :  { %8393 = vmatpush1.bf16.msra.mxu1 %v8392_v40  ;;  %v1804_v40 = vld [vmem:[%s12145_s9 + $0x1d0] sm:$0xff] }
 0xac2   :  { %8403 = vmatprep.subr.bf16.mxu1 %v8402_v46  ;;  %v8424_v46 = vpack.c.bf16 %v1802_v38, %v1786_v37  ;;  %v2553_v37 = vld [vmem:[%s12148_s11 + $0x28] sm:$0xff] }
 0xb82   :  { %v1495_v47 = vpop.f32.mrb[12].mxu0 }
 0xb83   :  { %1593 = vrot.lane.b32.xlu0 %v1495_v47, %s12168_s20  ;;  %v8214_v48 = vpop.f32.mrb[13].mxu0  ;;  %v1769_v47 = vld [vmem:[%s12145_s9 + $0xb8] sm:$0xff] }
 0xb84   :  { %v8410_v48 = vpack.c.bf16 %v1769_v47, %v1753_v45  ;;  %v1777_v45 = vld [vmem:[%s12145_s9 + $0xf8] sm:$0xff] }
 0xb8f   :  { %v1571_v49 = vpop.f32.mrb[20].mxu1 }
 0xb90   :  { %1595 = vrot.lane.b32.xlu1 %v1571_v49, %s12168_s20  ;;  %v8219_v50 = vpop.f32.mrb[21].mxu1  ;;  %s12187_s20 = smov 104  }
 0xbf5   :  { %v1594_v55 = vpop.permute.xlu0 %1593 }
 0xbf6   :  { %v1605_v56 = vsel %vm1604_vm7, %v1602_v54, %v1594_v55 }
 0xbf7   :  { %8228 = vmatprep.mubr.msk.f32.mxu0 %vm174_vm4, %v1605_v56  ;;  %v6972_v56 = vld [vmem:[%s12146_s7] ss:$0 sm:$0xff] }
 0xc02   :  { %v1596_v61 = vpop.permute.xlu1 %1595 }
 0xc03   :  { %v1606_v62 = vsel %vm1604_vm7, %v1603_v60, %v1596_v61  ;;  %v1752_v60 = vld [vmem:[%s12145_s9 + $0x30] sm:$0xff] }
 0xc04   :  { %8229 = vmatmul.mubr.msk.f32.vlgmr.msra.gmra.mrb[14].mxu0 %vm174_vm4, %v1606_v62  ;;  %v1768_v61 = vld [vmem:[%s12145_s9 + $0xb0] sm:$0xff]  ;;  %v6973_v62 = vld [vmem:[%s12147_s8] ss:$0 sm:$0xff] }
 0xc05   :  { %2041 = vmatprep.mubr.f32.mxu0 %v9174_v31  ;;  %8397 = vmatpush1.bf16.msra.mxu0 %v8396_v35  ;;  %v1787_v35 = vld [vmem:[%s12145_s9 + $0x148] sm:$0xff] }
 0xc06   :  { %8399 = vmatprep.subr.bf16.mxu0 %v8398_v39  ;;  %v1788_v39 = vld [vmem:[%s12145_s9 + $0x150] sm:$0xff]  ;;  %v8422_v41 = vpack.c.bf16 %v1803_v27, %v1787_v35  ;;  %v2569_v35 = vld [vmem:[%s12148_s11 + $0xa8] sm:$0xff]  ;;  %v2600_v27 = vld [vmem:[%s12148_s11 + $0x1a0] sm:$0xff] }
 0xc07   :  { %v8432_v47 = vpack.c.bf16 %v1804_v40, %v1788_v39  ;;  %v8490_v39 = vpack.c.bf16 %v2601_v28, %v2600_v27  ;;  %v2584_v40 = vld [vmem:[%s12148_s11 + $0x120] sm:$0xff]  ;;  %v2579_v27 = vld [vmem:[%s12148_s11 + $0xf8] sm:$0xff]  ;;  %v2610_v28 = vld [vmem:[%s12148_s11 + $0x1f0] sm:$0xff] }
 0xc09   :  { %8401 = vmatpush1.bf16.msra.mxu0 %v8400_v42  ;;  %v1759_v42 = vld [vmem:[%s12145_s9 + $0x68] sm:$0xff] }
 0xc0a   :  { %8411 = vmatprep.subr.bf16.mxu0 %v8410_v48  ;;  %v1758_v48 = vld [vmem:[%s12145_s9 + $0x60] sm:$0xff] }
 0xcd7   :  { %v8230_v63 = vpop.f32.mrb[14].mxu0 }
 0xcd8   :  { %v1696_v0 = vadd.f32 %v8230_v63, %v6969_v6  ;;  %v1690_v1 = vpop.f32.mrb[15].mxu0 }
 0xcd9   :  { %v1691_v2 = vadd.f32 %v6969_v6, %v1690_v1  ;;  %v1783_v6 = vld [vmem:[%s12145_s9 + $0x128] sm:$0xff]  ;;  %v1785_v1 = vld [vmem:[%s12145_s9 + $0x138] sm:$0xff] }
 0xcda   :  { %v1700_v3 = vadd.f32 %v1696_v0, %v9343_v30  ;;  %v1799_v0 = vld [vmem:[%s12145_s9 + $0x1a8] sm:$0xff] }
 0xcdb   :  { %v1699_v8 = vadd.f32 %v1691_v2, %v9341_v29  ;;  %v1801_v2 = vld [vmem:[%s12145_s9 + $0x1b8] sm:$0xff] }
 0xcdc   :  { %v1706_v4 = vsel %vm174_vm4, %v1700_v3, 0.0 }
 0xcdd   :  { %1707 = vadd.xlane.f32.xlu1 %v1706_v4  ;;  %v1703_v5 = vsel %vm174_vm4, %v1699_v8, 0.0  ;;  %v8412_v4 = vpack.c.bf16 %v1768_v61, %v1752_v60  ;;  %v1790_v60 = vld [vmem:[%s12145_s9 + $0x160] sm:$0xff] }
 0xcde   :  { %1704 = vadd.xlane.f32.xlu0 %v1703_v5  ;;  %v1782_v5 = vld [vmem:[%s12145_s9 + $0x120] sm:$0xff] }
 0xcdf   :  { %v1806_v61 = vld [vmem:[%s12145_s9 + $0x1e0] sm:$0xff] }
 0xd6a   :  { %v1708_v7 = vpop.xlane.xlu1 %1707 }
 0xd6b   :  { %v1711_v9 = vmul.f32 0.03125, %v1708_v7  ;;  %v1705_v10 = vpop.xlane.xlu0 %1704 }
 0xd6c   :  { %v1710_v11 = vmul.f32 0.03125, %v1705_v10  ;;  %v1798_v10 = vld [vmem:[%s12145_s9 + $0x1a0] sm:$0xff] }
 0xd6d   :  { %v9537_v12 = vsub.f32 %v1700_v3, %v1711_v9  ;;  %v8408_v18 = vpack.c.bf16 %v1798_v10, %v1782_v5  ;;  %v2549_v10 = vld [vmem:[%s12148_s11 + $0x8] sm:$0xff] }
 0xd6e   :  { %v1712_v13 = vsub.f32 %v1699_v8, %v1710_v11  ;;  %v8404_v8 = vpack.c.bf16 %v1766_v59, %v1750_v57  ;;  %v1784_v11 = vld [vmem:[%s12145_s9 + $0x130] sm:$0xff]  ;;  %v1809_v57 = vld [vmem:[%s12145_s9 + $0x1f8] sm:$0xff] }
 0xd6f   :  { %v1715_v30 = vmul.f32 %v9537_v12, %v9537_v12 }
 0xd70   :  { %v1714_v14 = vmul.f32 %v1712_v13, %v1712_v13 }
 0xd71   :  { %v1719_v29 = vsel %vm174_vm4, %v1715_v30, 0.0  ;;  %v1755_v30 = vld [vmem:[%s12145_s9 + $0x48] sm:$0xff] }
 0xd72   :  { %v1716_v15 = vsel %vm174_vm4, %v1714_v14, 0.0  ;;  %v8406_v14 = vpack.c.bf16 %v1799_v0, %v1783_v6  ;;  %v1808_v6 = vld [vmem:[%s12145_s9 + $0x1f0] sm:$0xff] }
 0xd73   :  { %1717 = vadd.xlane.f32.xlu0 %v1716_v15  ;;  %v8414_v15 = vpack.c.bf16 %v1801_v2, %v1785_v1  ;;  %v2564_v1 = vld [vmem:[%s12148_s11 + $0x80] sm:$0xff]  ;;  %v2565_v2 = vld [vmem:[%s12148_s11 + $0x88] sm:$0xff] }
 0xd77   :  { %1720 = vadd.xlane.f32.xlu0 %v1719_v29 }
 0xe00   :  { %v1718_v49 = vpop.xlane.xlu0 %1717 }
 0xe01   :  { %v1722_v50 = vmul.f32 0.03125, %v1718_v49  ;;  %v1774_v49 = vld [vmem:[%s12145_s9 + $0xe0] sm:$0xff] }
 0xe03   :  { %v1724_v51 = vadd.f32 1e-05, %v1722_v50  ;;  %v1760_v50 = vld [vmem:[%s12145_s9 + $0x70] sm:$0xff] }
 0xe04   :  { %v1721_v52 = vpop.xlane.xlu0 %1720 }
 0xe05   :  { %9101 = vrsqrt.f32 %v1724_v51  ;;  %v1723_v53 = vmul.f32 0.03125, %v1721_v52  ;;  %v1776_v51 = vld [vmem:[%s12145_s9 + $0xf0] sm:$0xff]  ;;  %v8434_v52 = vpack.c.bf16 %v1775_v43, %v1759_v42  ;;  %v2571_v42 = vld [vmem:[%s12148_s11 + $0xb8] sm:$0xff] }
 0xe06   :  { %v8444_v59 = vpack.c.bf16 %v1776_v51, %v1760_v50  ;;  %v2602_v43 = vld [vmem:[%s12148_s11 + $0x1b0] sm:$0xff] }
 0xe07   :  { %v1725_v54 = vadd.f32 1e-05, %v1723_v53  ;;  %v8442_v53 = vpack.c.bf16 %v1777_v45, %v1761_v44  ;;  %v2603_v44 = vld [vmem:[%s12148_s11 + $0x1b8] sm:$0xff]  ;;  %v2586_v51 = vld [vmem:[%s12148_s11 + $0x130] sm:$0xff] }
 0xe08   :  { %v8494_v50 = vpack.c.bf16 %v2603_v44, %v2602_v43  ;;  %v2629_v43 = vld [vmem:[%s12148_s11 + $0x288] sm:$0xff]  ;;  %v2660_v44 = vld [vmem:[%s12148_s11 + $0x380] sm:$0xff] }
 0xe09   :  { %9103 = vrsqrt.f32 %v1725_v54  ;;  %v1791_v54 = vld [vmem:[%s12145_s9 + $0x168] sm:$0xff] }
 0xe0f   :  { %v9102_v55 = vpop.eup %9101 }
 0xe10   :  { %v1728_v58 = vmul.f32 %v9102_v55, %v1712_v13  ;;  %v1800_v13 = vld [vmem:[%s12145_s9 + $0x1b0] sm:$0xff]  ;;  %v1807_v55 = vld [vmem:[%s12145_s9 + $0x1e8] sm:$0xff] }
 0xe11   :  { %v8416_v19 = vpack.c.bf16 %v1800_v13, %v1784_v11  ;;  %v8450_v11 = vpack.c.bf16 %v2565_v2, %v2564_v1  ;;  %v2575_v1 = vld [vmem:[%s12148_s11 + $0xd8] sm:$0xff]  ;;  %v2606_v2 = vld [vmem:[%s12148_s11 + $0x1d0] sm:$0xff] }
 0xe12   :  { %v1736_v63 = vmul.f32 %v6972_v56, %v1728_v58  ;;  %v8436_v58 = vpack.c.bf16 %v1774_v49, %v1758_v48  ;;  %v2555_v48 = vld [vmem:[%s12148_s11 + $0x38] sm:$0xff] }
 0xe13   :  { %v9104_v3 = vpop.eup %9103 }
 0xe14   :  { %v9636_v7 = vadd.f32 %v6973_v62, %v1736_v63  ;;  %v1729_v9 = vmul.f32 %v9104_v3, %v9537_v12  ;;  %v1771_v12 = vld [vmem:[%s12145_s9 + $0xc8] sm:$0xff]  ;;  %v8438_v63 = vpack.c.bf16 %v1807_v55, %v1791_v54  ;;  %v2596_v3 = vld [vmem:[%s12148_s11 + $0x180] sm:$0xff] }
 0xe15   :  { %v8418_v25 = vpack.c.bf16 %v1771_v12, %v1755_v30  ;;  %v2566_v30 = vld [vmem:[%s12148_s11 + $0x90] sm:$0xff]  ;;  %v2573_v54 = vld [vmem:[%s12148_s11 + $0xc8] sm:$0xff]  ;;  %v2604_v55 = vld [vmem:[%s12148_s11 + $0x1c0] sm:$0xff] }
 0xe16   :  { %v1737_v29 = vmul.f32 %v6972_v56, %v1729_v9  ;;  %6974 = vmatmul.mubr.msk.f32.vlgmr.msra.gmra.mrb[22].mxu1 %vm174_vm4, %v9636_v7  ;;  %6976 = vmatmul.mubr.msk.f32.vlgmr.msra.gmra.mrb[16].mxu0 %vm174_vm4, %v9636_v7  ;;  %v1793_v56 = vld [vmem:[%s12145_s9 + $0x178] sm:$0xff]  ;;  %v2548_v9 = vld [vmem:[%s12148_s11] sm:$0xff]  ;;  %v2598_v12 = vld [vmem:[%s12148_s11 + $0x190] sm:$0xff] }
 0xe17   :  { %8405 = vmatpush1.bf16.msra.mxu1 %v8404_v8  ;;  %8413 = vmatpush1.bf16.msra.mxu0 %v8412_v4  ;;  %v8446_v0 = vpack.c.bf16 %v1809_v57, %v1793_v56  ;;  %v2597_v8 = vld [vmem:[%s12148_s11 + $0x188] sm:$0xff]  ;;  %v8440_v4 = vpack.c.bf16 %v1806_v61, %v1790_v60  ;;  %v8452_v17 = vpack.c.bf16 %v2549_v10, %v2548_v9  ;;  %v2559_v9 = vld [vmem:[%s12148_s11 + $0x58] sm:$0xff] }
 0xe18   :  { %v9667_v21 = vadd.f32 %v6973_v62, %v1737_v29  ;;  %1970 = vmatprep.mubr.f32.mxu1 %v9174_v31  ;;  %2047 = vmatprep.mubr.f32.mxu0 %v9174_v31  ;;  %v1792_v62 = vld [vmem:[%s12145_s9 + $0x170] sm:$0xff]  ;;  %v8482_v13 = vpack.c.bf16 %v2597_v8, %v2596_v3  ;;  %v2567_v29 = vld [vmem:[%s12148_s11 + $0x98] sm:$0xff]  ;;  %v8486_v23 = vpack.c.bf16 %v2599_v16, %v2598_v12  ;;  %v2605_v56 = vld [vmem:[%s12148_s11 + $0x1c8] sm:$0xff] }
 0xe19   :  { %8407 = vmatprep.subr.bf16.mxu1 %v8406_v14  ;;  %8415 = vmatprep.subr.bf16.mxu0 %v8414_v15  ;;  %v8448_v5 = vpack.c.bf16 %v1808_v6, %v1792_v62  ;;  %v2580_v14 = vld [vmem:[%s12148_s11 + $0x100] sm:$0xff]  ;;  %v2581_v15 = vld [vmem:[%s12148_s11 + $0x108] sm:$0xff]  ;;  %v8454_v22 = vpack.c.bf16 %v2567_v29, %v2566_v30  ;;  %v8498_v62 = vpack.c.bf16 %v2605_v56, %v2604_v55  ;;  %v2607_v3 = vld [vmem:[%s12148_s11 + $0x1d8] sm:$0xff] }
 0xe1a   :  { %6975 = vmatmul.mubr.msk.f32.gmra.mrb[24].mxu1 %vm174_vm4, %v9667_v21  ;;  %6977 = vmatmul.mubr.msk.f32.gmra.mrb[18].mxu0 %vm174_vm4, %v9667_v21  ;;  %v2557_v60 = vld [vmem:[%s12148_s11 + $0x48] sm:$0xff]  ;;  %v2588_v6 = vld [vmem:[%s12148_s11 + $0x140] sm:$0xff] }
 0xe1b   :  { %8409 = vmatpush1.bf16.msra.mxu1 %v8408_v18  ;;  %8417 = vmatpush1.bf16.msra.mxu0 %v8416_v19  ;;  %v8484_v18 = vpack.c.bf16 %v2581_v15, %v2580_v14  ;;  %v2550_v19 = vld [vmem:[%s12148_s11 + $0x10] sm:$0xff]  ;;  %v2591_v14 = vld [vmem:[%s12148_s11 + $0x158] sm:$0xff]  ;;  %v2576_v15 = vld [vmem:[%s12148_s11 + $0xe0] sm:$0xff] }
 0xe1c   :  { %2118 = vmatprep.mubr.f32.mxu1 %v9174_v31  ;;  %2195 = vmatprep.mubr.f32.mxu0 %v9174_v31  ;;  %v8456_v32 = vpack.c.bf16 %v2551_v20, %v2550_v19  ;;  %v2577_v30 = vld [vmem:[%s12148_s11 + $0xe8] sm:$0xff]  ;;  %v2608_v29 = vld [vmem:[%s12148_s11 + $0x1e0] sm:$0xff] }
 0xe1d   :  { %8419 = vmatprep.subr.bf16.mxu1 %v8418_v25  ;;  %8427 = vmatprep.subr.bf16.mxu0 %v8426_v26  ;;  %v2583_v25 = vld [vmem:[%s12148_s11 + $0x118] sm:$0xff]  ;;  %v2568_v26 = vld [vmem:[%s12148_s11 + $0xa0] sm:$0xff]  ;;  %v2609_v12 = vld [vmem:[%s12148_s11 + $0x1e8] sm:$0xff]  ;;  %v8474_v19 = vpack.c.bf16 %v2577_v30, %v2576_v15 }
 0xe1e   :  { %6978 = vmatmul.mubr.msk.f32.vlgmr.msra.gmra.mrb[26].mxu1 %vm174_vm4, %v9636_v7  ;;  %6980 = vmatmul.mubr.msk.f32.vlgmr.msra.gmra.mrb[20].mxu0 %vm174_vm4, %v9636_v7  ;;  %v8458_v38 = vpack.c.bf16 %v2569_v35, %v2568_v26  ;;  %v8506_v20 = vpack.c.bf16 %v2609_v12, %v2608_v29  ;;  %v2578_v35 = vld [vmem:[%s12148_s11 + $0xf0] sm:$0xff] }
 0xe1f   :  { %8421 = vmatpush1.bf16.msra.mxu1 %v8420_v33  ;;  %8429 = vmatpush1.bf16.msra.mxu0 %v8428_v34  ;;  %v8488_v33 = vpack.c.bf16 %v2583_v25, %v2582_v24  ;;  %v2552_v34 = vld [vmem:[%s12148_s11 + $0x20] sm:$0xff]  ;;  %v2593_v24 = vld [vmem:[%s12148_s11 + $0x168] sm:$0xff]  ;;  %v2614_v12 = vld [vmem:[%s12148_s11 + $0x210] sm:$0xff] }
 0xe20   :  { %2124 = vmatprep.mubr.f32.mxu1 %v9174_v31  ;;  %2201 = vmatprep.mubr.f32.mxu0 %v9174_v31  ;;  %v8460_v45 = vpack.c.bf16 %v2553_v37, %v2552_v34  ;;  %v2562_v34 = vld [vmem:[%s12148_s11 + $0x70] sm:$0xff]  ;;  %v2563_v37 = vld [vmem:[%s12148_s11 + $0x78] sm:$0xff] }
 0xe21   :  { %8423 = vmatprep.subr.bf16.mxu1 %v8422_v41  ;;  %8431 = vmatprep.subr.bf16.mxu0 %v8430_v36  ;;  %v2585_v41 = vld [vmem:[%s12148_s11 + $0x128] sm:$0xff]  ;;  %v2570_v36 = vld [vmem:[%s12148_s11 + $0xb0] sm:$0xff] }
 0xe22   :  { %6979 = vmatmul.mubr.msk.f32.gmra.mrb[28].mxu1 %vm174_vm4, %v9667_v21  ;;  %6981 = vmatmul.mubr.msk.f32.gmra.mrb[22].mxu0 %vm174_vm4, %v9667_v21  ;;  %v8462_v49 = vpack.c.bf16 %v2571_v42, %v2570_v36  ;;  %v2628_v42 = vld [vmem:[%s12148_s11 + $0x280] sm:$0xff] }
 0xe23   :  { %8425 = vmatpush1.bf16.msra.mxu1 %v8424_v46  ;;  %8433 = vmatpush1.bf16.msra.mxu0 %v8432_v47  ;;  %v8492_v46 = vpack.c.bf16 %v2585_v41, %v2584_v40  ;;  %v2554_v47 = vld [vmem:[%s12148_s11 + $0x30] sm:$0xff]  ;;  %v2595_v41 = vld [vmem:[%s12148_s11 + $0x178] sm:$0xff] }
 0xe24   :  { %2272 = vmatprep.mubr.f32.mxu1 %v9174_v31  ;;  %2349 = vmatprep.mubr.f32.mxu0 %v9174_v31  ;;  %v8464_v57 = vpack.c.bf16 %v2555_v48, %v2554_v47  ;;  %v2594_v40 = vld [vmem:[%s12148_s11 + $0x170] sm:$0xff]  ;;  %v1814_v48 = vlaneseq }
 0xe25   :  { %8435 = vmatprep.subr.bf16.mxu1 %v8434_v52  ;;  %8443 = vmatprep.subr.bf16.mxu0 %v8442_v53  ;;  %v2587_v52 = vld [vmem:[%s12148_s11 + $0x138] sm:$0xff]  ;;  %v2572_v53 = vld [vmem:[%s12148_s11 + $0xc0] sm:$0xff]  ;;  %v8512_v36 = vpack.c.bf16 %v2595_v41, %v2594_v40  ;;  %v2633_v40 = vld [vmem:[%s12148_s11 + $0x2a8] sm:$0xff] }
 0xe26   :  { %6982 = vmatmul.mubr.msk.f32.vlgmr.msra.gmra.mrb[30].mxu1 %vm174_vm4, %v9636_v7  ;;  %6984 = vmatmul.mubr.msk.f32.vlgmr.msra.gmra.mrb[24].mxu0 %vm174_vm4, %v9636_v7  ;;  %v8466_v61 = vpack.c.bf16 %v2573_v54, %v2572_v53  ;;  %v2664_v41 = vld [vmem:[%s12148_s11 + $0x3a0] sm:$0xff] }
 0xe27   :  { %8437 = vmatpush1.bf16.msra.mxu1 %v8436_v58  ;;  %8445 = vmatpush1.bf16.msra.mxu0 %v8444_v59  ;;  %v8496_v58 = vpack.c.bf16 %v2587_v52, %v2586_v51  ;;  %v2556_v59 = vld [vmem:[%s12148_s11 + $0x40] sm:$0xff] }
 0xe28   :  { %2278 = vmatprep.mubr.f32.mxu1 %v9174_v31  ;;  %2355 = vmatprep.mubr.f32.mxu0 %v9174_v31  ;;  %v8468_v8 = vpack.c.bf16 %v2557_v60, %v2556_v59  ;;  %v10007_v52 = vld [vmem:[%s12149_s10] sm:$0xff]  ;;  %v2613_v60 = vld [vmem:[%s12148_s11 + $0x208] sm:$0xff] }
 0xe29   :  { %8439 = vmatprep.subr.bf16.mxu1 %v8438_v63  ;;  %8447 = vmatprep.subr.bf16.mxu0 %v8446_v0  ;;  %v2589_v63 = vld [vmem:[%s12148_s11 + $0x148] sm:$0xff]  ;;  %v2574_v0 = vld [vmem:[%s12148_s11 + $0xd0] sm:$0xff]  ;;  %v2612_v59 = vld [vmem:[%s12148_s11 + $0x200] sm:$0xff] }
 0xe2a   :  { %6983 = vmatmul.mubr.msk.f32.gmra.mrb[32].mxu1 %vm174_vm4, %v9667_v21  ;;  %6985 = vmatmul.mubr.msk.f32.gmra.mrb[26].mxu0 %vm174_vm4, %v9667_v21  ;;  %v8470_v10 = vpack.c.bf16 %v2575_v1, %v2574_v0  ;;  %v2645_v0 = vld [vmem:[%s12148_s11 + $0x308] sm:$0xff]  ;;  %v2630_v1 = vld [vmem:[%s12148_s11 + $0x290] sm:$0xff]  ;;  %v8516_v15 = vpack.c.bf16 %v2613_v60, %v2612_v59 }
 0xe2b   :  { %8441 = vmatpush1.bf16.msra.mxu1 %v8440_v4  ;;  %8449 = vmatpush1.bf16.msra.mxu0 %v8448_v5  ;;  %v8500_v4 = vpack.c.bf16 %v2589_v63, %v2588_v6  ;;  %v2558_v5 = vld [vmem:[%s12148_s11 + $0x50] sm:$0xff]  ;;  %v2644_v63 = vld [vmem:[%s12148_s11 + $0x300] sm:$0xff] }
 0xe2c   :  { %2426 = vmatprep.mubr.f32.mxu1 %v9174_v31  ;;  %2503 = vmatprep.mubr.f32.mxu0 %v9174_v31  ;;  %v8472_v16 = vpack.c.bf16 %v2559_v9, %v2558_v5  ;;  %v2631_v5 = vld [vmem:[%s12148_s11 + $0x298] sm:$0xff]  ;;  %v2662_v9 = vld [vmem:[%s12148_s11 + $0x390] sm:$0xff]  ;;  %v8548_v30 = vpack.c.bf16 %v2645_v0, %v2644_v63  ;;  %v2649_v63 = vld [vmem:[%s12148_s11 + $0x328] sm:$0xff] }
 0xe2d   :  { %8451 = vmatprep.subr.bf16.mxu1 %v8450_v11  ;;  %8483 = vmatprep.subr.bf16.mxu0 %v8482_v13  ;;  %v8502_v11 = vpack.c.bf16 %v2607_v3, %v2606_v2  ;;  %v2590_v13 = vld [vmem:[%s12148_s11 + $0x150] sm:$0xff] }
 0xe2e   :  { %6986 = vmatmul.mubr.msk.f32.vlgmr.msra.gmra.mrb[34].mxu1 %vm174_vm4, %v9636_v7  ;;  %6988 = vmatmul.mubr.msk.f32.vlgmr.msra.gmra.mrb[28].mxu0 %vm174_vm4, %v9636_v7  ;;  %v2634_v0 = vld [vmem:[%s12148_s11 + $0x2b0] sm:$0xff] }
 0xe2f   :  { %2432 = vmatprep.mubr.f32.mxu1 %v9174_v31  ;;  %2509 = vmatprep.mubr.f32.mxu0 %v9174_v31 }
 0xe30   :  { %8453 = vmatpush3.bf16.msra.mxu1 %v8452_v17  ;;  %8485 = vmatpush3.bf16.msra.mxu0 %v8484_v18  ;;  %v8504_v17 = vpack.c.bf16 %v2591_v14, %v2590_v13  ;;  %v2560_v18 = vld [vmem:[%s12148_s11 + $0x60] sm:$0xff] }
 0xe31   :  { %8455 = vmatprep.subr.bf16.mxu1 %v8454_v22  ;;  %8487 = vmatprep.subr.bf16.mxu0 %v8486_v23  ;;  %v2561_v22 = vld [vmem:[%s12148_s11 + $0x68] sm:$0xff]  ;;  %v2592_v23 = vld [vmem:[%s12148_s11 + $0x160] sm:$0xff] }
 0xe32   :  { %6987 = vmatmul.mubr.msk.f32.gmra.mrb[36].mxu1 %vm174_vm4, %v9667_v21  ;;  %6989 = vmatmul.mubr.msk.f32.gmra.mrb[30].mxu0 %vm174_vm4, %v9667_v21  ;;  %v8476_v25 = vpack.c.bf16 %v2561_v22, %v2560_v18  ;;  %v8508_v26 = vpack.c.bf16 %v2593_v24, %v2592_v23  ;;  %v2615_v23 = vld [vmem:[%s12148_s11 + $0x218] sm:$0xff]  ;;  %v2646_v24 = vld [vmem:[%s12148_s11 + $0x310] sm:$0xff] }
 0xe34   :  { %8457 = vmatpush3.bf16.msra.mxu1 %v8456_v32  ;;  %8489 = vmatpush3.bf16.msra.mxu0 %v8488_v33  ;;  %v8478_v32 = vpack.c.bf16 %v2579_v27, %v2578_v35  ;;  %v2611_v33 = vld [vmem:[%s12148_s11 + $0x1f8] sm:$0xff] }
 0xe35   :  { %8459 = vmatprep.subr.bf16.mxu1 %v8458_v38  ;;  %8491 = vmatprep.subr.bf16.mxu0 %v8490_v39  ;;  %v8510_v38 = vpack.c.bf16 %v2611_v33, %v2610_v28  ;;  %v8480_v39 = vpack.c.bf16 %v2563_v37, %v2562_v34  ;;  %v2647_v33 = vld [vmem:[%s12148_s11 + $0x318] sm:$0xff]  ;;  %v2632_v34 = vld [vmem:[%s12148_s11 + $0x2a0] sm:$0xff] }
 0xe38   :  { %8461 = vmatpush3.bf16.msra.mxu1 %v8460_v45  ;;  %8493 = vmatpush3.bf16.msra.mxu0 %v8492_v46  ;;  %v8514_v45 = vpack.c.bf16 %v2629_v43, %v2628_v42  ;;  %v2661_v46 = vld [vmem:[%s12148_s11 + $0x388] sm:$0xff]  ;;  %v2616_v42 = vld [vmem:[%s12148_s11 + $0x220] sm:$0xff] }
 0xe39   :  { %8463 = vmatprep.subr.bf16.mxu1 %v8462_v49  ;;  %8495 = vmatprep.subr.bf16.mxu0 %v8494_v50  ;;  %v8546_v47 = vpack.c.bf16 %v2661_v46, %v2660_v44  ;;  %v9996_v49 = vshrl.u32 %v1814_v48, 7  ;;  %v8552_v48 = vpack.c.bf16 %v2647_v33, %v2646_v24  ;;  %v2637_v24 = vld [vmem:[%s12148_s11 + $0x2c8] sm:$0xff]  ;;  %v2620_v33 = vld [vmem:[%s12148_s11 + $0x240] sm:$0xff] }
 0xe3b   :  { %v9999_v50 = vsub.s32 0, %v9996_v49  ;;  %v10002_v51 = vsub.s32 2, %v9996_v49  ;;  %v10010_v53 = vsub.s32 1, %v9996_v49  ;;  %v10013_v54 = vsub.s32 3, %v9996_v49 }
 0xe3c   :  { %8465 = vmatpush3.bf16.msra.mxu1 %v8464_v57  ;;  %8497 = vmatpush3.bf16.msra.mxu0 %v8496_v58  ;;  %v10051_v14 = vsub.s32 7, %v9996_v49 }
 0xe3d   :  { %8467 = vmatprep.subr.bf16.mxu1 %v8466_v61  ;;  %8499 = vmatprep.subr.bf16.mxu0 %v8498_v62  ;;  %v1817_v55 = vrot.slane %v10007_v52, %v9999_v50  ;;  %v1825_v56 = vrot.slane %v10007_v52, %v10002_v51  ;;  %v1821_v57 = vrot.slane %v10007_v52, %v10010_v53  ;;  %v10030_v61 = vsub.s32 5, %v9996_v49 }
 0xe3e   :  { %v1829_v58 = vrot.slane %v10007_v52, %v10013_v54 }
 0xe3f   :  { %v10055_v29 = vrot.slane %v10007_v52, %v10030_v61 }
 0xe40   :  { %8469 = vmatpush3.bf16.msra.mxu1 %v8468_v8  ;;  %8501 = vmatpush3.bf16.msra.mxu0 %v8500_v4 }
 0xe41   :  { %8471 = vmatprep.subr.bf16.mxu1 %v8470_v10  ;;  %8503 = vmatprep.subr.bf16.mxu0 %v8502_v11  ;;  %v2663_v10 = vld [vmem:[%s12148_s11 + $0x398] sm:$0xff] }
 0xe42   :  { %v8550_v22 = vpack.c.bf16 %v2663_v10, %v2662_v9 }
 0xe44   :  { %8473 = vmatpush3.bf16.msra.mxu1 %v8472_v16  ;;  %8505 = vmatpush3.bf16.msra.mxu0 %v8504_v17 }
 0xe45   :  { %8475 = vmatprep.subr.bf16.mxu1 %v8474_v19  ;;  %8507 = vmatprep.subr.bf16.mxu0 %v8506_v20  ;;  %v8518_v20 = vpack.c.bf16 %v2631_v5, %v2630_v1 }
 0xe48   :  { %8477 = vmatpush3.bf16.msra.mxu1 %v8476_v25  ;;  %8509 = vmatpush3.bf16.msra.mxu0 %v8508_v26 }
 0xe49   :  { %8479 = vmatprep.subr.bf16.mxu1 %v8478_v32  ;;  %8511 = vmatprep.subr.bf16.mxu0 %v8510_v38 }
 0xe4c   :  { %8481 = vmatpush3.bf16.msra.mxu1 %v8480_v39  ;;  %8513 = vmatpush3.bf16.msra.mxu0 %v8512_v36  ;;  %v10074_v39 = vrot.slane %v10007_v52, %v10051_v14  ;;  %v2665_v36 = vld [vmem:[%s12148_s11 + $0x3a8] sm:$0xff] }
 0xe4d   :  { %8515 = vmatprep.subr.bf16.mxu1 %v8514_v45  ;;  %8547 = vmatprep.subr.bf16.mxu0 %v8546_v47  ;;  %v8520_v47 = vpack.c.bf16 %v2615_v23, %v2614_v12  ;;  %v2619_v12 = vld [vmem:[%s12148_s11 + $0x238] sm:$0xff]  ;;  %v2636_v23 = vld [vmem:[%s12148_s11 + $0x2c0] sm:$0xff] }
 0xee9   :  { %v1966_v62 = vpop.f32.mrb[22].mxu1  ;;  %v2043_v6 = vpop.f32.mrb[16].mxu0 }
 0xeea   :  { %v1967_v2 = vadd.f32 %v1966_v62, %v1817_v55  ;;  %v2044_v3 = vadd.f32 %v2043_v6, %v1825_v56  ;;  %v1968_v8 = vpop.f32.mrb[23].mxu1  ;;  %v2045_v4 = vpop.f32.mrb[17].mxu0  ;;  %v8522_v62 = vpack.c.bf16 %v2633_v40, %v2632_v34  ;;  %v8554_v6 = vpack.c.bf16 %v2665_v36, %v2664_v41  ;;  %v2621_v34 = vld [vmem:[%s12148_s11 + $0x248] sm:$0xff]  ;;  %v2652_v36 = vld [vmem:[%s12148_s11 + $0x340] sm:$0xff] }
 0xeeb   :  { %v1969_v11 = vadd.f32 %v1968_v8, %v1821_v57  ;;  %v2046_v13 = vadd.f32 %v2045_v4, %v1829_v58  ;;  %v2666_v8 = vld [vmem:[%s12148_s11 + $0x3b0] sm:$0xff]  ;;  %v2667_v4 = vld [vmem:[%s12148_s11 + $0x3b8] sm:$0xff]  ;;  %v8530_v40 = vpack.c.bf16 %v2637_v24, %v2636_v23 }
 0xeec   :  { %v2516_v25 = vmax.f32 %v1967_v2, 0.0  ;;  %v2518_v26 = vmax.f32 %v2044_v3, 0.0  ;;  %v2635_v3 = vld [vmem:[%s12148_s11 + $0x2b8] sm:$0xff] }
 0xeed   :  { %v2517_v16 = vmax.f32 %v1969_v11, 0.0  ;;  %v2519_v17 = vmax.f32 %v2046_v13, 0.0  ;;  %v1972_v18 = vpop.f32.mrb[24].mxu1  ;;  %v2049_v19 = vpop.f32.mrb[18].mxu0 }
 0xeee   :  { %v1973_v35 = vadd.f32 %v1972_v18, %v1817_v55  ;;  %v2050_v27 = vadd.f32 %v2049_v19, %v1825_v56  ;;  %v1974_v28 = vpop.f32.mrb[25].mxu1  ;;  %v2051_v32 = vpop.f32.mrb[19].mxu0  ;;  %v2617_v55 = vld [vmem:[%s12148_s11 + $0x228] sm:$0xff]  ;;  %v2648_v56 = vld [vmem:[%s12148_s11 + $0x320] sm:$0xff]  ;;  %v8526_v18 = vpack.c.bf16 %v2635_v3, %v2634_v0  ;;  %v8558_v19 = vpack.c.bf16 %v2667_v4, %v2666_v8 }
 0xeef   :  { %v1975_v37 = vadd.f32 %v1974_v28, %v1821_v57  ;;  %v2052_v38 = vadd.f32 %v2051_v32, %v1829_v58  ;;  %2875 = vmatprep.mubr.f32.mxu1 %v2517_v16  ;;  %2950 = vmatprep.mubr.f32.mxu0 %v2519_v17  ;;  %v8524_v13 = vpack.c.bf16 %v2617_v55, %v2616_v42  ;;  %v2653_v42 = vld [vmem:[%s12148_s11 + $0x348] sm:$0xff]  ;;  %v2640_v3 = vld [vmem:[%s12148_s11 + $0x2e0] sm:$0xff] }
 0xef0   :  { %2876 = vmatmul.mubr.f32.vlgmr.msra.gmra.mrb[38].mxu1 %v2516_v25  ;;  %2951 = vmatmul.mubr.f32.vlgmr.msra.gmra.mrb[32].mxu0 %v2518_v26  ;;  %v2532_v57 = vmax.f32 %v1973_v35, 0.0  ;;  %v2534_v58 = vmax.f32 %v2050_v27, 0.0  ;;  %v2668_v25 = vld [vmem:[%s12148_s11 + $0x3c0] sm:$0xff]  ;;  %v2669_v26 = vld [vmem:[%s12148_s11 + $0x3c8] sm:$0xff] }
 0xef1   :  { %v2533_v43 = vmax.f32 %v1975_v37, 0.0  ;;  %v2535_v44 = vmax.f32 %v2052_v38, 0.0  ;;  %8517 = vmatpush3.bf16.msra.mxu1 %v8516_v15  ;;  %8549 = vmatpush3.bf16.msra.mxu0 %v8548_v30  ;;  %v10088_v45 = vpop.f32.mrb[26].mxu1  ;;  %v10090_v46 = vpop.f32.mrb[20].mxu0  ;;  %v8556_v15 = vpack.c.bf16 %v2649_v63, %v2648_v56  ;;  %v2618_v30 = vld [vmem:[%s12148_s11 + $0x230] sm:$0xff]  ;;  %v8562_v41 = vpack.c.bf16 %v2669_v26, %v2668_v25  ;;  %v2641_v8 = vld [vmem:[%s12148_s11 + $0x2e8] sm:$0xff] }
 0xef2   :  { %v2122_v59 = vpop.f32.mrb[27].mxu1  ;;  %v2199_v60 = vpop.f32.mrb[21].mxu0  ;;  %8519 = vmatprep.subr.bf16.mxu1 %v8518_v20  ;;  %8551 = vmatprep.subr.bf16.mxu0 %v8550_v22  ;;  %v2650_v20 = vld [vmem:[%s12148_s11 + $0x330] sm:$0xff]  ;;  %v2651_v22 = vld [vmem:[%s12148_s11 + $0x338] sm:$0xff]  ;;  %v8528_v28 = vpack.c.bf16 %v2619_v12, %v2618_v30  ;;  %v2672_v4 = vld [vmem:[%s12148_s11 + $0x3e0] sm:$0xff]  ;;  %v8538_v24 = vpack.c.bf16 %v2641_v8, %v2640_v3 }
 0xef3   :  { %v2123_v1 = vadd.f32 %v2122_v59, %v10055_v29  ;;  %v2200_v2 = vadd.f32 %v2199_v60, %v10074_v39  ;;  %2880 = vmatprep.mubr.f32.mxu1 %v2533_v43  ;;  %2955 = vmatprep.mubr.f32.mxu0 %v2535_v44  ;;  %v8560_v32 = vpack.c.bf16 %v2651_v22, %v2650_v20  ;;  %v2638_v43 = vld [vmem:[%s12148_s11 + $0x2d0] sm:$0xff]  ;;  %v2639_v44 = vld [vmem:[%s12148_s11 + $0x2d8] sm:$0xff]  ;;  %v10225_v20 = vsub.s32 6, %v9996_v49  ;;  %v2656_v26 = vld [vmem:[%s12148_s11 + $0x360] sm:$0xff] }
 0xef4   :  { %2881 = vmatmul.mubr.f32.gmra.mrb[40].mxu1 %v2532_v57  ;;  %2956 = vmatmul.mubr.f32.gmra.mrb[34].mxu0 %v2534_v58  ;;  %v8532_v57 = vpack.c.bf16 %v2621_v34, %v2620_v33  ;;  %v8564_v58 = vpack.c.bf16 %v2653_v42, %v2652_v36  ;;  %v2622_v59 = vld [vmem:[%s12148_s11 + $0x250] sm:$0xff]  ;;  %v2623_v60 = vld [vmem:[%s12148_s11 + $0x258] sm:$0xff]  ;;  %v8534_v63 = vpack.c.bf16 %v2639_v44, %v2638_v43  ;;  %v2725_v3 = vld [vmem:[%s12148_s11 + $0x588] sm:$0xff] }
 0xef5   :  { %v2521_v5 = vmax.f32 %v2123_v1, 0.0  ;;  %v2523_v9 = vmax.f32 %v2200_v2, 0.0  ;;  %8521 = vmatpush3.bf16.msra.mxu1 %v8520_v47  ;;  %8553 = vmatpush3.bf16.msra.mxu0 %v8552_v48  ;;  %v10115_v10 = vpop.f32.mrb[28].mxu1  ;;  %v10117_v11 = vpop.f32.mrb[22].mxu0  ;;  %v2670_v47 = vld [vmem:[%s12148_s11 + $0x3d0] sm:$0xff]  ;;  %v2671_v48 = vld [vmem:[%s12148_s11 + $0x3d8] sm:$0xff]  ;;  %v8536_v30 = vpack.c.bf16 %v2623_v60, %v2622_v59 }
 0xef6   :  { %v10125_v16 = vpop.f32.mrb[29].mxu1  ;;  %v10127_v17 = vpop.f32.mrb[23].mxu0  ;;  %8523 = vmatprep.subr.bf16.mxu1 %v8522_v62  ;;  %8555 = vmatprep.subr.bf16.mxu0 %v8554_v6  ;;  %v8566_v0 = vpack.c.bf16 %v2671_v48, %v2670_v47  ;;  %v2654_v1 = vld [vmem:[%s12148_s11 + $0x350] sm:$0xff]  ;;  %v2655_v2 = vld [vmem:[%s12148_s11 + $0x358] sm:$0xff]  ;;  %v10288_v8 = vld [vmem:[%s12149_s10 + $0x8] sm:$0xff] }
 0xef7   :  { %3025 = vmatprep.mubr.f32.mxu1 %v2521_v5  ;;  %3100 = vmatprep.mubr.f32.mxu0 %v2523_v9  ;;  %v2673_v5 = vld [vmem:[%s12148_s11 + $0x3e8] sm:$0xff]  ;;  %v10212_v9 = vsub.s32 4, %v9996_v49  ;;  %v8568_v12 = vpack.c.bf16 %v2655_v2, %v2654_v1  ;;  %v2642_v49 = vld [vmem:[%s12148_s11 + $0x2f0] sm:$0xff]  ;;  %v2675_v34 = vld [vmem:[%s12148_s11 + $0x3f8] sm:$0xff] }
 0xef8   :  { %v8570_v25 = vpack.c.bf16 %v2673_v5, %v2672_v4  ;;  %v2674_v33 = vld [vmem:[%s12148_s11 + $0x3f0] sm:$0xff]  ;;  %v2627_v47 = vld [vmem:[%s12148_s11 + $0x278] sm:$0xff]  ;;  %v2692_v1 = vld [vmem:[%s12148_s11 + $0x480] sm:$0xff] }
 0xef9   :  { %8525 = vmatpush3.bf16.msra.mxu1 %v8524_v13  ;;  %8557 = vmatpush3.bf16.msra.mxu0 %v8556_v15  ;;  %v10147_v35 = vpop.f32.mrb[30].mxu1  ;;  %v10149_v27 = vpop.f32.mrb[24].mxu0  ;;  %v2626_v44 = vld [vmem:[%s12148_s11 + $0x270] sm:$0xff]  ;;  %v2724_v2 = vld [vmem:[%s12148_s11 + $0x580] sm:$0xff]  ;;  %v2677_v5 = vld [vmem:[%s12148_s11 + $0x408] sm:$0xff] }
 0xefa   :  { %v10157_v37 = vpop.f32.mrb[31].mxu1  ;;  %v10159_v38 = vpop.f32.mrb[25].mxu0  ;;  %8527 = vmatprep.subr.bf16.mxu1 %v8526_v18  ;;  %8559 = vmatprep.subr.bf16.mxu0 %v8558_v19  ;;  %v2624_v18 = vld [vmem:[%s12148_s11 + $0x260] sm:$0xff]  ;;  %v2625_v19 = vld [vmem:[%s12148_s11 + $0x268] sm:$0xff]  ;;  %v2658_v48 = vld [vmem:[%s12148_s11 + $0x370] sm:$0xff] }
 0xefb   :  { %v8540_v42 = vpack.c.bf16 %v2625_v19, %v2624_v18  ;;  %v2676_v4 = vld [vmem:[%s12148_s11 + $0x400] sm:$0xff] }
 0xefc   :  { %v2708_v19 = vld [vmem:[%s12148_s11 + $0x500] sm:$0xff] }
 0xefd   :  { %8529 = vmatpush3.bf16.msra.mxu1 %v8528_v28  ;;  %8561 = vmatpush3.bf16.msra.mxu0 %v8560_v32  ;;  %v10179_v55 = vpop.f32.mrb[32].mxu1  ;;  %v10181_v56 = vpop.f32.mrb[26].mxu0  ;;  %v2657_v28 = vld [vmem:[%s12148_s11 + $0x368] sm:$0xff]  ;;  %v2643_v32 = vld [vmem:[%s12148_s11 + $0x2f8] sm:$0xff] }
 0xefe   :  { %v10189_v62 = vpop.f32.mrb[33].mxu1  ;;  %v10191_v6 = vpop.f32.mrb[27].mxu0  ;;  %8531 = vmatprep.subr.bf16.mxu1 %v8530_v40  ;;  %8563 = vmatprep.subr.bf16.mxu0 %v8562_v41  ;;  %v1833_v40 = vrot.slane %v10007_v52, %v10212_v9  ;;  %v8572_v43 = vpack.c.bf16 %v2657_v28, %v2656_v26  ;;  %v8542_v60 = vpack.c.bf16 %v2643_v32, %v2642_v49  ;;  %v2695_v32 = vld [vmem:[%s12148_s11 + $0x498] sm:$0xff] }
 0xeff   :  { %v8610_v49 = vpack.c.bf16 %v2725_v3, %v2724_v2  ;;  %v2729_v3 = vld [vmem:[%s12148_s11 + $0x5a8] sm:$0xff] }
 0xf00   :  { %v2121_v26 = vadd.f32 %v10088_v45, %v1833_v40  ;;  %v2129_v45 = vadd.f32 %v10125_v16, %v10055_v29  ;;  %v2127_v29 = vadd.f32 %v10115_v10, %v1833_v40  ;;  %v2678_v16 = vld [vmem:[%s12148_s11 + $0x410] sm:$0xff]  ;;  %v2711_v40 = vld [vmem:[%s12148_s11 + $0x518] sm:$0xff] }
 0xf01   :  { %8533 = vmatpush3.bf16.msra.mxu1 %v8532_v57  ;;  %8565 = vmatpush3.bf16.msra.mxu0 %v8564_v58  ;;  %v10214_v13 = vpop.f32.mrb[34].mxu1  ;;  %v10216_v15 = vpop.f32.mrb[28].mxu0  ;;  %v1841_v57 = vrot.slane %v10007_v52, %v10225_v20  ;;  %v2693_v52 = vld [vmem:[%s12148_s11 + $0x488] sm:$0xff] }
 0xf02   :  { %v10227_v22 = vpop.f32.mrb[35].mxu1  ;;  %v10229_v23 = vpop.f32.mrb[29].mxu0  ;;  %8535 = vmatprep.subr.bf16.mxu1 %v8534_v63  ;;  %8567 = vmatprep.subr.bf16.mxu0 %v8566_v0  ;;  %v8574_v63 = vpack.c.bf16 %v2675_v34, %v2674_v33  ;;  %v2659_v0 = vld [vmem:[%s12148_s11 + $0x378] sm:$0xff]  ;;  %v8578_v18 = vpack.c.bf16 %v2693_v52, %v2692_v1  ;;  %v2726_v33 = vld [vmem:[%s12148_s11 + $0x590] sm:$0xff]  ;;  %v2537_v1 = vmax.f32 %v2129_v45, 0.0 }
 0xf03   :  { %v2198_v28 = vadd.f32 %v10090_v46, %v1841_v57  ;;  %v2727_v34 = vld [vmem:[%s12148_s11 + $0x598] sm:$0xff]  ;;  %v2206_v46 = vadd.f32 %v10127_v17, %v10074_v39  ;;  %v2204_v39 = vadd.f32 %v10117_v11, %v1841_v57  ;;  %v2710_v11 = vld [vmem:[%s12148_s11 + $0x510] sm:$0xff]  ;;  %v2696_v57 = vld [vmem:[%s12148_s11 + $0x4a0] sm:$0xff] }
 0xf04   :  { %v2679_v17 = vld [vmem:[%s12148_s11 + $0x418] sm:$0xff]  ;;  %v2730_v45 = vld [vmem:[%s12148_s11 + $0x5b0] sm:$0xff] }
 0xf05   :  { %8537 = vmatpush3.bf16.msra.mxu1 %v8536_v30  ;;  %8569 = vmatpush3.bf16.msra.mxu0 %v8568_v12  ;;  %v10251_v41 = vpop.f32.mrb[36].mxu1  ;;  %v10253_v36 = vpop.f32.mrb[30].mxu0  ;;  %v8544_v30 = vpack.c.bf16 %v2627_v47, %v2626_v44  ;;  %v8576_v12 = vpack.c.bf16 %v2659_v0, %v2658_v48  ;;  %v8580_v44 = vpack.c.bf16 %v2677_v5, %v2676_v4  ;;  %v2522_v0 = vmax.f32 %v2198_v28, 0.0 }
 0xf06   :  { %v10266_v58 = vpop.f32.mrb[37].mxu1  ;;  %v10268_v59 = vpop.f32.mrb[31].mxu0  ;;  %8539 = vmatprep.subr.bf16.mxu1 %v8538_v24  ;;  %8571 = vmatprep.subr.bf16.mxu0 %v8570_v25  ;;  %v2709_v24 = vld [vmem:[%s12148_s11 + $0x508] sm:$0xff]  ;;  %v2694_v25 = vld [vmem:[%s12148_s11 + $0x490] sm:$0xff]  ;;  %v2539_v52 = vmax.f32 %v2206_v46, 0.0  ;;  %v2536_v4 = vmax.f32 %v2127_v29, 0.0 }
 0xf07   :  { %v8612_v47 = vpack.c.bf16 %v2709_v24, %v2708_v19  ;;  %v8582_v48 = vpack.c.bf16 %v2695_v32, %v2694_v25  ;;  %v2538_v5 = vmax.f32 %v2204_v39, 0.0  ;;  %v2681_v19 = vld [vmem:[%s12148_s11 + $0x428] sm:$0xff]  ;;  %v2731_v46 = vld [vmem:[%s12148_s11 + $0x5b8] sm:$0xff]  ;;  %v2714_v29 = vld [vmem:[%s12148_s11 + $0x530] sm:$0xff] }
 0xf08   :  { %v2713_v32 = vld [vmem:[%s12148_s11 + $0x528] sm:$0xff]  ;;  %v2715_v39 = vld [vmem:[%s12148_s11 + $0x538] sm:$0xff] }
 0xf09   :  { %8541 = vmatpush3.bf16.msra.mxu1 %v8540_v42  ;;  %8573 = vmatpush3.bf16.msra.mxu0 %v8572_v43  ;;  %v10322_v42 = vrot.slane %v10288_v8, %v10010_v53  ;;  %v10326_v43 = vrot.slane %v10288_v8, %v10013_v54 }
 0xf0a   :  { %8543 = vmatprep.subr.bf16.mxu1 %v8542_v60  ;;  %8575 = vmatprep.subr.bf16.mxu0 %v8574_v63  ;;  %v8614_v60 = vpack.c.bf16 %v2727_v34, %v2726_v33  ;;  %v2520_v63 = vmax.f32 %v2121_v26, 0.0  ;;  %v2698_v33 = vld [vmem:[%s12148_s11 + $0x4b0] sm:$0xff]  ;;  %v2699_v34 = vld [vmem:[%s12148_s11 + $0x4b8] sm:$0xff] }
 0xf0b   :  { %v2277_v2 = vadd.f32 %v10157_v37, %v10322_v42  ;;  %v2354_v10 = vadd.f32 %v10159_v38, %v10326_v43  ;;  %v2697_v37 = vld [vmem:[%s12148_s11 + $0x4a8] sm:$0xff]  ;;  %v2728_v38 = vld [vmem:[%s12148_s11 + $0x5a0] sm:$0xff] }
 0xf0c   :  { %v8586_v26 = vpack.c.bf16 %v2697_v37, %v2696_v57  ;;  %v8618_v28 = vpack.c.bf16 %v2729_v3, %v2728_v38  ;;  %v2716_v38 = vld [vmem:[%s12148_s11 + $0x540] sm:$0xff]  ;;  %v2717_v3 = vld [vmem:[%s12148_s11 + $0x548] sm:$0xff] }
 0xf0d   :  { %8545 = vmatpush3.bf16.msra.mxu1 %v8544_v30  ;;  %8577 = vmatpush3.bf16.msra.mxu0 %v8576_v12  ;;  %v8584_v30 = vpack.c.bf16 %v2679_v17, %v2678_v16  ;;  %v8616_v12 = vpack.c.bf16 %v2711_v40, %v2710_v11  ;;  %v2525_v24 = vmax.f32 %v2277_v2, 0.0  ;;  %v2527_v25 = vmax.f32 %v2354_v10, 0.0  ;;  %v2700_v16 = vld [vmem:[%s12148_s11 + $0x4c0] sm:$0xff]  ;;  %v2701_v17 = vld [vmem:[%s12148_s11 + $0x4c8] sm:$0xff] }
 0xf0e   :  { %8579 = vmatprep.subr.bf16.mxu1 %v8578_v18  ;;  %8611 = vmatprep.subr.bf16.mxu0 %v8610_v49  ;;  %v2680_v18 = vld [vmem:[%s12148_s11 + $0x420] sm:$0xff]  ;;  %v8624_v10 = vpack.c.bf16 %v2715_v39, %v2714_v29  ;;  %v2685_v40 = vld [vmem:[%s12148_s11 + $0x448] sm:$0xff]  ;;  %v8594_v57 = vpack.c.bf16 %v2701_v17, %v2700_v16  ;;  %v2706_v16 = vld [vmem:[%s12148_s11 + $0x4f0] sm:$0xff] }
 0xf0f   :  { %v2712_v49 = vld [vmem:[%s12148_s11 + $0x520] sm:$0xff]  ;;  %v2721_v39 = vld [vmem:[%s12148_s11 + $0x568] sm:$0xff]  ;;  %v2707_v17 = vld [vmem:[%s12148_s11 + $0x4f8] sm:$0xff] }
 0xf10   :  { %3026 = vmatmul.mubr.f32.vlgmr.msra.gmra.mrb[42].mxu1 %v2520_v63  ;;  %3101 = vmatmul.mubr.f32.vlgmr.msra.gmra.mrb[36].mxu0 %v2522_v0  ;;  %v8590_v63 = vpack.c.bf16 %v2699_v34, %v2698_v33  ;;  %v8622_v0 = vpack.c.bf16 %v2731_v46, %v2730_v45  ;;  %v2684_v11 = vld [vmem:[%s12148_s11 + $0x440] sm:$0xff]  ;;  %v2705_v34 = vld [vmem:[%s12148_s11 + $0x4e8] sm:$0xff] }
 0xf11   :  { %3030 = vmatprep.mubr.f32.mxu1 %v2537_v1  ;;  %3105 = vmatprep.mubr.f32.mxu0 %v2539_v52  ;;  %v2732_v1 = vld [vmem:[%s12148_s11 + $0x5c0] sm:$0xff]  ;;  %v2733_v52 = vld [vmem:[%s12148_s11 + $0x5c8] sm:$0xff] }
 0xf12   :  { %8581 = vmatpush3.bf16.msra.mxu1 %v8580_v44  ;;  %8613 = vmatpush3.bf16.msra.mxu0 %v8612_v47  ;;  %v8588_v44 = vpack.c.bf16 %v2681_v19, %v2680_v18  ;;  %v8620_v47 = vpack.c.bf16 %v2713_v32, %v2712_v49  ;;  %v8626_v37 = vpack.c.bf16 %v2733_v52, %v2732_v1  ;;  %v2718_v49 = vld [vmem:[%s12148_s11 + $0x550] sm:$0xff]  ;;  %v2719_v32 = vld [vmem:[%s12148_s11 + $0x558] sm:$0xff]  ;;  %v2704_v33 = vld [vmem:[%s12148_s11 + $0x4e0] sm:$0xff] }
 0xf13   :  { %8583 = vmatprep.subr.bf16.mxu1 %v8582_v48  ;;  %8615 = vmatprep.subr.bf16.mxu0 %v8614_v60  ;;  %v2682_v48 = vld [vmem:[%s12148_s11 + $0x430] sm:$0xff]  ;;  %v2683_v60 = vld [vmem:[%s12148_s11 + $0x438] sm:$0xff]  ;;  %v8596_v18 = vpack.c.bf16 %v2685_v40, %v2684_v11  ;;  %v8628_v19 = vpack.c.bf16 %v2717_v3, %v2716_v38  ;;  %v2736_v45 = vld [vmem:[%s12148_s11 + $0x5e0] sm:$0xff]  ;;  %v1857_v38 = vrot.slane %v10288_v8, %v10002_v51 }
 0xf14   :  { %3031 = vmatmul.mubr.f32.gmra.mrb[44].mxu1 %v2536_v4  ;;  %3106 = vmatmul.mubr.f32.gmra.mrb[38].mxu0 %v2538_v5  ;;  %v8592_v2 = vpack.c.bf16 %v2683_v60, %v2682_v48  ;;  %v2702_v4 = vld [vmem:[%s12148_s11 + $0x4d0] sm:$0xff]  ;;  %v2703_v5 = vld [vmem:[%s12148_s11 + $0x4d8] sm:$0xff]  ;;  %v2737_v46 = vld [vmem:[%s12148_s11 + $0x5e8] sm:$0xff]  ;;  %v8606_v3 = vpack.c.bf16 %v2707_v17, %v2706_v16 }
 0xf15   :  { %3175 = vmatprep.mubr.f32.mxu1 %v2525_v24  ;;  %3250 = vmatprep.mubr.f32.mxu0 %v2527_v25  ;;  %v2686_v24 = vld [vmem:[%s12148_s11 + $0x450] sm:$0xff]  ;;  %v2687_v25 = vld [vmem:[%s12148_s11 + $0x458] sm:$0xff]  ;;  %v2688_v48 = vld [vmem:[%s12148_s11 + $0x460] sm:$0xff] }
 0xf16   :  { %8585 = vmatpush3.bf16.msra.mxu1 %v8584_v30  ;;  %8617 = vmatpush3.bf16.msra.mxu0 %v8616_v12  ;;  %v2734_v30 = vld [vmem:[%s12148_s11 + $0x5d0] sm:$0xff]  ;;  %v2735_v12 = vld [vmem:[%s12148_s11 + $0x5d8] sm:$0xff]  ;;  %v2689_v60 = vld [vmem:[%s12148_s11 + $0x468] sm:$0xff] }
 0xf17   :  { %8587 = vmatprep.subr.bf16.mxu1 %v8586_v26  ;;  %8619 = vmatprep.subr.bf16.mxu0 %v8618_v28  ;;  %v8598_v26 = vpack.c.bf16 %v2703_v5, %v2702_v4  ;;  %v8630_v28 = vpack.c.bf16 %v2735_v12, %v2734_v30  ;;  %v2720_v29 = vld [vmem:[%s12148_s11 + $0x560] sm:$0xff]  ;;  %v2738_v1 = vld [vmem:[%s12148_s11 + $0x5f0] sm:$0xff]  ;;  %v2739_v52 = vld [vmem:[%s12148_s11 + $0x5f8] sm:$0xff] }
 0xf18   :  { %v8636_v11 = vpack.c.bf16 %v2721_v39, %v2720_v29  ;;  %v2690_v40 = vld [vmem:[%s12148_s11 + $0x470] sm:$0xff]  ;;  %v8638_v4 = vpack.c.bf16 %v2739_v52, %v2738_v1  ;;  %v2723_v5 = vld [vmem:[%s12148_s11 + $0x578] sm:$0xff]  ;;  %v2756_v30 = vld [vmem:[%s12148_s11 + $0x680] sm:$0xff] }
 0xf19   :  { %v2757_v12 = vld [vmem:[%s12148_s11 + $0x688] sm:$0xff] }
 0xf1a   :  { %8589 = vmatpush3.bf16.msra.mxu1 %v8588_v44  ;;  %8621 = vmatpush3.bf16.msra.mxu0 %v8620_v47  ;;  %v8600_v44 = vpack.c.bf16 %v2687_v25, %v2686_v24  ;;  %v8632_v47 = vpack.c.bf16 %v2719_v32, %v2718_v49  ;;  %v2740_v24 = vld [vmem:[%s12148_s11 + $0x600] sm:$0xff]  ;;  %v2741_v25 = vld [vmem:[%s12148_s11 + $0x608] sm:$0xff]  ;;  %v8642_v49 = vpack.c.bf16 %v2757_v12, %v2756_v30 }
 0xf1b   :  { %8591 = vmatprep.subr.bf16.mxu1 %v8590_v63  ;;  %8623 = vmatprep.subr.bf16.mxu0 %v8622_v0  ;;  %v8602_v63 = vpack.c.bf16 %v2705_v34, %v2704_v33  ;;  %v8634_v0 = vpack.c.bf16 %v2737_v46, %v2736_v45  ;;  %v2772_v32 = vld [vmem:[%s12148_s11 + $0x700] sm:$0xff]  ;;  %v2773_v33 = vld [vmem:[%s12148_s11 + $0x708] sm:$0xff]  ;;  %v2758_v34 = vld [vmem:[%s12148_s11 + $0x690] sm:$0xff]  ;;  %v2352_v46 = vadd.f32 %v10149_v27, %v1857_v38 }
 0xf1c   :  { %v2360_v27 = vadd.f32 %v10191_v6, %v10326_v43  ;;  %v8644_v29 = vpack.c.bf16 %v2741_v25, %v2740_v24  ;;  %v8676_v39 = vpack.c.bf16 %v2773_v33, %v2772_v32  ;;  %v2358_v6 = vadd.f32 %v10181_v56, %v1857_v38  ;;  %v2743_v43 = vld [vmem:[%s12148_s11 + $0x618] sm:$0xff]  ;;  %v2774_v56 = vld [vmem:[%s12148_s11 + $0x710] sm:$0xff]  ;;  %v2744_v30 = vld [vmem:[%s12148_s11 + $0x620] sm:$0xff] }
 0xf1d   :  { %v2526_v52 = vmax.f32 %v2352_v46, 0.0  ;;  %v2745_v12 = vld [vmem:[%s12148_s11 + $0x628] sm:$0xff]  ;;  %v2763_v32 = vld [vmem:[%s12148_s11 + $0x6b8] sm:$0xff]  ;;  %v2794_v33 = vld [vmem:[%s12148_s11 + $0x7b0] sm:$0xff] }
 0xf1e   :  { %8593 = vmatpush3.bf16.msra.mxu1 %v8592_v2  ;;  %8625 = vmatpush3.bf16.msra.mxu0 %v8624_v10  ;;  %v1849_v2 = vrot.slane %v10288_v8, %v9999_v50  ;;  %v8604_v10 = vpack.c.bf16 %v2689_v60, %v2688_v48  ;;  %v2790_v48 = vld [vmem:[%s12148_s11 + $0x790] sm:$0xff]  ;;  %v2791_v60 = vld [vmem:[%s12148_s11 + $0x798] sm:$0xff] }
 0xf1f   :  { %8595 = vmatprep.subr.bf16.mxu1 %v8594_v57  ;;  %8627 = vmatprep.subr.bf16.mxu0 %v8626_v37  ;;  %v2691_v57 = vld [vmem:[%s12148_s11 + $0x478] sm:$0xff]  ;;  %v2722_v37 = vld [vmem:[%s12148_s11 + $0x570] sm:$0xff]  ;;  %v8678_v17 = vpack.c.bf16 %v2791_v60, %v2790_v48 }
 0xf20   :  { %v2275_v45 = vadd.f32 %v10147_v35, %v1849_v2  ;;  %v2283_v35 = vadd.f32 %v10189_v62, %v10322_v42  ;;  %v2281_v62 = vadd.f32 %v10179_v55, %v1849_v2  ;;  %v2742_v42 = vld [vmem:[%s12148_s11 + $0x610] sm:$0xff]  ;;  %v2775_v2 = vld [vmem:[%s12148_s11 + $0x718] sm:$0xff] }
 0xf22   :  { %8597 = vmatpush3.bf16.msra.mxu1 %v8596_v18  ;;  %8629 = vmatpush3.bf16.msra.mxu0 %v8628_v19  ;;  %v2788_v18 = vld [vmem:[%s12148_s11 + $0x780] sm:$0xff]  ;;  %v2789_v19 = vld [vmem:[%s12148_s11 + $0x788] sm:$0xff]  ;;  %v2524_v1 = vmax.f32 %v2275_v45, 0.0  ;;  %v2540_v38 = vmax.f32 %v2281_v62, 0.0  ;;  %v8652_v45 = vpack.c.bf16 %v2745_v12, %v2744_v30 }
 0xf23   :  { %8599 = vmatprep.subr.bf16.mxu1 %v8598_v26  ;;  %8631 = vmatprep.subr.bf16.mxu0 %v8630_v28  ;;  %v8608_v26 = vpack.c.bf16 %v2691_v57, %v2690_v40  ;;  %v8640_v28 = vpack.c.bf16 %v2723_v5, %v2722_v37  ;;  %v2760_v57 = vld [vmem:[%s12148_s11 + $0x6a0] sm:$0xff]  ;;  %v2793_v37 = vld [vmem:[%s12148_s11 + $0x7a8] sm:$0xff]  ;;  %v8680_v5 = vpack.c.bf16 %v2775_v2, %v2774_v56  ;;  %v2798_v56 = vld [vmem:[%s12148_s11 + $0x7d0] sm:$0xff] }
 0xf24   :  { %v2748_v62 = vld [vmem:[%s12148_s11 + $0x640] sm:$0xff]  ;;  %v2799_v2 = vld [vmem:[%s12148_s11 + $0x7d8] sm:$0xff]  ;;  %v2769_v12 = vld [vmem:[%s12148_s11 + $0x6e8] sm:$0xff] }
 0xf25   :  { %v2768_v30 = vld [vmem:[%s12148_s11 + $0x6e0] sm:$0xff] }
 0xf26   :  { %8601 = vmatpush3.bf16.msra.mxu1 %v8600_v44  ;;  %8633 = vmatpush3.bf16.msra.mxu0 %v8632_v47  ;;  %v8674_v44 = vpack.c.bf16 %v2789_v19, %v2788_v18  ;;  %v2759_v47 = vld [vmem:[%s12148_s11 + $0x698] sm:$0xff] }
 0xf27   :  { %8603 = vmatprep.subr.bf16.mxu1 %v8602_v63  ;;  %8635 = vmatprep.subr.bf16.mxu0 %v8634_v0  ;;  %v10538_v63 = vrot.slane %v10288_v8, %v10030_v61  ;;  %v10542_v0 = vrot.slane %v10288_v8, %v10051_v14  ;;  %v8646_v16 = vpack.c.bf16 %v2759_v47, %v2758_v34  ;;  %v2795_v34 = vld [vmem:[%s12148_s11 + $0x7b8] sm:$0xff] }
 0xf28   :  { %v2747_v47 = vld [vmem:[%s12148_s11 + $0x638] sm:$0xff]  ;;  %v8686_v60 = vpack.c.bf16 %v2795_v34, %v2794_v33  ;;  %v2784_v33 = vld [vmem:[%s12148_s11 + $0x760] sm:$0xff]  ;;  %v2785_v34 = vld [vmem:[%s12148_s11 + $0x768] sm:$0xff] }
 0xf29   :  { %v2431_v40 = vadd.f32 %v10227_v22, %v10538_v63  ;;  %v2508_v55 = vadd.f32 %v10229_v23, %v10542_v0  ;;  %v2761_v22 = vld [vmem:[%s12148_s11 + $0x6a8] sm:$0xff]  ;;  %v2792_v23 = vld [vmem:[%s12148_s11 + $0x7a0] sm:$0xff] }
 0xf2a   :  { %8605 = vmatpush3.bf16.msra.mxu1 %v8604_v10  ;;  %8637 = vmatpush3.bf16.msra.mxu0 %v8636_v11  ;;  %v2541_v10 = vmax.f32 %v2283_v35, 0.0  ;;  %v2543_v11 = vmax.f32 %v2360_v27, 0.0  ;;  %v8650_v24 = vpack.c.bf16 %v2761_v22, %v2760_v57  ;;  %v8682_v25 = vpack.c.bf16 %v2793_v37, %v2792_v23  ;;  %v2778_v35 = vld [vmem:[%s12148_s11 + $0x730] sm:$0xff]  ;;  %v2779_v27 = vld [vmem:[%s12148_s11 + $0x738] sm:$0xff] }
 0xf2b   :  { %8607 = vmatprep.subr.bf16.mxu1 %v8606_v3  ;;  %8639 = vmatprep.subr.bf16.mxu0 %v8638_v4  ;;  %v2542_v3 = vmax.f32 %v2358_v6, 0.0  ;;  %v8648_v4 = vpack.c.bf16 %v2743_v43, %v2742_v42  ;;  %v2529_v18 = vmax.f32 %v2431_v40, 0.0  ;;  %v2531_v19 = vmax.f32 %v2508_v55, 0.0  ;;  %v2749_v6 = vld [vmem:[%s12148_s11 + $0x648] sm:$0xff]  ;;  %v2766_v40 = vld [vmem:[%s12148_s11 + $0x6d0] sm:$0xff]  ;;  %v2767_v55 = vld [vmem:[%s12148_s11 + $0x6d8] sm:$0xff] }
 0xf2c   :  { %v8660_v57 = vpack.c.bf16 %v2749_v6, %v2748_v62  ;;  %v2750_v23 = vld [vmem:[%s12148_s11 + $0x650] sm:$0xff]  ;;  %v2751_v37 = vld [vmem:[%s12148_s11 + $0x658] sm:$0xff] }
 0xf2e   :  { %8609 = vmatpush3.bf16.msra.mxu1 %v8608_v26  ;;  %8641 = vmatpush3.bf16.msra.mxu0 %v8640_v28  ;;  %v2776_v26 = vld [vmem:[%s12148_s11 + $0x720] sm:$0xff]  ;;  %v2777_v28 = vld [vmem:[%s12148_s11 + $0x728] sm:$0xff] }
 0xf2f   :  { %8643 = vmatprep.subr.bf16.mxu1 %v8642_v49  ;;  %8675 = vmatprep.subr.bf16.mxu0 %v8674_v44  ;;  %v2762_v49 = vld [vmem:[%s12148_s11 + $0x6b0] sm:$0xff]  ;;  %v8684_v46 = vpack.c.bf16 %v2777_v28, %v2776_v26  ;;  %v2752_v26 = vld [vmem:[%s12148_s11 + $0x660] sm:$0xff]  ;;  %v2753_v28 = vld [vmem:[%s12148_s11 + $0x668] sm:$0xff] }
 0xf30   :  { %v2746_v44 = vld [vmem:[%s12148_s11 + $0x630] sm:$0xff]  ;;  %v8654_v48 = vpack.c.bf16 %v2763_v32, %v2762_v49  ;;  %v8666_v49 = vpack.c.bf16 %v2769_v12, %v2768_v30 }
 0xf31   :  { %3176 = vmatmul.mubr.f32.vlgmr.msra.gmra.mrb[46].mxu1 %v2524_v1  ;;  %3251 = vmatmul.mubr.f32.vlgmr.msra.gmra.mrb[40].mxu0 %v2526_v52  ;;  %v8656_v1 = vpack.c.bf16 %v2747_v47, %v2746_v44  ;;  %v8688_v52 = vpack.c.bf16 %v2779_v27, %v2778_v35  ;;  %v2802_v44 = vld [vmem:[%s12148_s11 + $0x7f0] sm:$0xff]  ;;  %v2803_v47 = vld [vmem:[%s12148_s11 + $0x7f8] sm:$0xff]  ;;  %v8700_v35 = vpack.c.bf16 %v2785_v34, %v2784_v33 }
 0xf32   :  { %3180 = vmatprep.mubr.f32.mxu1 %v2541_v10  ;;  %3255 = vmatprep.mubr.f32.mxu0 %v2543_v11  ;;  %v2780_v10 = vld [vmem:[%s12148_s11 + $0x740] sm:$0xff]  ;;  %v2781_v11 = vld [vmem:[%s12148_s11 + $0x748] sm:$0xff]  ;;  %v2754_v27 = vld [vmem:[%s12148_s11 + $0x670] sm:$0xff] }
 0xf33   :  { %8645 = vmatpush3.bf16.msra.mxu1 %v8644_v29  ;;  %8677 = vmatpush3.bf16.msra.mxu0 %v8676_v39  ;;  %v2764_v29 = vld [vmem:[%s12148_s11 + $0x6c0] sm:$0xff]  ;;  %v2765_v39 = vld [vmem:[%s12148_s11 + $0x6c8] sm:$0xff]  ;;  %v8692_v22 = vpack.c.bf16 %v2781_v11, %v2780_v10  ;;  %v2514_v10 = vadd.f32 %v10268_v59, %v10542_v0 }
 0xf34   :  { %8647 = vmatprep.subr.bf16.mxu1 %v8646_v16  ;;  %8679 = vmatprep.subr.bf16.mxu0 %v8678_v17  ;;  %v2796_v16 = vld [vmem:[%s12148_s11 + $0x7c0] sm:$0xff]  ;;  %v2797_v17 = vld [vmem:[%s12148_s11 + $0x7c8] sm:$0xff]  ;;  %v8658_v42 = vpack.c.bf16 %v2765_v39, %v2764_v29  ;;  %v1873_v29 = vrot.slane %v10288_v8, %v10225_v20 }
 0xf35   :  { %3181 = vmatmul.mubr.f32.gmra.mrb[48].mxu1 %v2540_v38  ;;  %3256 = vmatmul.mubr.f32.gmra.mrb[42].mxu0 %v2542_v3  ;;  %v8690_v43 = vpack.c.bf16 %v2797_v17, %v2796_v16  ;;  %v8662_v38 = vpack.c.bf16 %v2767_v55, %v2766_v40  ;;  %v8694_v3 = vpack.c.bf16 %v2799_v2, %v2798_v56  ;;  %v2755_v17 = vld [vmem:[%s12148_s11 + $0x678] sm:$0xff] }
 0xf36   :  { %3325 = vmatprep.mubr.f32.mxu1 %v2529_v18  ;;  %3400 = vmatprep.mubr.f32.mxu0 %v2531_v19  ;;  %v2800_v18 = vld [vmem:[%s12148_s11 + $0x7e0] sm:$0xff]  ;;  %v2801_v19 = vld [vmem:[%s12148_s11 + $0x7e8] sm:$0xff]  ;;  %v8702_v16 = vpack.c.bf16 %v2803_v47, %v2802_v44  ;;  %v8672_v62 = vpack.c.bf16 %v2755_v17, %v2754_v27  ;;  %v2512_v56 = vadd.f32 %v10253_v36, %v1873_v29 }
 0xf37   :  { %8649 = vmatpush3.bf16.msra.mxu1 %v8648_v4  ;;  %8681 = vmatpush3.bf16.msra.mxu0 %v8680_v5  ;;  %v2782_v4 = vld [vmem:[%s12148_s11 + $0x750] sm:$0xff]  ;;  %v2783_v5 = vld [vmem:[%s12148_s11 + $0x758] sm:$0xff]  ;;  %v8698_v32 = vpack.c.bf16 %v2801_v19, %v2800_v18 }
 0xf38   :  { %8651 = vmatprep.subr.bf16.mxu1 %v8650_v24  ;;  %8683 = vmatprep.subr.bf16.mxu0 %v8682_v25  ;;  %v8664_v24 = vpack.c.bf16 %v2751_v37, %v2750_v23  ;;  %v8696_v25 = vpack.c.bf16 %v2783_v5, %v2782_v4 }
 0xf3b   :  { %8653 = vmatpush3.bf16.msra.mxu1 %v8652_v45  ;;  %8685 = vmatpush3.bf16.msra.mxu0 %v8684_v46  ;;  %v2770_v45 = vld [vmem:[%s12148_s11 + $0x6f0] sm:$0xff]  ;;  %v2771_v46 = vld [vmem:[%s12148_s11 + $0x6f8] sm:$0xff] }
 0xf3c   :  { %8655 = vmatprep.subr.bf16.mxu1 %v8654_v48  ;;  %8687 = vmatprep.subr.bf16.mxu0 %v8686_v60  ;;  %v1865_v48 = vrot.slane %v10288_v8, %v10212_v9  ;;  %v8668_v60 = vpack.c.bf16 %v2753_v28, %v2752_v26  ;;  %v8670_v39 = vpack.c.bf16 %v2771_v46, %v2770_v45 }
 0xf3e   :  { %v2429_v6 = vadd.f32 %v10214_v13, %v1865_v48  ;;  %v2435_v55 = vadd.f32 %v10251_v41, %v1865_v48  ;;  %v6990_v41 = vld [vmem:[%s12150_s12] ss:$0 sm:$0xff] }
 0xf3f   :  { %8657 = vmatpush3.bf16.msra.mxu1 %v8656_v1  ;;  %8689 = vmatpush3.bf16.msra.mxu0 %v8688_v52  ;;  %v2786_v1 = vld [vmem:[%s12148_s11 + $0x770] sm:$0xff]  ;;  %v2787_v52 = vld [vmem:[%s12148_s11 + $0x778] sm:$0xff] }
 0xf40   :  { %8659 = vmatprep.subr.bf16.mxu1 %v8658_v42  ;;  %8691 = vmatprep.subr.bf16.mxu0 %v8690_v43  ;;  %v8704_v8 = vpack.c.bf16 %v2787_v52, %v2786_v1  ;;  %v2506_v42 = vadd.f32 %v10216_v15, %v1873_v29  ;;  %v2437_v43 = vadd.f32 %v10266_v58, %v10538_v63  ;;  %v2528_v11 = vmax.f32 %v2429_v6, 0.0 }
 0xf41   :  { %v2547_v15 = vmax.f32 %v2514_v10, 0.0  ;;  %v2544_v58 = vmax.f32 %v2435_v55, 0.0  ;;  %v2546_v63 = vmax.f32 %v2512_v56, 0.0 }
 0xf42   :  { %v2530_v40 = vmax.f32 %v2506_v42, 0.0  ;;  %v2545_v13 = vmax.f32 %v2437_v43, 0.0 }
 0xf43   :  { %8661 = vmatpush3.bf16.msra.mxu1 %v8660_v57  ;;  %8693 = vmatpush3.bf16.msra.mxu0 %v8692_v22 }
 0xf44   :  { %8663 = vmatprep.subr.bf16.mxu1 %v8662_v38  ;;  %8695 = vmatprep.subr.bf16.mxu0 %v8694_v3 }
 0xf47   :  { %8665 = vmatpush3.bf16.msra.mxu1 %v8664_v24  ;;  %8697 = vmatpush3.bf16.msra.mxu0 %v8696_v25 }
 0xf48   :  { %8667 = vmatprep.subr.bf16.mxu1 %v8666_v49  ;;  %8699 = vmatprep.subr.bf16.mxu0 %v8698_v32 }
 0xf4b   :  { %8669 = vmatpush3.bf16.msra.mxu1 %v8668_v60  ;;  %8701 = vmatpush3.bf16.msra.mxu0 %v8700_v35 }
 0xf4c   :  { %8671 = vmatprep.subr.bf16.mxu1 %v8670_v39  ;;  %8703 = vmatprep.subr.bf16.mxu0 %v8702_v16 }
 0xf4f   :  { %8673 = vmatpush3.bf16.msra.mxu1 %v8672_v62  ;;  %8705 = vmatpush3.bf16.msra.mxu0 %v8704_v8 }
 0xf50   :  { %8247 = vmatprep.subr.mxu0 %v9174_v31 }
 0xf52   :  { %3326 = vmatmul.mubr.f32.vlgmr.msra.gmra.mrb[50].mxu1 %v2528_v11  ;;  %3401 = vmatmul.mubr.f32.vlgmr.msra.gmra.mrb[44].mxu0 %v2530_v40 }
 0xf53   :  { %3330 = vmatprep.mubr.f32.mxu1 %v2545_v13  ;;  %3405 = vmatprep.mubr.f32.mxu0 %v2547_v15 }
 0xf56   :  { %3331 = vmatmul.mubr.f32.gmra.mrb[52].mxu1 %v2544_v58  ;;  %3406 = vmatmul.mubr.f32.gmra.mrb[46].mxu0 %v2546_v63 }
 0xf57   :  { %8249 = vmatprep.mubr.msk.f32.mxu0 %vm9175_vm5, %v9174_v31 }
 0xfc3   :  { %v7476_v59 = vpop.f32.mrb[38].mxu1  ;;  %v7514_v0 = vpop.f32.mrb[32].mxu0 }
 0xfc4   :  { %v7477_v36 = vpop.f32.mrb[39].mxu1  ;;  %v7515_v2 = vpop.f32.mrb[33].mxu0 }
 0xfc5   :  { %v7478_v57 = vadd.f32 %v7477_v36, %v7476_v59  ;;  %v7516_v22 = vadd.f32 %v7515_v2, %v7514_v0 }
 0xfc7   :  { %v2878_v23 = vadd.f32 %v7478_v57, %v6990_v41  ;;  %v7479_v37 = vpop.f32.mrb[40].mxu1  ;;  %v7517_v38 = vpop.f32.mrb[34].mxu0 }
 0xfc8   :  { %v7480_v3 = vpop.f32.mrb[41].mxu1  ;;  %v7518_v4 = vpop.f32.mrb[35].mxu0 }
 0xfc9   :  { %v2953_v5 = vadd.f32 %v7516_v22, %v2878_v23  ;;  %v7481_v30 = vadd.f32 %v7480_v3, %v7479_v37  ;;  %v7519_v12 = vadd.f32 %v7518_v4, %v7517_v38 }
 0xfcb   :  { %v2883_v18 = vadd.f32 %v7481_v30, %v6990_v41 }
 0xfcd   :  { %v2958_v19 = vadd.f32 %v7519_v12, %v2883_v18 }
 0xfe3   :  { %v7552_v24 = vpop.f32.mrb[42].mxu1  ;;  %v7590_v25 = vpop.f32.mrb[36].mxu0 }
 0xfe4   :  { %v7553_v26 = vpop.f32.mrb[43].mxu1  ;;  %v7591_v28 = vpop.f32.mrb[37].mxu0 }
 0xfe5   :  { %v7554_v49 = vadd.f32 %v7553_v26, %v7552_v24  ;;  %v7592_v32 = vadd.f32 %v7591_v28, %v7590_v25 }
 0xfe7   :  { %v3028_v33 = vadd.f32 %v7554_v49, %v2953_v5  ;;  %v7555_v34 = vpop.f32.mrb[44].mxu1  ;;  %v7593_v45 = vpop.f32.mrb[38].mxu0 }
 0xfe8   :  { %v7556_v46 = vpop.f32.mrb[45].mxu1  ;;  %v7594_v44 = vpop.f32.mrb[39].mxu0 }
 0xfe9   :  { %v3103_v47 = vadd.f32 %v7592_v32, %v3028_v33  ;;  %v7557_v48 = vadd.f32 %v7556_v46, %v7555_v34  ;;  %v7595_v60 = vadd.f32 %v7594_v44, %v7593_v45  ;;  %v6994_v45 = vld [vmem:[%s12140_s3 + $0x28] sm:$0xff]  ;;  %v6995_v44 = vld [vmem:[%s12140_s3 + $0x30] sm:$0xff] }
 0xfeb   :  { %v3033_v35 = vadd.f32 %v7557_v48, %v2958_v19 }
 0xfed   :  { %v3108_v27 = vadd.f32 %v7595_v60, %v3033_v35 }
0x1004   :  { %v7628_v29 = vpop.f32.mrb[46].mxu1  ;;  %v7666_v39 = vpop.f32.mrb[40].mxu0 }
0x1005   :  { %v7629_v16 = vpop.f32.mrb[47].mxu1  ;;  %v7667_v17 = vpop.f32.mrb[41].mxu0 }
0x1006   :  { %v7630_v1 = vadd.f32 %v7629_v16, %v7628_v29  ;;  %v7668_v52 = vadd.f32 %v7667_v17, %v7666_v39 }
0x1008   :  { %v3178_v62 = vadd.f32 %v7630_v1, %v3103_v47  ;;  %v7631_v8 = vpop.f32.mrb[48].mxu1  ;;  %v7669_v6 = vpop.f32.mrb[42].mxu0  ;;  %v6996_v47 = vld [vmem:[%s12140_s3 + $0x38] sm:$0xff]  ;;  %v6991_v1 = vld [vmem:[%s12151_s13] ss:$0 sm:$0xff] }
0x1009   :  { %v7632_v42 = vpop.f32.mrb[49].mxu1  ;;  %v7670_v43 = vpop.f32.mrb[43].mxu0  ;;  %v8710_v48 = vpack.c.bf16 %v6996_v47, %v6995_v44 }
0x100a   :  { %v3253_v10 = vadd.f32 %v7668_v52, %v3178_v62  ;;  %v7633_v11 = vadd.f32 %v7632_v42, %v7631_v8  ;;  %v7671_v40 = vadd.f32 %v7670_v43, %v7669_v6  ;;  %v6992_v62 = vld [vmem:[%s12152_s14] ss:$0 sm:$0xff] }
0x100c   :  { %v3183_v55 = vadd.f32 %v7633_v11, %v3108_v27 }
0x100e   :  { %v3258_v56 = vadd.f32 %v7671_v40, %v3183_v55  ;;  %v6998_v40 = vld [vmem:[%s12142_s4 + $0x1] ss:$0 sm:$0xff]  ;;  %s12182_s4 = smov 56  }
0x1025   :  { %v7704_v13 = vpop.f32.mrb[50].mxu1  ;;  %v7742_v15 = vpop.f32.mrb[44].mxu0 }
0x1026   :  { %v7705_v58 = vpop.f32.mrb[51].mxu1  ;;  %v7743_v63 = vpop.f32.mrb[45].mxu0 }
0x1027   :  { %v7706_v59 = vadd.f32 %v7705_v58, %v7704_v13  ;;  %v7744_v0 = vadd.f32 %v7743_v63, %v7742_v15 }
0x1029   :  { %v3328_v41 = vadd.f32 %v7706_v59, %v3253_v10  ;;  %v7707_v36 = vpop.f32.mrb[52].mxu1  ;;  %v7745_v2 = vpop.f32.mrb[46].mxu0 }
0x102a   :  { %v7708_v57 = vpop.f32.mrb[53].mxu1  ;;  %v7746_v22 = vpop.f32.mrb[47].mxu0 }
0x102b   :  { %v3403_v23 = vadd.f32 %v7744_v0, %v3328_v41  ;;  %v7709_v37 = vadd.f32 %v7708_v57, %v7707_v36  ;;  %v7747_v38 = vadd.f32 %v7746_v22, %v7745_v2 }
0x102d   :  { %v3333_v3 = vadd.f32 %v7709_v37, %v3258_v56  ;;  %v3411_v4 = vadd.f32 %v3403_v23, %v9636_v7 }
0x102f   :  { %v3408_v5 = vadd.f32 %v7747_v38, %v3333_v3  ;;  %v3415_v30 = vsel %vm174_vm4, %v3411_v4, 0.0 }
0x1030   :  { %3416 = vadd.xlane.f32.xlu1 %v3415_v30 }
0x1031   :  { %v3412_v12 = vadd.f32 %v3408_v5, %v9667_v21  ;;  %v6993_v21 = vld [vmem:[%s12140_s3 + $0x20] sm:$0xff] }
0x1032   :  { %v8706_v46 = vpack.c.bf16 %v6994_v45, %v6993_v21 }
0x1033   :  { %v3418_v18 = vsel %vm174_vm4, %v3412_v12, 0.0 }
0x1034   :  { %3419 = vadd.xlane.f32.xlu0 %v3418_v18  ;;  %8707 = vmatprep.subr.bf16.mxu1 %v8706_v46 }
0x1035   :  { %8709 = vmatpush3.bf16.msra.mxu1 %v8706_v46 }
0x1036   :  { %8711 = vmatprep.subr.bf16.mxu1 %v8710_v48 }
0x1039   :  { %8713 = vmatpush3.bf16.msra.mxu1 %v8710_v48 }
0x103a   :  { %8242 = vmatprep.subr.mxu1 %v9174_v31 }
0x10bd   :  { %v3417_v19 = vpop.xlane.xlu1 %3416 }
0x10be   :  { %v3421_v24 = vmul.f32 0.03125, %v3417_v19 }
0x10c0   :  { %v3423_v25 = vsub.f32 %v3411_v4, %v3421_v24 }
0x10c1   :  { %v3420_v26 = vpop.xlane.xlu0 %3419 }
0x10c2   :  { %v3422_v28 = vmul.f32 0.03125, %v3420_v26  ;;  %v3425_v49 = vmul.f32 %v3423_v25, %v3423_v25 }
0x10c4   :  { %v3424_v32 = vsub.f32 %v3412_v12, %v3422_v28  ;;  %v3427_v33 = vsel %vm174_vm4, %v3425_v49, 0.0 }
0x10c5   :  { %3428 = vadd.xlane.f32.xlu1 %v3427_v33 }
0x10c6   :  { %v3426_v7 = vmul.f32 %v3424_v32, %v3424_v32 }
0x10c8   :  { %v3430_v34 = vsel %vm174_vm4, %v3426_v7, 0.0 }
0x10c9   :  { %3431 = vadd.xlane.f32.xlu0 %v3430_v34 }
0x1152   :  { %v3429_v60 = vpop.xlane.xlu1 %3428 }
0x1153   :  { %v3433_v35 = vmul.f32 0.03125, %v3429_v60 }
0x1155   :  { %v3435_v27 = vadd.f32 1e-05, %v3433_v35 }
0x1156   :  { %v3432_v29 = vpop.xlane.xlu0 %3431 }
0x1157   :  { %9105 = vrsqrt.f32 %v3435_v27  ;;  %v3434_v39 = vmul.f32 0.03125, %v3432_v29 }
0x1159   :  { %v3436_v16 = vadd.f32 1e-05, %v3434_v39 }
0x115b   :  { %9107 = vrsqrt.f32 %v3436_v16 }
0x1161   :  { %v9106_v17 = vpop.eup %9105 }
0x1162   :  { %v3439_v52 = vmul.f32 %v9106_v17, %v3423_v25 }
0x1164   :  { %v3447_v8 = vmul.f32 %v6991_v1, %v3439_v52 }
0x1165   :  { %v9108_v6 = vpop.eup %9107 }
0x1166   :  { %v3440_v42 = vmul.f32 %v9108_v6, %v3424_v32  ;;  %v10749_v43 = vadd.f32 %v6992_v62, %v3447_v8 }
0x1168   :  { %v3448_v10 = vmul.f32 %v6991_v1, %v3440_v42  ;;  %8239 = vmatprep.mubr.msk.f32.mxu1 %vm174_vm4, %v10749_v43 }
0x116a   :  { %v10753_v11 = vadd.f32 %v6992_v62, %v3448_v10 }
0x116c   :  { %8240 = vmatmul.mubr.msk.f32.vlgmr.msra.gmra.mrb[54].mxu1 %vm174_vm4, %v10753_v11 }
0x116d   :  { %8244 = vmatprep.mubr.msk.f32.mxu1 %vm9175_vm5, %v9174_v31 }
0x123f   :  { %v8241_v55 = vpop.f32.mrb[54].mxu1 }
0x1240   :  { %v10762_v56 = vadd.f32 %v8241_v55, %v6998_v40  ;;  %v3542_v13 = vpop.f32.mrb[55].mxu1 }
0x1241   :  { %v10764_v15 = vadd.f32 %v6998_v40, %v3542_v13 }
0x1242   :  { %3629 = vrot.lane.b32.xlu0 %v10762_v56, %s9176_s21 }
0x1243   :  { %3552 = vrot.lane.b32.xlu1 %v10764_v15, %s9176_s21  ;;  %s12183_s21 = smov 80  }
0x12b4   :  { %v3630_v58 = vpop.permute.xlu0 %3629 }
0x12b5   :  { %8248 = vmatpush3.xpose.msk.msra.mxu0 %vm259_vm6, %v3630_v58  ;;  %v3553_v63 = vpop.permute.xlu1 %3552 }
0x12b6   :  { %8243 = vmatpush3.xpose.msk.msra.mxu1 %vm259_vm6, %v3553_v63  ;;  %8257 = vmatprep.subr.mxu0 %v9174_v31 }
0x12b7   :  { %8252 = vmatprep.subr.mxu1 %v9174_v31 }
0x12b8   :  { %8250 = vmatmul.mubr.msk.f32.vlgmr.msra.gmra.mrb[48].mxu0 %vm259_vm6, %v10762_v56 }
0x12b9   :  { %8245 = vmatmul.mubr.msk.f32.vlgmr.msra.gmra.mrb[56].mxu1 %vm259_vm6, %v10764_v15  ;;  %8259 = vmatprep.mubr.msk.f32.mxu0 %vm9175_vm5, %v9174_v31 }
0x12ba   :  { %8254 = vmatprep.mubr.msk.f32.mxu1 %vm9175_vm5, %v9174_v31 }
0x138b   :  { %v3701_v59 = vpop.f32.mrb[48].mxu0 }
0x138c   :  { %v3624_v0 = vpop.f32.mrb[56].mxu1  ;;  %v8251_v41 = vpop.f32.mrb[49].mxu0  ;;  %v3708_v36 = vsel %vm259_vm6, %v3701_v59, -inf }
0x138d   :  { %3709 = vmax.xlane.f32.xlu0 %v3708_v36  ;;  %v8246_v2 = vpop.f32.mrb[57].mxu1  ;;  %v3705_v57 = vsel %vm259_vm6, %v3624_v0, -inf }
0x138e   :  { %3706 = vmax.xlane.f32.xlu1 %v3705_v57 }
0x139f   :  { %3727 = vrot.lane.b32.xlu1 %v10764_v15, %s9177_s22 }
0x13a3   :  { %3803 = vrot.lane.b32.xlu0 %v10762_v56, %s9177_s22  ;;  %3881 = vrot.lane.b32.xlu1 %v10764_v15, %s9178_s23  ;;  %s12184_s22 = smov 112  }
0x13a7   :  { %3959 = vrot.lane.b32.xlu1 %v10762_v56, %s9178_s23  ;;  %s12185_s23 = smov 48  }
0x141a   :  { %v3710_v22 = vpop.xlane.xlu0 %3709 }
0x141b   :  { %v3712_v23 = vsub.f32 %v3701_v59, %v3710_v22  ;;  %v3707_v37 = vpop.xlane.xlu1 %3706 }
0x141c   :  { %v3711_v38 = vsub.f32 %v3624_v0, %v3707_v37 }
0x141d   :  { %v3715_v3 = vmul.f32 1.442695, %v3712_v23 }
0x141e   :  { %v3713_v4 = vmul.f32 1.442695, %v3711_v38  ;;  %v3804_v5 = vpop.permute.xlu0 %3803 }
0x141f   :  { %9109 = vpow2.f32 %v3715_v3  ;;  %8258 = vmatpush3.msra.mxu0 %v3804_v5  ;;  %v3728_v30 = vpop.permute.xlu1 %3727 }
0x1420   :  { %9111 = vpow2.f32 %v3713_v4  ;;  %8253 = vmatpush3.msra.mxu1 %v3728_v30  ;;  %8267 = vmatprep.subr.mxu0 %v9174_v31 }
0x1421   :  { %8262 = vmatprep.subr.mxu1 %v9174_v31 }
0x1423   :  { %v3882_v25 = vpop.permute.xlu1 %3881 }
0x1427   :  { %v3960_v26 = vpop.permute.xlu1 %3959 }
0x1429   :  { %v9110_v12 = vpop.eup %9109 }
0x142a   :  { %v9112_v18 = vpop.eup %9111  ;;  %v3720_v19 = vsel %vm259_vm6, %v9110_v12, 0.0 }
0x142b   :  { %3721 = vadd.xlane.f32.xlu0 %v3720_v19  ;;  %v3717_v24 = vsel %vm259_vm6, %v9112_v18, 0.0 }
0x142c   :  { %3718 = vadd.xlane.f32.xlu1 %v3717_v24 }
0x143d   :  { %3957 = vrot.lane.b32.xlu1 %v10762_v56, %s9179_s25 }
0x1441   :  { %3879 = vrot.lane.b32.xlu0 %v10764_v15, %s9179_s25  ;;  %s12186_s25 = smov 72  }
0x14b8   :  { %v3722_v28 = vpop.xlane.xlu0 %3721 }
0x14b9   :  { %9113 = vrcp.f32 %v3722_v28  ;;  %v3719_v49 = vpop.xlane.xlu1 %3718 }
0x14ba   :  { %9115 = vrcp.f32 %v3719_v49 }
0x14bc   :  { %v3880_v45 = vpop.permute.xlu0 %3879 }
0x14bd   :  { %v3958_v21 = vpop.permute.xlu1 %3957 }
0x14c3   :  { %v9114_v32 = vpop.eup %9113 }
0x14c4   :  { %v9116_v33 = vpop.eup %9115  ;;  %v3726_v7 = vmul.f32 %v9114_v32, %v9110_v12 }
0x14c5   :  { %v3725_v34 = vmul.f32 %v9116_v33, %v9112_v18 }
0x14c6   :  { %8260 = vmatmul.mubr.msk.f32.vlgmr.msra.gmra.mrb[50].mxu0 %vm259_vm6, %v3726_v7 }
0x14c7   :  { %8268 = vmatpush3.xpose.msk.msra.mxu0 %vm259_vm6, %v3960_v26  ;;  %8255 = vmatmul.mubr.msk.f32.vlgmr.msra.gmra.mrb[58].mxu1 %vm259_vm6, %v3725_v34 }
0x14c8   :  { %8263 = vmatpush3.xpose.msk.msra.mxu1 %vm259_vm6, %v3882_v25  ;;  %8269 = vmatprep.mubr.msk.f32.mxu0 %vm9175_vm5, %v9174_v31 }
0x14c9   :  { %8264 = vmatprep.mubr.msk.f32.mxu1 %vm9175_vm5, %v9174_v31  ;;  %8272 = vmatprep.subr.mxu1 %v9174_v31 }
0x14ca   :  { %8270 = vmatmul.mubr.msk.f32.vlgmr.msra.gmra.mrb[52].mxu0 %vm259_vm6, %v3958_v21  ;;  %8277 = vmatprep.subr.mxu0 %v9174_v31 }
0x14cb   :  { %8265 = vmatmul.mubr.msk.f32.vlgmr.msra.gmra.mrb[60].mxu1 %vm259_vm6, %v3880_v45  ;;  %8279 = vmatprep.mubr.msk.f32.mxu0 %vm9175_vm5, %v9174_v31 }
0x14cc   :  { %8274 = vmatprep.mubr.msk.f32.mxu1 %vm9175_vm5, %v9174_v31 }
0x1599   :  { %v10816_v46 = vpop.f32.mrb[50].mxu0 }
0x159a   :  { %v10818_v44 = vpop.f32.mrb[58].mxu1  ;;  %v8261_v47 = vpop.f32.mrb[51].mxu0 }
0x159b   :  { %v8256_v48 = vpop.f32.mrb[59].mxu1 }
0x159d   :  { %v4031_v60 = vpop.f32.mrb[52].mxu0 }
0x159e   :  { %v3953_v35 = vpop.f32.mrb[60].mxu1  ;;  %v8271_v27 = vpop.f32.mrb[53].mxu0  ;;  %v4038_v29 = vsel %vm259_vm6, %v4031_v60, -inf }
0x159f   :  { %4039 = vmax.xlane.f32.xlu1 %v4038_v29  ;;  %v8266_v39 = vpop.f32.mrb[61].mxu1  ;;  %v4035_v16 = vsel %vm259_vm6, %v3953_v35, -inf }
0x15a0   :  { %4036 = vmax.xlane.f32.xlu0 %v4035_v16 }
0x15b0   :  { %4057 = vrot.lane.b32.xlu1 %v10764_v15, %s12182_s4 }
0x15b4   :  { %4211 = vrot.lane.b32.xlu1 %v10764_v15, %s12183_s21 }
0x15b6   :  { %4133 = vrot.lane.b32.xlu0 %v10762_v56, %s12182_s4 }
0x15b8   :  { %4289 = vrot.lane.b32.xlu1 %v10762_v56, %s12183_s21 }
0x15bc   :  { %4287 = vrot.lane.b32.xlu1 %v10762_v56, %s12184_s22 }
0x162c   :  { %v4040_v17 = vpop.xlane.xlu1 %4039 }
0x162d   :  { %v4042_v1 = vsub.f32 %v4031_v60, %v4040_v17  ;;  %v4037_v52 = vpop.xlane.xlu0 %4036 }
0x162e   :  { %v4041_v62 = vsub.f32 %v3953_v35, %v4037_v52 }
0x162f   :  { %v4045_v8 = vmul.f32 1.442695, %v4042_v1 }
0x1630   :  { %v4043_v6 = vmul.f32 1.442695, %v4041_v62  ;;  %v4058_v42 = vpop.permute.xlu1 %4057 }
0x1631   :  { %9117 = vpow2.f32 %v4045_v8  ;;  %8273 = vmatpush3.msra.mxu1 %v4058_v42  ;;  %v4134_v10 = vpop.permute.xlu0 %4133 }
0x1632   :  { %8278 = vmatpush3.msra.mxu0 %v4134_v10  ;;  %8282 = vmatprep.subr.mxu1 %v9174_v31  ;;  %9119 = vpow2.f32 %v4043_v6 }
0x1633   :  { %8287 = vmatprep.subr.mxu0 %v9174_v31 }
0x1634   :  { %v4212_v0 = vpop.permute.xlu1 %4211 }
0x1638   :  { %v4290_v36 = vpop.permute.xlu1 %4289 }
0x163b   :  { %v9118_v40 = vpop.eup %9117 }
0x163c   :  { %v4050_v55 = vsel %vm259_vm6, %v9118_v40, 0.0  ;;  %v9120_v13 = vpop.eup %9119  ;;  %v4288_v23 = vpop.permute.xlu1 %4287 }
0x163d   :  { %4051 = vadd.xlane.f32.xlu0 %v4050_v55  ;;  %v4047_v58 = vsel %vm259_vm6, %v9120_v13, 0.0 }
0x1641   :  { %4048 = vadd.xlane.f32.xlu0 %v4047_v58 }
0x1657   :  { %4209 = vrot.lane.b32.xlu0 %v10764_v15, %s12184_s22 }
0x16ca   :  { %v4052_v63 = vpop.xlane.xlu0 %4051 }
0x16cb   :  { %9121 = vrcp.f32 %v4052_v63 }
0x16ce   :  { %v4049_v59 = vpop.xlane.xlu0 %4048 }
0x16cf   :  { %9123 = vrcp.f32 %v4049_v59 }
0x16d2   :  { %v4210_v37 = vpop.permute.xlu0 %4209 }
0x16d5   :  { %v9122_v41 = vpop.eup %9121 }
0x16d6   :  { %v4056_v2 = vmul.f32 %v9122_v41, %v9118_v40 }
0x16d8   :  { %8280 = vmatmul.mubr.msk.f32.vlgmr.msra.gmra.mrb[54].mxu0 %vm259_vm6, %v4056_v2 }
0x16d9   :  { %v9124_v57 = vpop.eup %9123  ;;  %8288 = vmatpush3.xpose.msk.msra.mxu0 %vm259_vm6, %v4290_v36  ;;  %8289 = vmatprep.mubr.msk.f32.mxu0 %vm9175_vm5, %v9174_v31 }
0x16da   :  { %v4055_v22 = vmul.f32 %v9124_v57, %v9120_v13  ;;  %8297 = vmatprep.subr.mxu0 %v9174_v31 }
0x16dc   :  { %8275 = vmatmul.mubr.msk.f32.vlgmr.msra.gmra.mrb[62].mxu1 %vm259_vm6, %v4055_v22  ;;  %8290 = vmatmul.mubr.msk.f32.vlgmr.msra.gmra.mrb[56].mxu0 %vm259_vm6, %v4288_v23 }
0x16dd   :  { %8283 = vmatpush3.xpose.msk.msra.mxu1 %vm259_vm6, %v4212_v0  ;;  %8284 = vmatprep.mubr.msk.f32.mxu1 %vm9175_vm5, %v9174_v31 }
0x16de   :  { %8292 = vmatprep.subr.mxu1 %v9174_v31  ;;  %8299 = vmatprep.mubr.msk.f32.mxu0 %vm9175_vm5, %v9174_v31 }
0x16e0   :  { %8285 = vmatmul.mubr.msk.f32.vlgmr.msra.gmra.mrb[64].mxu1 %vm259_vm6, %v4210_v37 }
0x16e1   :  { %8294 = vmatprep.mubr.msk.f32.mxu1 %vm9175_vm5, %v9174_v31 }
0x17ab   :  { %v10854_v38 = vpop.f32.mrb[54].mxu0 }
0x17ac   :  { %v8281_v3 = vpop.f32.mrb[55].mxu0 }
0x17af   :  { %v10856_v4 = vpop.f32.mrb[62].mxu1  ;;  %v4361_v5 = vpop.f32.mrb[56].mxu0 }
0x17b0   :  { %v8276_v30 = vpop.f32.mrb[63].mxu1  ;;  %v8291_v12 = vpop.f32.mrb[57].mxu0  ;;  %v4368_v18 = vsel %vm259_vm6, %v4361_v5, -inf }
0x17b1   :  { %4369 = vmax.xlane.f32.xlu1 %v4368_v18 }
0x17b3   :  { %v4283_v19 = vpop.f32.mrb[64].mxu1 }
0x17b4   :  { %v8286_v24 = vpop.f32.mrb[65].mxu1  ;;  %v4365_v25 = vsel %vm259_vm6, %v4283_v19, -inf }
0x17b5   :  { %4366 = vmax.xlane.f32.xlu0 %v4365_v25 }
0x17c2   :  { %4387 = vrot.lane.b32.xlu1 %v10764_v15, %s12185_s23 }
0x17c6   :  { %4541 = vrot.lane.b32.xlu1 %v10764_v15, %s12186_s25 }
0x17ca   :  { %4619 = vrot.lane.b32.xlu1 %v10762_v56, %s12186_s25 }
0x17cb   :  { %4463 = vrot.lane.b32.xlu0 %v10762_v56, %s12185_s23 }
0x17ce   :  { %4617 = vrot.lane.b32.xlu1 %v10762_v56, %s12187_s20 }
0x183e   :  { %v4370_v26 = vpop.xlane.xlu1 %4369 }
0x183f   :  { %v4372_v28 = vsub.f32 %v4361_v5, %v4370_v26  ;;  %v7026_v26 = vld [vmem:[%s12143_s5 + $0x28] sm:$0xff] }
0x1841   :  { %v4375_v49 = vmul.f32 1.442695, %v4372_v28 }
0x1842   :  { %v4388_v32 = vpop.permute.xlu1 %4387  ;;  %v4367_v33 = vpop.xlane.xlu0 %4366 }
0x1843   :  { %9125 = vpow2.f32 %v4375_v49  ;;  %v4371_v7 = vsub.f32 %v4283_v19, %v4367_v33  ;;  %8293 = vmatpush3.msra.mxu1 %v4388_v32  ;;  %v7027_v49 = vld [vmem:[%s12143_s5 + $0x30] sm:$0xff]  ;;  %v7028_v32 = vld [vmem:[%s12143_s5 + $0x38] sm:$0xff] }
0x1844   :  { %8302 = vmatprep.subr.mxu1 %v9174_v31  ;;  %v8718_v33 = vpack.c.bf16 %v7028_v32, %v7027_v49  ;;  %v7069_v49 = vld [vmem:[%s12145_s9 + $0x300] sm:$0xff] }
0x1845   :  { %v4373_v34 = vmul.f32 1.442695, %v4371_v7  ;;  %v7085_v32 = vld [vmem:[%s12145_s9 + $0x380] sm:$0xff] }
0x1846   :  { %v4464_v21 = vpop.permute.xlu0 %4463  ;;  %v4542_v29 = vpop.permute.xlu1 %4541 }
0x1847   :  { %9127 = vpow2.f32 %v4373_v34  ;;  %8298 = vmatpush3.msra.mxu0 %v4464_v21 }
0x1848   :  { %8307 = vmatprep.subr.mxu0 %v9174_v31 }
0x184a   :  { %v4620_v16 = vpop.permute.xlu1 %4619 }
0x184d   :  { %v9126_v45 = vpop.eup %9125 }
0x184e   :  { %v4380_v47 = vsel %vm259_vm6, %v9126_v45, 0.0  ;;  %v4618_v62 = vpop.permute.xlu1 %4617 }
0x184f   :  { %4381 = vadd.xlane.f32.xlu0 %v4380_v47 }
0x1851   :  { %v9128_v48 = vpop.eup %9127 }
0x1852   :  { %v4377_v60 = vsel %vm259_vm6, %v9128_v48, 0.0 }
0x1853   :  { %4378 = vadd.xlane.f32.xlu0 %v4377_v60 }
0x1869   :  { %4539 = vrot.lane.b32.xlu0 %v10764_v15, %s12187_s20 }
0x18dc   :  { %v4382_v35 = vpop.xlane.xlu0 %4381 }
0x18dd   :  { %9129 = vrcp.f32 %v4382_v35 }
0x18e0   :  { %v4379_v27 = vpop.xlane.xlu0 %4378 }
0x18e1   :  { %9131 = vrcp.f32 %v4379_v27 }
0x18e4   :  { %v4540_v8 = vpop.permute.xlu0 %4539 }
0x18e7   :  { %v9130_v39 = vpop.eup %9129 }
0x18e8   :  { %v4386_v17 = vmul.f32 %v9130_v39, %v9126_v45 }
0x18ea   :  { %8300 = vmatmul.mubr.msk.f32.vlgmr.msra.gmra.mrb[58].mxu0 %vm259_vm6, %v4386_v17 }
0x18eb   :  { %v9132_v1 = vpop.eup %9131  ;;  %8308 = vmatpush3.xpose.msk.msra.mxu0 %vm259_vm6, %v4620_v16  ;;  %8309 = vmatprep.mubr.msk.f32.mxu0 %vm9175_vm5, %v9174_v31 }
0x18ec   :  { %v4385_v52 = vmul.f32 %v9132_v1, %v9128_v48  ;;  %8317 = vmatprep.subr.mxu0 %v9174_v31 }
0x18ee   :  { %8295 = vmatmul.mubr.msk.f32.vlgmr.msra.gmra.mrb[66].mxu1 %vm259_vm6, %v4385_v52  ;;  %8310 = vmatmul.mubr.msk.f32.vlgmr.msra.gmra.mrb[60].mxu0 %vm259_vm6, %v4618_v62 }
0x18ef   :  { %8303 = vmatpush3.xpose.msk.msra.mxu1 %vm259_vm6, %v4542_v29  ;;  %8304 = vmatprep.mubr.msk.f32.mxu1 %vm9175_vm5, %v9174_v31 }
0x18f0   :  { %8312 = vmatprep.subr.mxu1 %v9174_v31  ;;  %8319 = vmatprep.mubr.msk.f32.mxu0 %vm9175_vm5, %v9174_v31 }
0x18f2   :  { %8305 = vmatmul.mubr.msk.f32.vlgmr.msra.gmra.mrb[68].mxu1 %vm259_vm6, %v4540_v8 }
0x18f3   :  { %8314 = vmatprep.mubr.msk.f32.mxu1 %vm9175_vm5, %v9174_v31 }
0x19bd   :  { %v4535_v6 = vpop.f32.mrb[58].mxu0 }
0x19be   :  { %v8301_v42 = vpop.f32.mrb[59].mxu0 }
0x19c1   :  { %v4459_v10 = vpop.f32.mrb[66].mxu1  ;;  %v4691_v40 = vpop.f32.mrb[60].mxu0 }
0x19c2   :  { %v8296_v55 = vpop.f32.mrb[67].mxu1  ;;  %v8311_v13 = vpop.f32.mrb[61].mxu0  ;;  %v4698_v58 = vsel %vm259_vm6, %v4691_v40, -inf }
0x19c3   :  { %4699 = vmax.xlane.f32.xlu1 %v4698_v58 }
0x19c5   :  { %v4613_v63 = vpop.f32.mrb[68].mxu1 }
0x19c6   :  { %v8306_v59 = vpop.f32.mrb[69].mxu1  ;;  %v4695_v0 = vsel %vm259_vm6, %v4613_v63, -inf }
0x19c7   :  { %4696 = vmax.xlane.f32.xlu0 %v4695_v0 }
0x19d4   :  { %4717 = vrot.lane.b32.xlu1 %v10764_v15, %s12188_s30 }
0x19d8   :  { %4871 = vrot.lane.b32.xlu1 %v10856_v4, %s12189_s18 }
0x19dc   :  { %4873 = vrot.lane.b32.xlu1 %v10854_v38, %s12189_s18 }
0x19e0   :  { %4881 = vrot.lane.b32.xlu1 %v4535_v6, %s12190_s27 }
0x1a50   :  { %v4700_v41 = vpop.xlane.xlu1 %4699 }
0x1a51   :  { %v4702_v36 = vsub.f32 %v4691_v40, %v4700_v41 }
0x1a53   :  { %v4705_v2 = vmul.f32 1.442695, %v4702_v36 }
0x1a54   :  { %v4718_v57 = vpop.permute.xlu1 %4717  ;;  %v4697_v22 = vpop.xlane.xlu0 %4696 }
0x1a55   :  { %9133 = vpow2.f32 %v4705_v2  ;;  %v4701_v23 = vsub.f32 %v4613_v63, %v4697_v22  ;;  %8313 = vmatpush3.msra.mxu1 %v4718_v57  ;;  %v7038_v22 = vld [vmem:[%s12145_s9 + $0x208] sm:$0xff] }
0x1a57   :  { %v4703_v37 = vmul.f32 1.442695, %v4701_v23  ;;  %v7054_v23 = vld [vmem:[%s12145_s9 + $0x288] sm:$0xff] }
0x1a58   :  { %v4872_v47 = vpop.permute.xlu1 %4871 }
0x1a59   :  { %9135 = vpow2.f32 %v4703_v37  ;;  %v4893_v27 = vsel %vm259_vm6, %v10818_v44, %v4872_v47  ;;  %v7030_v44 = vld [vmem:[%s12144_s6 + $0x1] ss:$0 sm:$0xff]  ;;  %v7040_v37 = vld [vmem:[%s12145_s9 + $0x218] sm:$0xff]  ;;  %v7042_v47 = vld [vmem:[%s12145_s9 + $0x228] sm:$0xff] }
0x1a5c   :  { %v4874_v48 = vpop.permute.xlu1 %4873 }
0x1a5d   :  { %v4894_v39 = vsel %vm259_vm6, %v10816_v46, %v4874_v48  ;;  %v7058_v48 = vld [vmem:[%s12145_s9 + $0x2a8] sm:$0xff] }
0x1a5f   :  { %v9134_v3 = vpop.eup %9133 }
0x1a60   :  { %v4710_v15 = vsel %vm259_vm6, %v9134_v3, 0.0  ;;  %v4882_v60 = vpop.permute.xlu1 %4881 }
0x1a61   :  { %4711 = vadd.xlane.f32.xlu0 %v4710_v15  ;;  %v4896_v1 = vsel %vm1601_vm8, %v4894_v39, %v4882_v60  ;;  %v7056_v15 = vld [vmem:[%s12145_s9 + $0x298] sm:$0xff] }
0x1a62   :  { %v7044_v60 = vld [vmem:[%s12145_s9 + $0x238] sm:$0xff] }
0x1a63   :  { %v9136_v4 = vpop.eup %9135 }
0x1a64   :  { %v4707_v5 = vsel %vm259_vm6, %v9136_v4, 0.0 }
0x1a65   :  { %4708 = vadd.xlane.f32.xlu0 %v4707_v5  ;;  %v7053_v5 = vld [vmem:[%s12145_s9 + $0x280] sm:$0xff] }
0x1a7b   :  { %4793 = vrot.lane.b32.xlu0 %v10762_v56, %s12188_s30  ;;  %v7025_v56 = vld [vmem:[%s12143_s5 + $0x20] sm:$0xff] }
0x1a7c   :  { %v8714_v28 = vpack.c.bf16 %v7026_v26, %v7025_v56  ;;  %v7072_v56 = vld [vmem:[%s12145_s9 + $0x318] sm:$0xff] }
0x1a7e   :  { %8715 = vmatprep.subr.bf16.mxu1 %v8714_v28 }
0x1a7f   :  { %4879 = vrot.lane.b32.xlu0 %v4459_v10, %s12190_s27 }
0x1aee   :  { %v4712_v38 = vpop.xlane.xlu0 %4711 }
0x1aef   :  { %9137 = vrcp.f32 %v4712_v38  ;;  %v8730_v38 = vpack.c.bf16 %v7056_v15, %v7040_v37  ;;  %v7075_v37 = vld [vmem:[%s12145_s9 + $0x330] sm:$0xff] }
0x1af2   :  { %v4709_v30 = vpop.xlane.xlu0 %4708 }
0x1af3   :  { %9139 = vrcp.f32 %v4709_v30 }
0x1af6   :  { %v4794_v12 = vpop.permute.xlu0 %4793 }
0x1af7   :  { %8318 = vmatpush3.msra.mxu0 %v4794_v12  ;;  %v7039_v12 = vld [vmem:[%s12145_s9 + $0x210] sm:$0xff] }
0x1af9   :  { %v9138_v18 = vpop.eup %9137 }
0x1afa   :  { %v4716_v19 = vmul.f32 %v9138_v18, %v9134_v3  ;;  %v4880_v35 = vpop.permute.xlu0 %4879  ;;  %v8722_v3 = vpack.c.bf16 %v7054_v23, %v7038_v22  ;;  %v7055_v18 = vld [vmem:[%s12145_s9 + $0x290] sm:$0xff]  ;;  %v7089_v23 = vld [vmem:[%s12145_s9 + $0x3a0] sm:$0xff] }
0x1afb   :  { %v4895_v16 = vsel %vm1601_vm8, %v4893_v27, %v4880_v35  ;;  %v8738_v35 = vpack.c.bf16 %v7058_v48, %v7042_v47  ;;  %v7060_v27 = vld [vmem:[%s12145_s9 + $0x2b8] sm:$0xff]  ;;  %v7077_v48 = vld [vmem:[%s12145_s9 + $0x340] sm:$0xff] }
0x1afc   :  { %8320 = vmatmul.mubr.msk.f32.vlgmr.msra.gmra.mrb[62].mxu0 %vm259_vm6, %v4716_v19  ;;  %8723 = vmatprep.subr.bf16.mxu0 %v8722_v3  ;;  %v8732_v19 = vpack.c.bf16 %v7055_v18, %v7039_v12  ;;  %v7091_v3 = vld [vmem:[%s12145_s9 + $0x3b0] sm:$0xff]  ;;  %v7064_v12 = vld [vmem:[%s12145_s9 + $0x2d8] sm:$0xff] }
0x1afd   :  { %v9140_v24 = vpop.eup %9139  ;;  %5261 = vmatprep.mubr.f32.mxu0 %v9174_v31 }
0x1afe   :  { %v4715_v25 = vmul.f32 %v9140_v24, %v9136_v4  ;;  %v7037_v4 = vld [vmem:[%s12145_s9 + $0x200] sm:$0xff]  ;;  %v7070_v24 = vld [vmem:[%s12145_s9 + $0x308] sm:$0xff] }
0x1aff   :  { %v8724_v30 = vpack.c.bf16 %v7053_v5, %v7037_v4  ;;  %v7046_v5 = vld [vmem:[%s12145_s9 + $0x248] sm:$0xff] }
0x1b00   :  { %8315 = vmatmul.mubr.msk.f32.vlgmr.msra.gmra.mrb[70].mxu1 %vm259_vm6, %v4715_v25  ;;  %v7086_v25 = vld [vmem:[%s12145_s9 + $0x388] sm:$0xff] }
0x1b01   :  { %8717 = vmatpush3.bf16.msra.mxu1 %v8714_v28  ;;  %8725 = vmatpush1.bf16.msra.mxu0 %v8724_v30  ;;  %v8726_v26 = vpack.c.bf16 %v7086_v25, %v7070_v24  ;;  %v7088_v28 = vld [vmem:[%s12145_s9 + $0x398] sm:$0xff]  ;;  %v7045_v24 = vld [vmem:[%s12145_s9 + $0x240] sm:$0xff] }
0x1b02   :  { %8719 = vmatprep.subr.bf16.mxu1 %v8718_v33  ;;  %v7048_v30 = vld [vmem:[%s12145_s9 + $0x258] sm:$0xff] }
0x1b03   :  { %8727 = vmatprep.subr.bf16.mxu0 %v8726_v26  ;;  %v7047_v26 = vld [vmem:[%s12145_s9 + $0x250] sm:$0xff] }
0x1b05   :  { %8721 = vmatpush3.bf16.msra.mxu1 %v8718_v33  ;;  %v8734_v33 = vpack.c.bf16 %v7088_v28, %v7072_v56  ;;  %v7061_v56 = vld [vmem:[%s12145_s9 + $0x2c0] sm:$0xff]  ;;  %v7063_v28 = vld [vmem:[%s12145_s9 + $0x2d0] sm:$0xff] }
0x1b06   :  { %8731 = vmatprep.subr.bf16.mxu1 %v8730_v38  ;;  %v8764_v47 = vpack.c.bf16 %v7063_v28, %v7047_v26  ;;  %v7138_v26 = vld [vmem:[%s12148_s11 + $0x898] sm:$0xff]  ;;  %v7169_v28 = vld [vmem:[%s12148_s11 + $0x990] sm:$0xff] }
0x1bcf   :  { %v4865_v7 = vpop.f32.mrb[62].mxu0 }
0x1bd0   :  { %4889 = vrot.lane.b32.xlu1 %v4865_v7, %s12191_s29  ;;  %v8321_v34 = vpop.f32.mrb[63].mxu0  ;;  %v8728_v7 = vpack.c.bf16 %v7085_v32, %v7069_v49  ;;  %v8762_v32 = vpack.c.bf16 %v7064_v12, %v7048_v30  ;;  %v7120_v30 = vld [vmem:[%s12148_s11 + $0x808] sm:$0xff] }
0x1bd1   :  { %v7071_v34 = vld [vmem:[%s12145_s9 + $0x310] sm:$0xff] }
0x1bd2   :  { %8729 = vmatpush1.bf16.msra.mxu0 %v8728_v7  ;;  %v7094_v7 = vld [vmem:[%s12145_s9 + $0x3c8] sm:$0xff] }
0x1bd3   :  { %v4789_v21 = vpop.f32.mrb[70].mxu1  ;;  %8739 = vmatprep.subr.bf16.mxu0 %v8738_v35  ;;  %v7079_v35 = vld [vmem:[%s12145_s9 + $0x350] sm:$0xff] }
0x1bd4   :  { %4887 = vrot.lane.b32.xlu0 %v4789_v21, %s12191_s29  ;;  %v8316_v45 = vpop.f32.mrb[71].mxu1  ;;  %v7087_v21 = vld [vmem:[%s12145_s9 + $0x390] sm:$0xff] }
0x1bd5   :  { %v8736_v45 = vpack.c.bf16 %v7087_v21, %v7071_v34  ;;  %v7080_v34 = vld [vmem:[%s12145_s9 + $0x358] sm:$0xff] }
0x1bd6   :  { %v7096_v21 = vld [vmem:[%s12145_s9 + $0x3d8] sm:$0xff] }
0x1c42   :  { %v4890_v29 = vpop.permute.xlu1 %4889 }
0x1c43   :  { %v4898_v62 = vsel %vm1604_vm7, %v4896_v1, %v4890_v29  ;;  %v8746_v29 = vpack.c.bf16 %v7060_v27, %v7044_v60  ;;  %v7093_v60 = vld [vmem:[%s12145_s9 + $0x3c0] sm:$0xff]  ;;  %v7095_v27 = vld [vmem:[%s12145_s9 + $0x3d0] sm:$0xff] }
0x1c46   :  { %v4888_v17 = vpop.permute.xlu0 %4887 }
0x1c47   :  { %v4897_v52 = vsel %vm1604_vm7, %v4895_v16, %v4888_v17 }
0x1c48   :  { %8330 = vmatprep.mubr.msk.f32.mxu1 %vm174_vm4, %v4897_v52 }
0x1c49   :  { %8331 = vmatmul.mubr.msk.f32.vlgmr.msra.gmra.mrb[72].mxu1 %vm174_vm4, %v4898_v62 }
0x1c4a   :  { %5338 = vmatprep.mubr.f32.mxu1 %v9174_v31  ;;  %8733 = vmatpush1.bf16.msra.mxu1 %v8732_v19  ;;  %v8752_v19 = vpack.c.bf16 %v7091_v3, %v7075_v37  ;;  %v7135_v37 = vld [vmem:[%s12148_s11 + $0x880] sm:$0xff]  ;;  %v7136_v3 = vld [vmem:[%s12148_s11 + $0x888] sm:$0xff] }
0x1c4b   :  { %8735 = vmatprep.subr.bf16.mxu1 %v8734_v33  ;;  %v7078_v33 = vld [vmem:[%s12145_s9 + $0x348] sm:$0xff]  ;;  %v8786_v12 = vpack.c.bf16 %v7136_v3, %v7135_v37  ;;  %v7127_v37 = vld [vmem:[%s12148_s11 + $0x840] sm:$0xff] }
0x1c4c   :  { %v7128_v3 = vld [vmem:[%s12148_s11 + $0x848] sm:$0xff] }
0x1c4e   :  { %8737 = vmatpush1.bf16.msra.mxu1 %v8736_v45  ;;  %v8756_v45 = vpack.c.bf16 %v7061_v56, %v7045_v24  ;;  %v7152_v24 = vld [vmem:[%s12148_s11 + $0x908] sm:$0xff]  ;;  %v7137_v56 = vld [vmem:[%s12148_s11 + $0x890] sm:$0xff] }
0x1c4f   :  { %8747 = vmatprep.subr.bf16.mxu1 %v8746_v29  ;;  %v8758_v29 = vpack.c.bf16 %v7094_v7, %v7078_v33  ;;  %v7121_v7 = vld [vmem:[%s12148_s11 + $0x810] sm:$0xff] }
0x1d1c   :  { %v8332_v46 = vpop.f32.mrb[72].mxu1 }
0x1d1d   :  { %v4990_v8 = vadd.f32 %v8332_v46, %v7030_v44  ;;  %v4984_v6 = vpop.f32.mrb[73].mxu1  ;;  %v7035_v46 = vld [vmem:[%s12146_s7 + $0x1] ss:$0 sm:$0xff] }
0x1d1e   :  { %v4985_v42 = vadd.f32 %v7030_v44, %v4984_v6 }
0x1d1f   :  { %v4994_v10 = vadd.f32 %v4990_v8, %v10753_v11  ;;  %v7041_v8 = vld [vmem:[%s12145_s9 + $0x220] sm:$0xff] }
0x1d20   :  { %v4993_v40 = vadd.f32 %v4985_v42, %v10749_v43  ;;  %v7057_v42 = vld [vmem:[%s12145_s9 + $0x2a0] sm:$0xff] }
0x1d21   :  { %v5002_v55 = vsel %vm174_vm4, %v4994_v10, 0.0 }
0x1d22   :  { %5003 = vadd.xlane.f32.xlu1 %v5002_v55  ;;  %v4999_v13 = vsel %vm174_vm4, %v4993_v40, 0.0  ;;  %v7036_v55 = vld [vmem:[%s12147_s8 + $0x1] ss:$0 sm:$0xff] }
0x1d23   :  { %5000 = vadd.xlane.f32.xlu0 %v4999_v13  ;;  %v7074_v13 = vld [vmem:[%s12145_s9 + $0x328] sm:$0xff] }
0x1daf   :  { %v5004_v58 = vpop.xlane.xlu1 %5003 }
0x1db0   :  { %v5006_v63 = vmul.f32 0.03125, %v5004_v58  ;;  %v5001_v59 = vpop.xlane.xlu0 %5000 }
0x1db1   :  { %v5005_v0 = vmul.f32 0.03125, %v5001_v59  ;;  %v7076_v59 = vld [vmem:[%s12145_s9 + $0x338] sm:$0xff] }
0x1db2   :  { %v10941_v41 = vsub.f32 %v4994_v10, %v5006_v63  ;;  %v7043_v10 = vld [vmem:[%s12145_s9 + $0x230] sm:$0xff]  ;;  %v7090_v63 = vld [vmem:[%s12145_s9 + $0x3a8] sm:$0xff] }
0x1db3   :  { %v5007_v36 = vsub.f32 %v4993_v40, %v5005_v0  ;;  %v7059_v40 = vld [vmem:[%s12145_s9 + $0x2b0] sm:$0xff]  ;;  %v7092_v0 = vld [vmem:[%s12145_s9 + $0x3b8] sm:$0xff]  ;;  %v8742_v15 = vpack.c.bf16 %v7090_v63, %v7074_v13  ;;  %v7098_v13 = vld [vmem:[%s12145_s9 + $0x3e8] sm:$0xff] }
0x1db4   :  { %v5010_v11 = vmul.f32 %v10941_v41, %v10941_v41  ;;  %v8750_v4 = vpack.c.bf16 %v7092_v0, %v7076_v59  ;;  %v7100_v63 = vld [vmem:[%s12145_s9 + $0x3f8] sm:$0xff] }
0x1db5   :  { %v5009_v2 = vmul.f32 %v5007_v36, %v5007_v36 }
0x1db6   :  { %v5014_v43 = vsel %vm174_vm4, %v5010_v11, 0.0  ;;  %v7073_v11 = vld [vmem:[%s12145_s9 + $0x320] sm:$0xff] }
0x1db7   :  { %v5011_v57 = vsel %vm174_vm4, %v5009_v2, 0.0  ;;  %v8740_v2 = vpack.c.bf16 %v7057_v42, %v7041_v8  ;;  %v8744_v18 = vpack.c.bf16 %v7089_v23, %v7073_v11  ;;  %v7065_v8 = vld [vmem:[%s12145_s9 + $0x2e0] sm:$0xff]  ;;  %v7067_v42 = vld [vmem:[%s12145_s9 + $0x2f0] sm:$0xff] }
0x1db8   :  { %5012 = vadd.xlane.f32.xlu0 %v5011_v57  ;;  %v8748_v57 = vpack.c.bf16 %v7059_v40, %v7043_v10  ;;  %v7099_v11 = vld [vmem:[%s12145_s9 + $0x3f0] sm:$0xff] }
0x1dbc   :  { %5015 = vadd.xlane.f32.xlu0 %v5014_v43 }
0x1e45   :  { %v5013_v39 = vpop.xlane.xlu0 %5012 }
0x1e46   :  { %v5017_v16 = vmul.f32 0.03125, %v5013_v39  ;;  %v8766_v39 = vpack.c.bf16 %v7096_v21, %v7080_v34  ;;  %v7122_v34 = vld [vmem:[%s12148_s11 + $0x818] sm:$0xff]  ;;  %v8790_v21 = vpack.c.bf16 %v7138_v26, %v7137_v56  ;;  %v7129_v56 = vld [vmem:[%s12148_s11 + $0x850] sm:$0xff] }
0x1e47   :  { %v7130_v26 = vld [vmem:[%s12148_s11 + $0x858] sm:$0xff] }
0x1e48   :  { %v5019_v17 = vadd.f32 1e-05, %v5017_v16  ;;  %v7050_v16 = vld [vmem:[%s12145_s9 + $0x268] sm:$0xff] }
0x1e49   :  { %v5016_v1 = vpop.xlane.xlu0 %5015 }
0x1e4a   :  { %9141 = vrsqrt.f32 %v5019_v17  ;;  %v5018_v52 = vmul.f32 0.03125, %v5016_v1  ;;  %v7066_v17 = vld [vmem:[%s12145_s9 + $0x2e8] sm:$0xff]  ;;  %v7052_v1 = vld [vmem:[%s12145_s9 + $0x278] sm:$0xff] }
0x1e4b   :  { %v8770_v10 = vpack.c.bf16 %v7066_v17, %v7050_v16  ;;  %v7123_v17 = vld [vmem:[%s12148_s11 + $0x820] sm:$0xff] }
0x1e4c   :  { %v5020_v62 = vadd.f32 1e-05, %v5018_v52  ;;  %v7068_v52 = vld [vmem:[%s12145_s9 + $0x2f8] sm:$0xff] }
0x1e4d   :  { %v8778_v40 = vpack.c.bf16 %v7068_v52, %v7052_v1  ;;  %v7124_v1 = vld [vmem:[%s12148_s11 + $0x828] sm:$0xff] }
0x1e4e   :  { %9143 = vrsqrt.f32 %v5020_v62  ;;  %v8760_v62 = vpack.c.bf16 %v7093_v60, %v7077_v48  ;;  %v7154_v48 = vld [vmem:[%s12148_s11 + $0x918] sm:$0xff]  ;;  %v7139_v60 = vld [vmem:[%s12148_s11 + $0x8a0] sm:$0xff] }
0x1e54   :  { %v9142_v44 = vpop.eup %9141 }
0x1e55   :  { %v5023_v6 = vmul.f32 %v9142_v44, %v5007_v36  ;;  %v8768_v44 = vpack.c.bf16 %v7095_v27, %v7079_v35  ;;  %v7140_v35 = vld [vmem:[%s12148_s11 + $0x8a8] sm:$0xff]  ;;  %v7171_v27 = vld [vmem:[%s12148_s11 + $0x9a0] sm:$0xff] }
0x1e56   :  { %v8794_v52 = vpack.c.bf16 %v7140_v35, %v7139_v60  ;;  %v7131_v60 = vld [vmem:[%s12148_s11 + $0x860] sm:$0xff] }
0x1e57   :  { %v5031_v58 = vmul.f32 %v7035_v46, %v5023_v6  ;;  %v7051_v6 = vld [vmem:[%s12145_s9 + $0x270] sm:$0xff] }
0x1e58   :  { %v9144_v36 = vpop.eup %9143  ;;  %v8780_v0 = vpack.c.bf16 %v7067_v42, %v7051_v6  ;;  %v7173_v6 = vld [vmem:[%s12148_s11 + $0x9b0] sm:$0xff]  ;;  %v7174_v42 = vld [vmem:[%s12148_s11 + $0x9b8] sm:$0xff] }
0x1e59   :  { %v11040_v43 = vadd.f32 %v7036_v55, %v5031_v58  ;;  %v5024_v22 = vmul.f32 %v9144_v36, %v10941_v41  ;;  %v7062_v41 = vld [vmem:[%s12145_s9 + $0x2c8] sm:$0xff]  ;;  %v7084_v58 = vld [vmem:[%s12145_s9 + $0x378] sm:$0xff]  ;;  %v7081_v36 = vld [vmem:[%s12145_s9 + $0x360] sm:$0xff] }
0x1e5a   :  { %v8754_v49 = vpack.c.bf16 %v7062_v41, %v7046_v5  ;;  %v8782_v23 = vpack.c.bf16 %v7100_v63, %v7084_v58  ;;  %v7119_v41 = vld [vmem:[%s12148_s11 + $0x800] sm:$0xff]  ;;  %v8830_v63 = vpack.c.bf16 %v7174_v42, %v7173_v6  ;;  %v7134_v6 = vld [vmem:[%s12148_s11 + $0x878] sm:$0xff] }
0x1e5b   :  { %v5032_v38 = vmul.f32 %v7035_v46, %v5024_v22  ;;  %7103 = vmatmul.mubr.msk.f32.vlgmr.msra.gmra.mrb[64].mxu0 %vm174_vm4, %v11040_v43  ;;  %7105 = vmatmul.mubr.msk.f32.vlgmr.msra.gmra.mrb[74].mxu1 %vm174_vm4, %v11040_v43  ;;  %v7049_v46 = vld [vmem:[%s12145_s9 + $0x260] sm:$0xff] }
0x1e5c   :  { %8741 = vmatpush1.bf16.msra.mxu0 %v8740_v2  ;;  %8749 = vmatpush1.bf16.msra.mxu1 %v8748_v57  ;;  %v8772_v59 = vpack.c.bf16 %v7065_v8, %v7049_v46  ;;  %v7097_v2 = vld [vmem:[%s12145_s9 + $0x3e0] sm:$0xff]  ;;  %v7083_v57 = vld [vmem:[%s12145_s9 + $0x370] sm:$0xff]  ;;  %v7142_v8 = vld [vmem:[%s12148_s11 + $0x8b8] sm:$0xff] }
0x1e5d   :  { %v11071_v25 = vadd.f32 %v7036_v55, %v5032_v38  ;;  %5267 = vmatprep.mubr.f32.mxu0 %v9174_v31  ;;  %5344 = vmatprep.mubr.f32.mxu1 %v9174_v31  ;;  %v7082_v55 = vld [vmem:[%s12145_s9 + $0x368] sm:$0xff]  ;;  %v8776_v5 = vpack.c.bf16 %v7097_v2, %v7081_v36  ;;  %v8784_v38 = vpack.c.bf16 %v7099_v11, %v7083_v57  ;;  %v7141_v46 = vld [vmem:[%s12148_s11 + $0x8b0] sm:$0xff]  ;;  %v7143_v36 = vld [vmem:[%s12148_s11 + $0x8c0] sm:$0xff] }
0x1e5e   :  { %8743 = vmatprep.subr.bf16.mxu0 %v8742_v15  ;;  %8751 = vmatprep.subr.bf16.mxu1 %v8750_v4  ;;  %v8774_v22 = vpack.c.bf16 %v7098_v13, %v7082_v55  ;;  %v7167_v15 = vld [vmem:[%s12148_s11 + $0x980] sm:$0xff]  ;;  %v7168_v4 = vld [vmem:[%s12148_s11 + $0x988] sm:$0xff]  ;;  %v7125_v55 = vld [vmem:[%s12148_s11 + $0x830] sm:$0xff]  ;;  %v8798_v58 = vpack.c.bf16 %v7142_v8, %v7141_v46 }
0x1e5f   :  { %7104 = vmatmul.mubr.msk.f32.gmra.mrb[66].mxu0 %vm174_vm4, %v11071_v25  ;;  %7106 = vmatmul.mubr.msk.f32.gmra.mrb[76].mxu1 %vm174_vm4, %v11071_v25  ;;  %v7126_v13 = vld [vmem:[%s12148_s11 + $0x838] sm:$0xff]  ;;  %v7144_v2 = vld [vmem:[%s12148_s11 + $0x8c8] sm:$0xff]  ;;  %v7175_v57 = vld [vmem:[%s12148_s11 + $0x9c0] sm:$0xff] }
0x1e60   :  { %8745 = vmatpush1.bf16.msra.mxu0 %v8744_v18  ;;  %8753 = vmatpush1.bf16.msra.mxu1 %v8752_v19  ;;  %v8818_v18 = vpack.c.bf16 %v7168_v4, %v7167_v15  ;;  %v7151_v19 = vld [vmem:[%s12148_s11 + $0x900] sm:$0xff]  ;;  %v7176_v11 = vld [vmem:[%s12148_s11 + $0x9c8] sm:$0xff]  ;;  %v8802_v15 = vpack.c.bf16 %v7144_v2, %v7143_v36  ;;  %v7182_v46 = vld [vmem:[%s12148_s11 + $0x9f8] sm:$0xff] }
0x1e61   :  { %5415 = vmatprep.mubr.f32.mxu0 %v9174_v31  ;;  %5492 = vmatprep.mubr.f32.mxu1 %v9174_v31  ;;  %v8820_v33 = vpack.c.bf16 %v7152_v24, %v7151_v19  ;;  %v8834_v4 = vpack.c.bf16 %v7176_v11, %v7175_v57  ;;  %v8804_v19 = vpack.c.bf16 %v7128_v3, %v7127_v37  ;;  %v7133_v8 = vld [vmem:[%s12148_s11 + $0x870] sm:$0xff]  ;;  %v7232_v36 = vld [vmem:[%s12148_s11 + $0xb88] sm:$0xff]  ;;  %v7183_v3 = vld [vmem:[%s12148_s11 + $0xa00] sm:$0xff] }
0x1e62   :  { %8755 = vmatprep.subr.bf16.mxu0 %v8754_v49  ;;  %8763 = vmatprep.subr.bf16.mxu1 %v8762_v32  ;;  %v7170_v49 = vld [vmem:[%s12148_s11 + $0x998] sm:$0xff]  ;;  %v8788_v32 = vpack.c.bf16 %v7120_v30, %v7119_v41  ;;  %v7145_v41 = vld [vmem:[%s12148_s11 + $0x8d0] sm:$0xff] }
0x1e63   :  { %7107 = vmatmul.mubr.msk.f32.vlgmr.msra.gmra.mrb[68].mxu0 %vm174_vm4, %v11040_v43  ;;  %7109 = vmatmul.mubr.msk.f32.vlgmr.msra.gmra.mrb[78].mxu1 %vm174_vm4, %v11040_v43  ;;  %v7146_v30 = vld [vmem:[%s12148_s11 + $0x8d8] sm:$0xff]  ;;  %v11403_v57 = vld [vmem:[%s12149_s10 + $0x10] sm:$0xff] }
0x1e64   :  { %8757 = vmatpush1.bf16.msra.mxu0 %v8756_v45  ;;  %8765 = vmatpush1.bf16.msra.mxu1 %v8764_v47  ;;  %v8822_v45 = vpack.c.bf16 %v7170_v49, %v7169_v28  ;;  %v7153_v47 = vld [vmem:[%s12148_s11 + $0x910] sm:$0xff]  ;;  %v8806_v28 = vpack.c.bf16 %v7146_v30, %v7145_v41  ;;  %v5114_v11 = vrot.slane %v11403_v57, %v9999_v50  ;;  %v7216_v41 = vld [vmem:[%s12148_s11 + $0xb08] sm:$0xff] }
0x1e65   :  { %5421 = vmatprep.mubr.f32.mxu0 %v9174_v31  ;;  %5498 = vmatprep.mubr.f32.mxu1 %v9174_v31  ;;  %v8824_v16 = vpack.c.bf16 %v7154_v48, %v7153_v47  ;;  %v8808_v47 = vpack.c.bf16 %v7130_v26, %v7129_v56  ;;  %v5126_v37 = vrot.slane %v11403_v57, %v10013_v54  ;;  %v7201_v30 = vld [vmem:[%s12148_s11 + $0xa90] sm:$0xff]  ;;  %v7202_v56 = vld [vmem:[%s12148_s11 + $0xa98] sm:$0xff] }
0x1e66   :  { %8759 = vmatprep.subr.bf16.mxu0 %v8758_v29  ;;  %8767 = vmatprep.subr.bf16.mxu1 %v8766_v39  ;;  %v7172_v29 = vld [vmem:[%s12148_s11 + $0x9a8] sm:$0xff]  ;;  %v8792_v39 = vpack.c.bf16 %v7122_v34, %v7121_v7  ;;  %v7147_v7 = vld [vmem:[%s12148_s11 + $0x8e0] sm:$0xff]  ;;  %v7233_v26 = vld [vmem:[%s12148_s11 + $0xb90] sm:$0xff] }
0x1e67   :  { %7108 = vmatmul.mubr.msk.f32.gmra.mrb[70].mxu0 %vm174_vm4, %v11071_v25  ;;  %7110 = vmatmul.mubr.msk.f32.gmra.mrb[80].mxu1 %vm174_vm4, %v11071_v25  ;;  %v7148_v34 = vld [vmem:[%s12148_s11 + $0x8e8] sm:$0xff] }
0x1e68   :  { %8761 = vmatpush1.bf16.msra.mxu0 %v8760_v62  ;;  %8769 = vmatpush1.bf16.msra.mxu1 %v8768_v44  ;;  %v8826_v62 = vpack.c.bf16 %v7172_v29, %v7171_v27  ;;  %v7156_v44 = vld [vmem:[%s12148_s11 + $0x928] sm:$0xff]  ;;  %v8810_v35 = vpack.c.bf16 %v7148_v34, %v7147_v7  ;;  %v11439_v34 = vrot.slane %v11403_v57, %v10030_v61 }
0x1e69   :  { %5569 = vmatprep.mubr.f32.mxu0 %v9174_v31  ;;  %5646 = vmatprep.mubr.f32.mxu1 %v9174_v31  ;;  %v7132_v29 = vld [vmem:[%s12148_s11 + $0x868] sm:$0xff] }
0x1e6a   :  { %8771 = vmatprep.subr.bf16.mxu0 %v8770_v10  ;;  %8779 = vmatprep.subr.bf16.mxu1 %v8778_v40  ;;  %v8796_v10 = vpack.c.bf16 %v7124_v1, %v7123_v17  ;;  %v8812_v17 = vpack.c.bf16 %v7132_v29, %v7131_v60  ;;  %v7186_v29 = vld [vmem:[%s12148_s11 + $0xa18] sm:$0xff] }
0x1e6b   :  { %7111 = vmatmul.mubr.msk.f32.vlgmr.msra.gmra.mrb[72].mxu0 %vm174_vm4, %v11040_v43  ;;  %7113 = vmatmul.mubr.msk.f32.vlgmr.msra.gmra.mrb[82].mxu1 %vm174_vm4, %v11040_v43 }
0x1e6c   :  { %8773 = vmatpush1.bf16.msra.mxu0 %v8772_v59  ;;  %8781 = vmatpush1.bf16.msra.mxu1 %v8780_v0  ;;  %v7157_v59 = vld [vmem:[%s12148_s11 + $0x930] sm:$0xff]  ;;  %v7158_v0 = vld [vmem:[%s12148_s11 + $0x938] sm:$0xff] }
0x1e6d   :  { %5575 = vmatprep.mubr.f32.mxu0 %v9174_v31  ;;  %5652 = vmatprep.mubr.f32.mxu1 %v9174_v31 }
0x1e6e   :  { %8775 = vmatprep.subr.bf16.mxu0 %v8774_v22  ;;  %8783 = vmatprep.subr.bf16.mxu1 %v8782_v23  ;;  %v8800_v22 = vpack.c.bf16 %v7126_v13, %v7125_v55  ;;  %v8832_v23 = vpack.c.bf16 %v7158_v0, %v7157_v59  ;;  %v7166_v55 = vld [vmem:[%s12148_s11 + $0x978] sm:$0xff]  ;;  %v7231_v59 = vld [vmem:[%s12148_s11 + $0xb80] sm:$0xff] }
0x1e6f   :  { %7112 = vmatmul.mubr.msk.f32.gmra.mrb[74].mxu0 %vm174_vm4, %v11071_v25  ;;  %7114 = vmatmul.mubr.msk.f32.gmra.mrb[84].mxu1 %vm174_vm4, %v11071_v25  ;;  %v8882_v2 = vpack.c.bf16 %v7232_v36, %v7231_v59 }
0x1e70   :  { %8777 = vmatpush1.bf16.msra.mxu0 %v8776_v5  ;;  %8785 = vmatpush1.bf16.msra.mxu1 %v8784_v38  ;;  %v7159_v5 = vld [vmem:[%s12148_s11 + $0x940] sm:$0xff]  ;;  %v7160_v38 = vld [vmem:[%s12148_s11 + $0x948] sm:$0xff] }
0x1e71   :  { %5723 = vmatprep.mubr.f32.mxu0 %v9174_v31  ;;  %5800 = vmatprep.mubr.f32.mxu1 %v9174_v31  ;;  %v8836_v24 = vpack.c.bf16 %v7160_v38, %v7159_v5  ;;  %v7215_v38 = vld [vmem:[%s12148_s11 + $0xb00] sm:$0xff] }
0x1e72   :  { %8787 = vmatprep.subr.bf16.mxu0 %v8786_v12  ;;  %8819 = vmatprep.subr.bf16.mxu1 %v8818_v18  ;;  %v7177_v12 = vld [vmem:[%s12148_s11 + $0x9d0] sm:$0xff]  ;;  %v7178_v18 = vld [vmem:[%s12148_s11 + $0x9d8] sm:$0xff]  ;;  %v8884_v7 = vpack.c.bf16 %v7216_v41, %v7215_v38  ;;  %v7220_v38 = vld [vmem:[%s12148_s11 + $0xb28] sm:$0xff] }
0x1e73   :  { %7115 = vmatmul.mubr.msk.f32.vlgmr.msra.gmra.mrb[76].mxu0 %vm174_vm4, %v11040_v43  ;;  %7117 = vmatmul.mubr.msk.f32.vlgmr.msra.gmra.mrb[86].mxu1 %vm174_vm4, %v11040_v43  ;;  %v8838_v49 = vpack.c.bf16 %v7178_v18, %v7177_v12  ;;  %v7205_v41 = vld [vmem:[%s12148_s11 + $0xab0] sm:$0xff] }
0x1e74   :  { %5729 = vmatprep.mubr.f32.mxu0 %v9174_v31  ;;  %5806 = vmatprep.mubr.f32.mxu1 %v9174_v31  ;;  %v7155_v31 = vld [vmem:[%s12148_s11 + $0x920] sm:$0xff] }
0x1e75   :  { %8789 = vmatpush3.bf16.msra.mxu0 %v8788_v32  ;;  %8821 = vmatpush3.bf16.msra.mxu1 %v8820_v33  ;;  %v8828_v40 = vpack.c.bf16 %v7156_v44, %v7155_v31  ;;  %v7161_v32 = vld [vmem:[%s12148_s11 + $0x950] sm:$0xff]  ;;  %v7162_v33 = vld [vmem:[%s12148_s11 + $0x958] sm:$0xff] }
0x1e76   :  { %8791 = vmatprep.subr.bf16.mxu0 %v8790_v21  ;;  %8823 = vmatprep.subr.bf16.mxu1 %v8822_v45  ;;  %v7179_v21 = vld [vmem:[%s12148_s11 + $0x9e0] sm:$0xff]  ;;  %v7180_v45 = vld [vmem:[%s12148_s11 + $0x9e8] sm:$0xff]  ;;  %v8840_v48 = vpack.c.bf16 %v7162_v33, %v7161_v32  ;;  %v7181_v31 = vld [vmem:[%s12148_s11 + $0x9f0] sm:$0xff] }
0x1e77   :  { %7116 = vmatmul.mubr.msk.f32.gmra.mrb[78].mxu0 %vm174_vm4, %v11071_v25  ;;  %7118 = vmatmul.mubr.msk.f32.gmra.mrb[88].mxu1 %vm174_vm4, %v11071_v25  ;;  %v8842_v27 = vpack.c.bf16 %v7180_v45, %v7179_v21  ;;  %v8846_v42 = vpack.c.bf16 %v7182_v46, %v7181_v31  ;;  %v7185_v21 = vld [vmem:[%s12148_s11 + $0xa10] sm:$0xff]  ;;  %v7203_v46 = vld [vmem:[%s12148_s11 + $0xaa0] sm:$0xff] }
0x1e78   :  { %v8856_v36 = vpack.c.bf16 %v7186_v29, %v7185_v21  ;;  %v7190_v21 = vld [vmem:[%s12148_s11 + $0xa38] sm:$0xff]  ;;  %v7207_v29 = vld [vmem:[%s12148_s11 + $0xac0] sm:$0xff] }
0x1e79   :  { %8793 = vmatpush3.bf16.msra.mxu0 %v8792_v39  ;;  %8825 = vmatpush3.bf16.msra.mxu1 %v8824_v16  ;;  %v7163_v39 = vld [vmem:[%s12148_s11 + $0x960] sm:$0xff]  ;;  %v7164_v16 = vld [vmem:[%s12148_s11 + $0x968] sm:$0xff] }
0x1e7a   :  { %8795 = vmatprep.subr.bf16.mxu0 %v8794_v52  ;;  %8827 = vmatprep.subr.bf16.mxu1 %v8826_v62  ;;  %v8844_v1 = vpack.c.bf16 %v7164_v16, %v7163_v39  ;;  %v7149_v52 = vld [vmem:[%s12148_s11 + $0x8f0] sm:$0xff]  ;;  %v7150_v62 = vld [vmem:[%s12148_s11 + $0x8f8] sm:$0xff] }
0x1e7b   :  { %v8814_v44 = vpack.c.bf16 %v7150_v62, %v7149_v52  ;;  %v7217_v39 = vld [vmem:[%s12148_s11 + $0xb10] sm:$0xff] }
0x1e7d   :  { %8797 = vmatpush3.bf16.msra.mxu0 %v8796_v10  ;;  %8829 = vmatpush3.bf16.msra.mxu1 %v8828_v40  ;;  %v8816_v10 = vpack.c.bf16 %v7134_v6, %v7133_v8  ;;  %v7165_v40 = vld [vmem:[%s12148_s11 + $0x970] sm:$0xff] }
0x1e7e   :  { %8799 = vmatprep.subr.bf16.mxu0 %v8798_v58  ;;  %8831 = vmatprep.subr.bf16.mxu1 %v8830_v63  ;;  %v8848_v13 = vpack.c.bf16 %v7166_v55, %v7165_v40  ;;  %v7199_v58 = vld [vmem:[%s12148_s11 + $0xa80] sm:$0xff]  ;;  %v7200_v63 = vld [vmem:[%s12148_s11 + $0xa88] sm:$0xff] }
0x1e7f   :  { %v8850_v0 = vpack.c.bf16 %v7200_v63, %v7199_v58  ;;  %v7235_v40 = vld [vmem:[%s12148_s11 + $0xba0] sm:$0xff]  ;;  %v7236_v55 = vld [vmem:[%s12148_s11 + $0xba8] sm:$0xff] }
0x1e81   :  { %8801 = vmatpush3.bf16.msra.mxu0 %v8800_v22  ;;  %8833 = vmatpush3.bf16.msra.mxu1 %v8832_v23  ;;  %v5122_v22 = vrot.slane %v11403_v57, %v10002_v51  ;;  %v5118_v23 = vrot.slane %v11403_v57, %v10010_v53 }
0x1e82   :  { %8803 = vmatprep.subr.bf16.mxu0 %v8802_v15  ;;  %8835 = vmatprep.subr.bf16.mxu1 %v8834_v4  ;;  %v7184_v15 = vld [vmem:[%s12148_s11 + $0xa08] sm:$0xff] }
0x1e83   :  { %v8852_v33 = vpack.c.bf16 %v7184_v15, %v7183_v3 }
0x1e85   :  { %8805 = vmatpush3.bf16.msra.mxu0 %v8804_v19  ;;  %8837 = vmatpush3.bf16.msra.mxu1 %v8836_v24 }
0x1e86   :  { %8807 = vmatprep.subr.bf16.mxu0 %v8806_v28  ;;  %8839 = vmatprep.subr.bf16.mxu1 %v8838_v49  ;;  %v7234_v28 = vld [vmem:[%s12148_s11 + $0xb98] sm:$0xff] }
0x1e89   :  { %8809 = vmatpush3.bf16.msra.mxu0 %v8808_v47  ;;  %8841 = vmatpush3.bf16.msra.mxu1 %v8840_v48 }
0x1e8a   :  { %8811 = vmatprep.subr.bf16.mxu0 %v8810_v35  ;;  %8843 = vmatprep.subr.bf16.mxu1 %v8842_v27  ;;  %v8854_v35 = vpack.c.bf16 %v7202_v56, %v7201_v30  ;;  %v8886_v27 = vpack.c.bf16 %v7234_v28, %v7233_v26 }
0x1e8d   :  { %8813 = vmatpush3.bf16.msra.mxu0 %v8812_v17  ;;  %8845 = vmatpush3.bf16.msra.mxu1 %v8844_v1 }
0x1e8e   :  { %8815 = vmatprep.subr.bf16.mxu0 %v8814_v44  ;;  %8847 = vmatprep.subr.bf16.mxu1 %v8846_v42  ;;  %v7218_v44 = vld [vmem:[%s12148_s11 + $0xb18] sm:$0xff]  ;;  %v11458_v42 = vrot.slane %v11403_v57, %v10051_v14 }
0x1e91   :  { %8817 = vmatpush3.bf16.msra.mxu0 %v8816_v10  ;;  %8849 = vmatpush3.bf16.msra.mxu1 %v8848_v13  ;;  %v7204_v10 = vld [vmem:[%s12148_s11 + $0xaa8] sm:$0xff]  ;;  %v7187_v13 = vld [vmem:[%s12148_s11 + $0xa20] sm:$0xff] }
0x1e92   :  { %8851 = vmatprep.subr.bf16.mxu0 %v8850_v0  ;;  %8883 = vmatprep.subr.bf16.mxu1 %v8882_v2  ;;  %v8888_v2 = vpack.c.bf16 %v7218_v44, %v7217_v39  ;;  %v7208_v39 = vld [vmem:[%s12148_s11 + $0xac8] sm:$0xff]  ;;  %v7191_v44 = vld [vmem:[%s12148_s11 + $0xa40] sm:$0xff] }
0x1f2e   :  { %v5263_v4 = vpop.f32.mrb[64].mxu0  ;;  %v5340_v5 = vpop.f32.mrb[74].mxu1 }
0x1f2f   :  { %v5264_v12 = vadd.f32 %v5263_v4, %v5114_v11  ;;  %v5341_v18 = vadd.f32 %v5340_v5, %v5122_v22  ;;  %v5265_v19 = vpop.f32.mrb[65].mxu0  ;;  %v5342_v24 = vpop.f32.mrb[75].mxu1  ;;  %v8858_v4 = vpack.c.bf16 %v7204_v10, %v7203_v46  ;;  %v8890_v5 = vpack.c.bf16 %v7236_v55, %v7235_v40  ;;  %v7192_v46 = vld [vmem:[%s12148_s11 + $0xa48] sm:$0xff]  ;;  %v7223_v55 = vld [vmem:[%s12148_s11 + $0xb40] sm:$0xff] }
0x1f30   :  { %v5266_v49 = vadd.f32 %v5265_v19, %v5118_v23  ;;  %v5343_v32 = vadd.f32 %v5342_v24, %v5126_v37  ;;  %v7237_v19 = vld [vmem:[%s12148_s11 + $0xbb0] sm:$0xff]  ;;  %v7238_v24 = vld [vmem:[%s12148_s11 + $0xbb8] sm:$0xff]  ;;  %v8866_v10 = vpack.c.bf16 %v7208_v39, %v7207_v29  ;;  %v7227_v39 = vld [vmem:[%s12148_s11 + $0xb60] sm:$0xff] }
0x1f31   :  { %v5813_v16 = vmax.f32 %v5264_v12, 0.0  ;;  %v5815_v17 = vmax.f32 %v5341_v18, 0.0  ;;  %v7206_v18 = vld [vmem:[%s12148_s11 + $0xab8] sm:$0xff] }
0x1f32   :  { %v5814_v45 = vmax.f32 %v5266_v49, 0.0  ;;  %v5816_v47 = vmax.f32 %v5343_v32, 0.0  ;;  %v5269_v48 = vpop.f32.mrb[66].mxu0  ;;  %v5346_v60 = vpop.f32.mrb[76].mxu1 }
0x1f33   :  { %v5270_v1 = vadd.f32 %v5269_v48, %v5114_v11  ;;  %v5347_v52 = vadd.f32 %v5346_v60, %v5122_v22  ;;  %v5271_v62 = vpop.f32.mrb[67].mxu0  ;;  %v5348_v31 = vpop.f32.mrb[77].mxu1  ;;  %v7188_v11 = vld [vmem:[%s12148_s11 + $0xa28] sm:$0xff]  ;;  %v7219_v22 = vld [vmem:[%s12148_s11 + $0xb20] sm:$0xff]  ;;  %v8862_v48 = vpack.c.bf16 %v7206_v18, %v7205_v41  ;;  %v8894_v60 = vpack.c.bf16 %v7238_v24, %v7237_v19 }
0x1f34   :  { %v5272_v8 = vadd.f32 %v5271_v62, %v5118_v23  ;;  %v5349_v6 = vadd.f32 %v5348_v31, %v5126_v37  ;;  %6174 = vmatprep.mubr.f32.mxu0 %v5814_v45  ;;  %6249 = vmatprep.mubr.f32.mxu1 %v5816_v47  ;;  %v8860_v32 = vpack.c.bf16 %v7188_v11, %v7187_v13  ;;  %v7224_v13 = vld [vmem:[%s12148_s11 + $0xb48] sm:$0xff]  ;;  %v7211_v18 = vld [vmem:[%s12148_s11 + $0xae0] sm:$0xff] }
0x1f35   :  { %6175 = vmatmul.mubr.f32.vlgmr.msra.gmra.mrb[80].mxu0 %v5813_v16  ;;  %6250 = vmatmul.mubr.f32.vlgmr.msra.gmra.mrb[90].mxu1 %v5815_v17  ;;  %v5829_v23 = vmax.f32 %v5270_v1, 0.0  ;;  %v5831_v37 = vmax.f32 %v5347_v52, 0.0  ;;  %v7239_v16 = vld [vmem:[%s12148_s11 + $0xbc0] sm:$0xff]  ;;  %v7240_v17 = vld [vmem:[%s12148_s11 + $0xbc8] sm:$0xff] }
0x1f36   :  { %v5830_v58 = vmax.f32 %v5272_v8, 0.0  ;;  %v5832_v63 = vmax.f32 %v5349_v6, 0.0  ;;  %8853 = vmatpush3.bf16.msra.mxu0 %v8852_v33  ;;  %8885 = vmatpush3.bf16.msra.mxu1 %v8884_v7  ;;  %v11472_v59 = vpop.f32.mrb[68].mxu0  ;;  %v11474_v0 = vpop.f32.mrb[78].mxu1  ;;  %v8892_v33 = vpack.c.bf16 %v7220_v38, %v7219_v22  ;;  %v7189_v7 = vld [vmem:[%s12148_s11 + $0xa30] sm:$0xff]  ;;  %v8898_v40 = vpack.c.bf16 %v7240_v17, %v7239_v16  ;;  %v7212_v19 = vld [vmem:[%s12148_s11 + $0xae8] sm:$0xff] }
0x1f37   :  { %v5419_v3 = vpop.f32.mrb[69].mxu0  ;;  %v5496_v15 = vpop.f32.mrb[79].mxu1  ;;  %8855 = vmatprep.subr.bf16.mxu0 %v8854_v35  ;;  %8887 = vmatprep.subr.bf16.mxu1 %v8886_v27  ;;  %v7221_v35 = vld [vmem:[%s12148_s11 + $0xb30] sm:$0xff]  ;;  %v7222_v27 = vld [vmem:[%s12148_s11 + $0xb38] sm:$0xff]  ;;  %v8864_v62 = vpack.c.bf16 %v7190_v21, %v7189_v7  ;;  %v7243_v24 = vld [vmem:[%s12148_s11 + $0xbe0] sm:$0xff] }
0x1f38   :  { %v5420_v30 = vadd.f32 %v5419_v3, %v11439_v34  ;;  %v5497_v12 = vadd.f32 %v5496_v15, %v11458_v42  ;;  %6179 = vmatprep.mubr.f32.mxu0 %v5830_v58  ;;  %6254 = vmatprep.mubr.f32.mxu1 %v5832_v63  ;;  %v8896_v31 = vpack.c.bf16 %v7222_v27, %v7221_v35  ;;  %v7209_v58 = vld [vmem:[%s12148_s11 + $0xad0] sm:$0xff]  ;;  %v7210_v63 = vld [vmem:[%s12148_s11 + $0xad8] sm:$0xff]  ;;  %v7195_v21 = vld [vmem:[%s12148_s11 + $0xa60] sm:$0xff] }
0x1f39   :  { %6180 = vmatmul.mubr.f32.gmra.mrb[82].mxu0 %v5829_v23  ;;  %6255 = vmatmul.mubr.f32.gmra.mrb[92].mxu1 %v5831_v37  ;;  %v8868_v23 = vpack.c.bf16 %v7192_v46, %v7191_v44  ;;  %v8900_v37 = vpack.c.bf16 %v7224_v13, %v7223_v55  ;;  %v7193_v3 = vld [vmem:[%s12148_s11 + $0xa50] sm:$0xff]  ;;  %v7194_v15 = vld [vmem:[%s12148_s11 + $0xa58] sm:$0xff]  ;;  %v8870_v38 = vpack.c.bf16 %v7210_v63, %v7209_v58  ;;  %v7228_v16 = vld [vmem:[%s12148_s11 + $0xb68] sm:$0xff] }
0x1f3a   :  { %v5818_v56 = vmax.f32 %v5420_v30, 0.0  ;;  %v5820_v26 = vmax.f32 %v5497_v12, 0.0  ;;  %8857 = vmatpush3.bf16.msra.mxu0 %v8856_v36  ;;  %8889 = vmatpush3.bf16.msra.mxu1 %v8888_v2  ;;  %v11499_v28 = vpop.f32.mrb[70].mxu0  ;;  %v11501_v49 = vpop.f32.mrb[80].mxu1  ;;  %v7241_v36 = vld [vmem:[%s12148_s11 + $0xbd0] sm:$0xff]  ;;  %v7242_v2 = vld [vmem:[%s12148_s11 + $0xbd8] sm:$0xff]  ;;  %v8874_v27 = vpack.c.bf16 %v7212_v19, %v7211_v18  ;;  %v5130_v46 = vrot.slane %v11403_v57, %v10212_v9 }
0x1f3b   :  { %v11509_v45 = vpop.f32.mrb[71].mxu0  ;;  %v11511_v47 = vpop.f32.mrb[81].mxu1  ;;  %8859 = vmatprep.subr.bf16.mxu0 %v8858_v4  ;;  %8891 = vmatprep.subr.bf16.mxu1 %v8890_v5  ;;  %v8902_v41 = vpack.c.bf16 %v7242_v2, %v7241_v36  ;;  %v7225_v30 = vld [vmem:[%s12148_s11 + $0xb50] sm:$0xff]  ;;  %v7226_v12 = vld [vmem:[%s12148_s11 + $0xb58] sm:$0xff]  ;;  %v8908_v13 = vpack.c.bf16 %v7228_v16, %v7227_v39  ;;  %v5138_v2 = vrot.slane %v11403_v57, %v10225_v20  ;;  %v7264_v57 = vld [vmem:[%s12148_s11 + $0xc88] sm:$0xff] }
0x1f3c   :  { %6324 = vmatprep.mubr.f32.mxu0 %v5818_v56  ;;  %6399 = vmatprep.mubr.f32.mxu1 %v5820_v26  ;;  %v7244_v56 = vld [vmem:[%s12148_s11 + $0xbe8] sm:$0xff]  ;;  %v8904_v7 = vpack.c.bf16 %v7226_v12, %v7225_v30  ;;  %v7213_v17 = vld [vmem:[%s12148_s11 + $0xaf0] sm:$0xff]  ;;  %v7246_v44 = vld [vmem:[%s12148_s11 + $0xbf8] sm:$0xff] }
0x1f3d   :  { %v8906_v29 = vpack.c.bf16 %v7244_v56, %v7243_v24  ;;  %v7197_v58 = vld [vmem:[%s12148_s11 + $0xa70] sm:$0xff]  ;;  %v7198_v63 = vld [vmem:[%s12148_s11 + $0xa78] sm:$0xff]  ;;  %v7295_v30 = vld [vmem:[%s12148_s11 + $0xd80] sm:$0xff]  ;;  %v5495_v39 = vadd.f32 %v11474_v0, %v5138_v2  ;;  %v5503_v0 = vadd.f32 %v11511_v47, %v11458_v42  ;;  %v5501_v42 = vadd.f32 %v11501_v49, %v5138_v2 }
0x1f3e   :  { %8861 = vmatpush3.bf16.msra.mxu0 %v8860_v32  ;;  %8893 = vmatpush3.bf16.msra.mxu1 %v8892_v33  ;;  %v11531_v1 = vpop.f32.mrb[72].mxu0  ;;  %v11533_v52 = vpop.f32.mrb[82].mxu1  ;;  %v8872_v33 = vpack.c.bf16 %v7194_v15, %v7193_v3  ;;  %v7229_v36 = vld [vmem:[%s12148_s11 + $0xb70] sm:$0xff]  ;;  %v7296_v12 = vld [vmem:[%s12148_s11 + $0xd88] sm:$0xff]  ;;  %v11666_v18 = vld [vmem:[%s12149_s10 + $0x18] sm:$0xff]  ;;  %v8880_v56 = vpack.c.bf16 %v7198_v63, %v7197_v58 }
0x1f3f   :  { %v11541_v8 = vpop.f32.mrb[73].mxu0  ;;  %v11543_v6 = vpop.f32.mrb[83].mxu1  ;;  %8863 = vmatprep.subr.bf16.mxu0 %v8862_v48  ;;  %8895 = vmatprep.subr.bf16.mxu1 %v8894_v60  ;;  %v7196_v48 = vld [vmem:[%s12148_s11 + $0xa68] sm:$0xff]  ;;  %v7247_v19 = vld [vmem:[%s12148_s11 + $0xc00] sm:$0xff]  ;;  %v8946_v16 = vpack.c.bf16 %v7296_v12, %v7295_v30  ;;  %v5836_v47 = vmax.f32 %v5503_v0, 0.0  ;;  %v7281_v49 = vld [vmem:[%s12148_s11 + $0xd10] sm:$0xff] }
0x1f40   :  { %v8876_v55 = vpack.c.bf16 %v7196_v48, %v7195_v21  ;;  %v7248_v24 = vld [vmem:[%s12148_s11 + $0xc08] sm:$0xff]  ;;  %v7279_v21 = vld [vmem:[%s12148_s11 + $0xd00] sm:$0xff]  ;;  %v5835_v30 = vmax.f32 %v5501_v42, 0.0  ;;  %v7253_v0 = vld [vmem:[%s12148_s11 + $0xc30] sm:$0xff] }
0x1f41   :  { %v7280_v48 = vld [vmem:[%s12148_s11 + $0xd08] sm:$0xff]  ;;  %v7267_v2 = vld [vmem:[%s12148_s11 + $0xca0] sm:$0xff] }
0x1f42   :  { %8865 = vmatpush3.bf16.msra.mxu0 %v8864_v62  ;;  %8897 = vmatpush3.bf16.msra.mxu1 %v8896_v31  ;;  %v11563_v11 = vpop.f32.mrb[74].mxu0  ;;  %v11565_v22 = vpop.f32.mrb[84].mxu1  ;;  %v7214_v62 = vld [vmem:[%s12148_s11 + $0xaf8] sm:$0xff]  ;;  %v7245_v31 = vld [vmem:[%s12148_s11 + $0xbf0] sm:$0xff]  ;;  %v8948_v58 = vpack.c.bf16 %v7280_v48, %v7279_v21  ;;  %v7303_v42 = vld [vmem:[%s12148_s11 + $0xdc0] sm:$0xff] }
0x1f43   :  { %v11573_v4 = vpop.f32.mrb[75].mxu0  ;;  %v11575_v5 = vpop.f32.mrb[85].mxu1  ;;  %8867 = vmatprep.subr.bf16.mxu0 %v8866_v10  ;;  %8899 = vmatprep.subr.bf16.mxu1 %v8898_v40  ;;  %v8878_v3 = vpack.c.bf16 %v7214_v62, %v7213_v17  ;;  %v8910_v15 = vpack.c.bf16 %v7246_v44, %v7245_v31  ;;  %v7266_v17 = vld [vmem:[%s12148_s11 + $0xc98] sm:$0xff]  ;;  %v7297_v62 = vld [vmem:[%s12148_s11 + $0xd90] sm:$0xff]  ;;  %v11700_v44 = vrot.slane %v11666_v18, %v10010_v53 }
0x1f44   :  { %v7298_v31 = vld [vmem:[%s12148_s11 + $0xd98] sm:$0xff]  ;;  %v7249_v53 = vld [vmem:[%s12148_s11 + $0xc10] sm:$0xff] }
0x1f46   :  { %8869 = vmatpush3.bf16.msra.mxu0 %v8868_v23  ;;  %8901 = vmatpush3.bf16.msra.mxu1 %v8900_v37  ;;  %v11595_v26 = vpop.f32.mrb[76].mxu0  ;;  %v11597_v32 = vpop.f32.mrb[86].mxu1 }
0x1f47   :  { %v11605_v60 = vpop.f32.mrb[77].mxu0  ;;  %v11607_v35 = vpop.f32.mrb[87].mxu1  ;;  %8871 = vmatprep.subr.bf16.mxu0 %v8870_v38  ;;  %8903 = vmatprep.subr.bf16.mxu1 %v8902_v41  ;;  %v7230_v38 = vld [vmem:[%s12148_s11 + $0xb78] sm:$0xff]  ;;  %v7263_v41 = vld [vmem:[%s12148_s11 + $0xc80] sm:$0xff] }
0x1f4a   :  { %8873 = vmatpush3.bf16.msra.mxu0 %v8872_v33  ;;  %8905 = vmatpush3.bf16.msra.mxu1 %v8904_v7  ;;  %v11629_v10 = vpop.f32.mrb[78].mxu0  ;;  %v11631_v40 = vpop.f32.mrb[88].mxu1  ;;  %v8912_v33 = vpack.c.bf16 %v7230_v38, %v7229_v36  ;;  %v8914_v7 = vpack.c.bf16 %v7264_v57, %v7263_v41  ;;  %v8950_v36 = vpack.c.bf16 %v7298_v31, %v7297_v62  ;;  %v7300_v41 = vld [vmem:[%s12148_s11 + $0xda8] sm:$0xff]  ;;  %v7302_v62 = vld [vmem:[%s12148_s11 + $0xdb8] sm:$0xff] }
0x1f4b   :  { %v11644_v23 = vpop.f32.mrb[79].mxu0  ;;  %v11646_v37 = vpop.f32.mrb[89].mxu1  ;;  %8875 = vmatprep.subr.bf16.mxu0 %v8874_v27  ;;  %8907 = vmatprep.subr.bf16.mxu1 %v8906_v29  ;;  %v7265_v27 = vld [vmem:[%s12148_s11 + $0xc90] sm:$0xff]  ;;  %v5418_v29 = vadd.f32 %v11472_v59, %v5130_v46  ;;  %v5426_v59 = vadd.f32 %v11509_v45, %v11439_v34  ;;  %v5424_v34 = vadd.f32 %v11499_v28, %v5130_v46  ;;  %v7282_v46 = vld [vmem:[%s12148_s11 + $0xd18] sm:$0xff] }
0x1f4c   :  { %v8918_v63 = vpack.c.bf16 %v7266_v17, %v7265_v27  ;;  %v5574_v38 = vadd.f32 %v11541_v8, %v11700_v44  ;;  %v7268_v8 = vld [vmem:[%s12148_s11 + $0xca8] sm:$0xff]  ;;  %v7283_v27 = vld [vmem:[%s12148_s11 + $0xd20] sm:$0xff]  ;;  %v7301_v17 = vld [vmem:[%s12148_s11 + $0xdb0] sm:$0xff] }
0x1f4d   :  { %v5834_v45 = vmax.f32 %v5426_v59, 0.0  ;;  %v5833_v57 = vmax.f32 %v5424_v34, 0.0  ;;  %v8922_v21 = vpack.c.bf16 %v7268_v8, %v7267_v2  ;;  %v7272_v34 = vld [vmem:[%s12148_s11 + $0xcc8] sm:$0xff]  ;;  %v7273_v8 = vld [vmem:[%s12148_s11 + $0xcd0] sm:$0xff] }
0x1f4e   :  { %8877 = vmatpush3.bf16.msra.mxu0 %v8876_v55  ;;  %8909 = vmatpush3.bf16.msra.mxu1 %v8908_v13  ;;  %v11704_v55 = vrot.slane %v11666_v18, %v10013_v54  ;;  %v8916_v13 = vpack.c.bf16 %v7248_v24, %v7247_v19  ;;  %v7250_v54 = vld [vmem:[%s12148_s11 + $0xc18] sm:$0xff]  ;;  %v8952_v19 = vpack.c.bf16 %v7282_v46, %v7281_v49  ;;  %v7251_v24 = vld [vmem:[%s12148_s11 + $0xc20] sm:$0xff]  ;;  %v7288_v2 = vld [vmem:[%s12148_s11 + $0xd48] sm:$0xff] }
0x1f4f   :  { %8879 = vmatprep.subr.bf16.mxu0 %v8878_v3  ;;  %8911 = vmatprep.subr.bf16.mxu1 %v8910_v15  ;;  %v5817_v3 = vmax.f32 %v5418_v29, 0.0  ;;  %v5819_v15 = vmax.f32 %v5495_v39, 0.0  ;;  %v8920_v12 = vpack.c.bf16 %v7250_v54, %v7249_v53  ;;  %v7284_v29 = vld [vmem:[%s12148_s11 + $0xd28] sm:$0xff]  ;;  %v7269_v39 = vld [vmem:[%s12148_s11 + $0xcb0] sm:$0xff]  ;;  %v7287_v46 = vld [vmem:[%s12148_s11 + $0xd40] sm:$0xff] }
0x1f50   :  { %v5651_v28 = vadd.f32 %v11543_v6, %v11704_v55  ;;  %v7299_v6 = vld [vmem:[%s12148_s11 + $0xda0] sm:$0xff]  ;;  %v8956_v59 = vpack.c.bf16 %v7284_v29, %v7283_v27  ;;  %v7304_v53 = vld [vmem:[%s12148_s11 + $0xdc8] sm:$0xff] }
0x1f51   :  { %v8954_v48 = vpack.c.bf16 %v7300_v41, %v7299_v6  ;;  %v8962_v49 = vpack.c.bf16 %v7304_v53, %v7303_v42  ;;  %v7274_v6 = vld [vmem:[%s12148_s11 + $0xcd8] sm:$0xff]  ;;  %v7305_v41 = vld [vmem:[%s12148_s11 + $0xdd0] sm:$0xff]  ;;  %v7276_v27 = vld [vmem:[%s12148_s11 + $0xce8] sm:$0xff] }
0x1f52   :  { %8881 = vmatpush3.bf16.msra.mxu0 %v8880_v56  ;;  %8913 = vmatpush3.bf16.msra.mxu1 %v8912_v33  ;;  %v7252_v56 = vld [vmem:[%s12148_s11 + $0xc28] sm:$0xff]  ;;  %v5822_v33 = vmax.f32 %v5574_v38, 0.0  ;;  %v7307_v29 = vld [vmem:[%s12148_s11 + $0xde0] sm:$0xff] }
0x1f53   :  { %8915 = vmatprep.subr.bf16.mxu0 %v8914_v7  ;;  %8947 = vmatprep.subr.bf16.mxu1 %v8946_v16  ;;  %v5824_v7 = vmax.f32 %v5651_v28, 0.0  ;;  %v7270_v16 = vld [vmem:[%s12148_s11 + $0xcb8] sm:$0xff]  ;;  %v8924_v31 = vpack.c.bf16 %v7252_v56, %v7251_v24  ;;  %v7256_v38 = vld [vmem:[%s12148_s11 + $0xc48] sm:$0xff]  ;;  %v8934_v56 = vpack.c.bf16 %v7274_v6, %v7273_v8  ;;  %v7311_v6 = vld [vmem:[%s12148_s11 + $0xe00] sm:$0xff] }
0x1f54   :  { %v7258_v24 = vld [vmem:[%s12148_s11 + $0xc58] sm:$0xff]  ;;  %v7360_v8 = vld [vmem:[%s12148_s11 + $0xf88] sm:$0xff] }
0x1f55   :  { %6325 = vmatmul.mubr.f32.vlgmr.msra.gmra.mrb[84].mxu0 %v5817_v3  ;;  %6400 = vmatmul.mubr.f32.vlgmr.msra.gmra.mrb[94].mxu1 %v5819_v15  ;;  %v7286_v3 = vld [vmem:[%s12148_s11 + $0xd38] sm:$0xff]  ;;  %v7271_v15 = vld [vmem:[%s12148_s11 + $0xcc0] sm:$0xff] }
0x1f56   :  { %6329 = vmatprep.mubr.f32.mxu0 %v5834_v45  ;;  %6404 = vmatprep.mubr.f32.mxu1 %v5836_v47  ;;  %v7255_v47 = vld [vmem:[%s12148_s11 + $0xc40] sm:$0xff]  ;;  %v8930_v28 = vpack.c.bf16 %v7272_v34, %v7271_v15  ;;  %v7310_v15 = vld [vmem:[%s12148_s11 + $0xdf8] sm:$0xff]  ;;  %v5146_v34 = vrot.slane %v11666_v18, %v9999_v50 }
0x1f57   :  { %8917 = vmatpush3.bf16.msra.mxu0 %v8916_v13  ;;  %8949 = vmatpush3.bf16.msra.mxu1 %v8948_v58  ;;  %v7254_v13 = vld [vmem:[%s12148_s11 + $0xc38] sm:$0xff]  ;;  %v8926_v58 = vpack.c.bf16 %v7270_v16, %v7269_v39  ;;  %v7308_v39 = vld [vmem:[%s12148_s11 + $0xde8] sm:$0xff] }
0x1f58   :  { %8919 = vmatprep.subr.bf16.mxu0 %v8918_v63  ;;  %8951 = vmatprep.subr.bf16.mxu1 %v8950_v36  ;;  %v8958_v63 = vpack.c.bf16 %v7302_v62, %v7301_v17  ;;  %v7285_v36 = vld [vmem:[%s12148_s11 + $0xd30] sm:$0xff]  ;;  %v8928_v54 = vpack.c.bf16 %v7254_v13, %v7253_v0  ;;  %v7259_v62 = vld [vmem:[%s12148_s11 + $0xc60] sm:$0xff]  ;;  %v8970_v0 = vpack.c.bf16 %v7308_v39, %v7307_v29  ;;  %v7362_v29 = vld [vmem:[%s12148_s11 + $0xf98] sm:$0xff] }
0x1f59   :  { %6330 = vmatmul.mubr.f32.gmra.mrb[86].mxu0 %v5833_v57  ;;  %6405 = vmatmul.mubr.f32.gmra.mrb[96].mxu1 %v5835_v30  ;;  %v8960_v45 = vpack.c.bf16 %v7286_v3, %v7285_v36  ;;  %v7306_v57 = vld [vmem:[%s12148_s11 + $0xdd8] sm:$0xff]  ;;  %v8932_v30 = vpack.c.bf16 %v7256_v38, %v7255_v47  ;;  %v7291_v13 = vld [vmem:[%s12148_s11 + $0xd60] sm:$0xff]  ;;  %v7309_v3 = vld [vmem:[%s12148_s11 + $0xdf0] sm:$0xff]  ;;  %v5154_v38 = vrot.slane %v11666_v18, %v10002_v51 }
0x1f5a   :  { %6474 = vmatprep.mubr.f32.mxu0 %v5822_v33  ;;  %6549 = vmatprep.mubr.f32.mxu1 %v5824_v7  ;;  %v8966_v33 = vpack.c.bf16 %v7306_v57, %v7305_v41  ;;  %v7289_v7 = vld [vmem:[%s12148_s11 + $0xd50] sm:$0xff]  ;;  %v7278_v36 = vld [vmem:[%s12148_s11 + $0xcf8] sm:$0xff]  ;;  %v7359_v51 = vld [vmem:[%s12148_s11 + $0xf80] sm:$0xff]  ;;  %v11916_v39 = vrot.slane %v11666_v18, %v10030_v61 }
0x1f5b   :  { %8921 = vmatpush3.bf16.msra.mxu0 %v8920_v12  ;;  %8953 = vmatpush3.bf16.msra.mxu1 %v8952_v19  ;;  %v8964_v12 = vpack.c.bf16 %v7288_v2, %v7287_v46  ;;  %v7257_v19 = vld [vmem:[%s12148_s11 + $0xc50] sm:$0xff]  ;;  %v7327_v46 = vld [vmem:[%s12148_s11 + $0xe80] sm:$0xff]  ;;  %v7328_v2 = vld [vmem:[%s12148_s11 + $0xe88] sm:$0xff] }
0x1f5c   :  { %8923 = vmatprep.subr.bf16.mxu0 %v8922_v21  ;;  %8955 = vmatprep.subr.bf16.mxu1 %v8954_v48  ;;  %v7290_v21 = vld [vmem:[%s12148_s11 + $0xd58] sm:$0xff]  ;;  %v7275_v48 = vld [vmem:[%s12148_s11 + $0xce0] sm:$0xff]  ;;  %v8936_v16 = vpack.c.bf16 %v7258_v24, %v7257_v19  ;;  %v7293_v47 = vld [vmem:[%s12148_s11 + $0xd70] sm:$0xff] }
0x1f5d   :  { %v8968_v17 = vpack.c.bf16 %v7290_v21, %v7289_v7  ;;  %v7312_v41 = vld [vmem:[%s12148_s11 + $0xe08] sm:$0xff]  ;;  %v7343_v19 = vld [vmem:[%s12148_s11 + $0xf00] sm:$0xff]  ;;  %v5649_v7 = vadd.f32 %v11533_v52, %v5154_v38  ;;  %v9010_v21 = vpack.c.bf16 %v7360_v8, %v7359_v51  ;;  %v5657_v52 = vadd.f32 %v11575_v5, %v11704_v55  ;;  %v7313_v61 = vld [vmem:[%s12148_s11 + $0xe10] sm:$0xff] }
0x1f5e   :  { %v7344_v24 = vld [vmem:[%s12148_s11 + $0xf08] sm:$0xff]  ;;  %v5655_v5 = vadd.f32 %v11565_v22, %v5154_v38  ;;  %v7345_v22 = vld [vmem:[%s12148_s11 + $0xf10] sm:$0xff]  ;;  %v7334_v51 = vld [vmem:[%s12148_s11 + $0xeb8] sm:$0xff] }
0x1f5f   :  { %8925 = vmatpush3.bf16.msra.mxu0 %v8924_v31  ;;  %8957 = vmatpush3.bf16.msra.mxu1 %v8956_v59  ;;  %v7260_v31 = vld [vmem:[%s12148_s11 + $0xc68] sm:$0xff]  ;;  %v8938_v59 = vpack.c.bf16 %v7276_v27, %v7275_v48  ;;  %v7330_v48 = vld [vmem:[%s12148_s11 + $0xe98] sm:$0xff]  ;;  %v7361_v27 = vld [vmem:[%s12148_s11 + $0xf90] sm:$0xff]  ;;  %v5840_v55 = vmax.f32 %v5657_v52, 0.0 }
0x1f60   :  { %8927 = vmatprep.subr.bf16.mxu0 %v8926_v58  ;;  %8959 = vmatprep.subr.bf16.mxu1 %v8958_v63  ;;  %v7292_v58 = vld [vmem:[%s12148_s11 + $0xd68] sm:$0xff]  ;;  %v7277_v63 = vld [vmem:[%s12148_s11 + $0xcf0] sm:$0xff]  ;;  %v8940_v42 = vpack.c.bf16 %v7260_v31, %v7259_v62  ;;  %v9012_v62 = vpack.c.bf16 %v7344_v24, %v7343_v19  ;;  %v7319_v52 = vld [vmem:[%s12148_s11 + $0xe40] sm:$0xff] }
0x1f61   :  { %v8972_v53 = vpack.c.bf16 %v7292_v58, %v7291_v13  ;;  %v8942_v50 = vpack.c.bf16 %v7278_v36, %v7277_v63  ;;  %v5823_v13 = vmax.f32 %v5649_v7, 0.0  ;;  %v5728_v58 = vadd.f32 %v11605_v60, %v11916_v39  ;;  %v7346_v63 = vld [vmem:[%s12148_s11 + $0xf18] sm:$0xff]  ;;  %v7331_v36 = vld [vmem:[%s12148_s11 + $0xea0] sm:$0xff]  ;;  %v7332_v60 = vld [vmem:[%s12148_s11 + $0xea8] sm:$0xff] }
0x1f62   :  { %v7365_v8 = vld [vmem:[%s12148_s11 + $0xfb0] sm:$0xff]  ;;  %v7335_v7 = vld [vmem:[%s12148_s11 + $0xec0] sm:$0xff] }
0x1f63   :  { %8929 = vmatpush3.bf16.msra.mxu0 %v8928_v54  ;;  %8961 = vmatpush3.bf16.msra.mxu1 %v8960_v45  ;;  %v7261_v54 = vld [vmem:[%s12148_s11 + $0xc70] sm:$0xff]  ;;  %v7262_v45 = vld [vmem:[%s12148_s11 + $0xc78] sm:$0xff] }
0x1f64   :  { %8931 = vmatprep.subr.bf16.mxu0 %v8930_v28  ;;  %8963 = vmatprep.subr.bf16.mxu1 %v8962_v49  ;;  %v8974_v28 = vpack.c.bf16 %v7310_v15, %v7309_v3  ;;  %v7294_v49 = vld [vmem:[%s12148_s11 + $0xd78] sm:$0xff]  ;;  %v8944_v57 = vpack.c.bf16 %v7262_v45, %v7261_v54  ;;  %v7364_v3 = vld [vmem:[%s12148_s11 + $0xfa8] sm:$0xff]  ;;  %v7315_v54 = vld [vmem:[%s12148_s11 + $0xe20] sm:$0xff] }
0x1f65   :  { %v7316_v45 = vld [vmem:[%s12148_s11 + $0xe28] sm:$0xff] }
0x1f67   :  { %8933 = vmatpush3.bf16.msra.mxu0 %v8932_v30  ;;  %8965 = vmatpush3.bf16.msra.mxu1 %v8964_v12  ;;  %v8976_v30 = vpack.c.bf16 %v7294_v49, %v7293_v47  ;;  %v8978_v12 = vpack.c.bf16 %v7328_v2, %v7327_v46  ;;  %v5826_v47 = vmax.f32 %v5728_v58, 0.0  ;;  %v7347_v49 = vld [vmem:[%s12148_s11 + $0xf20] sm:$0xff]  ;;  %v7348_v46 = vld [vmem:[%s12148_s11 + $0xf28] sm:$0xff]  ;;  %v7333_v2 = vld [vmem:[%s12148_s11 + $0xeb0] sm:$0xff] }
0x1f68   :  { %8935 = vmatprep.subr.bf16.mxu0 %v8934_v56  ;;  %8967 = vmatprep.subr.bf16.mxu1 %v8966_v33  ;;  %v7329_v56 = vld [vmem:[%s12148_s11 + $0xe90] sm:$0xff]  ;;  %v5572_v33 = vadd.f32 %v11531_v1, %v5146_v34  ;;  %v5580_v1 = vadd.f32 %v11573_v4, %v11700_v44  ;;  %v5578_v4 = vadd.f32 %v11563_v11, %v5146_v34  ;;  %v5839_v34 = vmax.f32 %v5655_v5, 0.0  ;;  %v7322_v58 = vld [vmem:[%s12148_s11 + $0xe58] sm:$0xff] }
0x1f69   :  { %v8982_v31 = vpack.c.bf16 %v7330_v48, %v7329_v56  ;;  %v8990_v19 = vpack.c.bf16 %v7334_v51, %v7333_v2  ;;  %v7349_v56 = vld [vmem:[%s12148_s11 + $0xf30] sm:$0xff]  ;;  %v7367_v48 = vld [vmem:[%s12148_s11 + $0xfc0] sm:$0xff]  ;;  %v7374_v2 = vld [vmem:[%s12148_s11 + $0xff8] sm:$0xff]  ;;  %v5162_v51 = vrot.slane %v11666_v18, %v10212_v9 }
0x1f6a   :  { %v5838_v44 = vmax.f32 %v5580_v1, 0.0  ;;  %v5837_v15 = vmax.f32 %v5578_v4, 0.0  ;;  %v7338_v4 = vld [vmem:[%s12148_s11 + $0xed8] sm:$0xff]  ;;  %v7369_v5 = vld [vmem:[%s12148_s11 + $0xfd0] sm:$0xff] }
0x1f6b   :  { %8937 = vmatpush3.bf16.msra.mxu0 %v8936_v16  ;;  %8969 = vmatpush3.bf16.msra.mxu1 %v8968_v17  ;;  %v11920_v16 = vrot.slane %v11666_v18, %v10051_v14  ;;  %v8980_v17 = vpack.c.bf16 %v7312_v41, %v7311_v6  ;;  %v7314_v14 = vld [vmem:[%s12148_s11 + $0xe18] sm:$0xff]  ;;  %v8988_v41 = vpack.c.bf16 %v7316_v45, %v7315_v54  ;;  %v7324_v54 = vld [vmem:[%s12148_s11 + $0xe68] sm:$0xff]  ;;  %v7357_v9 = vld [vmem:[%s12148_s11 + $0xf70] sm:$0xff] }
0x1f6c   :  { %8939 = vmatprep.subr.bf16.mxu0 %v8938_v59  ;;  %8971 = vmatprep.subr.bf16.mxu1 %v8970_v0  ;;  %v9014_v59 = vpack.c.bf16 %v7362_v29, %v7361_v27  ;;  %v5821_v0 = vmax.f32 %v5572_v33, 0.0  ;;  %v7366_v6 = vld [vmem:[%s12148_s11 + $0xfb8] sm:$0xff]  ;;  %v7368_v27 = vld [vmem:[%s12148_s11 + $0xfc8] sm:$0xff] }
0x1f6d   :  { %v5805_v11 = vadd.f32 %v11607_v35, %v11920_v16  ;;  %v7363_v35 = vld [vmem:[%s12148_s11 + $0xfa0] sm:$0xff]  ;;  %v9022_v24 = vpack.c.bf16 %v7366_v6, %v7365_v8  ;;  %v7350_v33 = vld [vmem:[%s12148_s11 + $0xf38] sm:$0xff] }
0x1f6e   :  { %v9024_v1 = vpack.c.bf16 %v7350_v33, %v7349_v56 }
0x1f6f   :  { %8941 = vmatpush3.bf16.msra.mxu0 %v8940_v42  ;;  %8973 = vmatpush3.bf16.msra.mxu1 %v8972_v53  ;;  %v8984_v42 = vpack.c.bf16 %v7314_v14, %v7313_v61  ;;  %v9016_v53 = vpack.c.bf16 %v7346_v63, %v7345_v22  ;;  %v5828_v38 = vmax.f32 %v5805_v11, 0.0  ;;  %v7370_v61 = vld [vmem:[%s12148_s11 + $0xfd8] sm:$0xff]  ;;  %v7353_v63 = vld [vmem:[%s12148_s11 + $0xf50] sm:$0xff] }
0x1f70   :  { %8943 = vmatprep.subr.bf16.mxu0 %v8942_v50  ;;  %8975 = vmatprep.subr.bf16.mxu1 %v8974_v28  ;;  %v8986_v50 = vpack.c.bf16 %v7332_v60, %v7331_v36  ;;  %v9018_v28 = vpack.c.bf16 %v7364_v3, %v7363_v35  ;;  %v9030_v22 = vpack.c.bf16 %v7370_v61, %v7369_v5  ;;  %v7354_v36 = vld [vmem:[%s12148_s11 + $0xf58] sm:$0xff]  ;;  %v7339_v60 = vld [vmem:[%s12148_s11 + $0xee0] sm:$0xff]  ;;  %v7340_v35 = vld [vmem:[%s12148_s11 + $0xee8] sm:$0xff] }
0x1f71   :  { %v7371_v3 = vld [vmem:[%s12148_s11 + $0xfe0] sm:$0xff]  ;;  %v9002_v45 = vpack.c.bf16 %v7340_v35, %v7339_v60 }
0x1f73   :  { %8945 = vmatpush3.bf16.msra.mxu0 %v8944_v57  ;;  %8977 = vmatpush3.bf16.msra.mxu1 %v8976_v30  ;;  %v9020_v57 = vpack.c.bf16 %v7348_v46, %v7347_v49  ;;  %v7317_v30 = vld [vmem:[%s12148_s11 + $0xe30] sm:$0xff]  ;;  %v7342_v49 = vld [vmem:[%s12148_s11 + $0xef8] sm:$0xff] }
0x1f74   :  { %8979 = vmatprep.subr.bf16.mxu0 %v8978_v12  ;;  %9011 = vmatprep.subr.bf16.mxu1 %v9010_v21  ;;  %v7318_v12 = vld [vmem:[%s12148_s11 + $0xe38] sm:$0xff]  ;;  %v7336_v21 = vld [vmem:[%s12148_s11 + $0xec8] sm:$0xff]  ;;  %v7373_v46 = vld [vmem:[%s12148_s11 + $0xff0] sm:$0xff] }
0x1f75   :  { %v8992_v29 = vpack.c.bf16 %v7318_v12, %v7317_v30  ;;  %v9038_v12 = vpack.c.bf16 %v7374_v2, %v7373_v46 }
0x1f76   :  { %6475 = vmatmul.mubr.f32.vlgmr.msra.gmra.mrb[88].mxu0 %v5821_v0  ;;  %6550 = vmatmul.mubr.f32.vlgmr.msra.gmra.mrb[98].mxu1 %v5823_v13  ;;  %v7352_v0 = vld [vmem:[%s12148_s11 + $0xf48] sm:$0xff]  ;;  %v7337_v13 = vld [vmem:[%s12148_s11 + $0xed0] sm:$0xff] }
0x1f77   :  { %6479 = vmatprep.mubr.f32.mxu0 %v5838_v44  ;;  %6554 = vmatprep.mubr.f32.mxu1 %v5840_v55  ;;  %v7321_v55 = vld [vmem:[%s12148_s11 + $0xe50] sm:$0xff]  ;;  %v8998_v11 = vpack.c.bf16 %v7338_v4, %v7337_v13 }
0x1f78   :  { %8981 = vmatpush3.bf16.msra.mxu0 %v8980_v17  ;;  %9013 = vmatpush3.bf16.msra.mxu1 %v9012_v62  ;;  %v7320_v17 = vld [vmem:[%s12148_s11 + $0xe48] sm:$0xff]  ;;  %v8994_v62 = vpack.c.bf16 %v7336_v21, %v7335_v7  ;;  %v5734_v7 = vadd.f32 %v11644_v23, %v11916_v39  ;;  %v5811_v21 = vadd.f32 %v11646_v37, %v11920_v16  ;;  %v7376_v39 = vld [vmem:[%s12150_s12 + $0x1] ss:$0 sm:$0xff] }
0x1f79   :  { %8983 = vmatprep.subr.bf16.mxu0 %v8982_v31  ;;  %9015 = vmatprep.subr.bf16.mxu1 %v9014_v59  ;;  %v9026_v31 = vpack.c.bf16 %v7368_v27, %v7367_v48  ;;  %v7351_v59 = vld [vmem:[%s12148_s11 + $0xf40] sm:$0xff]  ;;  %v8996_v14 = vpack.c.bf16 %v7320_v17, %v7319_v52 }
0x1f7a   :  { %6480 = vmatmul.mubr.f32.gmra.mrb[90].mxu0 %v5837_v15  ;;  %6555 = vmatmul.mubr.f32.gmra.mrb[100].mxu1 %v5839_v34  ;;  %v9028_v44 = vpack.c.bf16 %v7352_v0, %v7351_v59  ;;  %v7372_v15 = vld [vmem:[%s12148_s11 + $0xfe8] sm:$0xff]  ;;  %v9000_v34 = vpack.c.bf16 %v7322_v58, %v7321_v55  ;;  %v5842_v52 = vmax.f32 %v5734_v7, 0.0 }
0x1f7b   :  { %6624 = vmatprep.mubr.f32.mxu0 %v5826_v47  ;;  %6699 = vmatprep.mubr.f32.mxu1 %v5828_v38  ;;  %v9034_v47 = vpack.c.bf16 %v7372_v15, %v7371_v3  ;;  %v7355_v38 = vld [vmem:[%s12148_s11 + $0xf60] sm:$0xff] }
0x1f7c   :  { %8985 = vmatpush3.bf16.msra.mxu0 %v8984_v42  ;;  %9017 = vmatpush3.bf16.msra.mxu1 %v9016_v53  ;;  %v9032_v42 = vpack.c.bf16 %v7354_v36, %v7353_v63  ;;  %v7323_v53 = vld [vmem:[%s12148_s11 + $0xe60] sm:$0xff] }
0x1f7d   :  { %8987 = vmatprep.subr.bf16.mxu0 %v8986_v50  ;;  %9019 = vmatprep.subr.bf16.mxu1 %v9018_v28  ;;  %v7356_v50 = vld [vmem:[%s12148_s11 + $0xf68] sm:$0xff]  ;;  %v7341_v28 = vld [vmem:[%s12148_s11 + $0xef0] sm:$0xff]  ;;  %v9004_v8 = vpack.c.bf16 %v7324_v54, %v7323_v53 }
0x1f7e   :  { %v9036_v6 = vpack.c.bf16 %v7356_v50, %v7355_v38  ;;  %v9006_v30 = vpack.c.bf16 %v7342_v49, %v7341_v28 }
0x1f80   :  { %8989 = vmatpush3.bf16.msra.mxu0 %v8988_v41  ;;  %9021 = vmatpush3.bf16.msra.mxu1 %v9020_v57  ;;  %v7325_v41 = vld [vmem:[%s12148_s11 + $0xe70] sm:$0xff]  ;;  %v5170_v57 = vrot.slane %v11666_v18, %v10225_v20  ;;  %v5726_v18 = vadd.f32 %v11595_v26, %v5162_v51  ;;  %v5844_v26 = vmax.f32 %v5811_v21, 0.0 }
0x1f81   :  { %8991 = vmatprep.subr.bf16.mxu0 %v8990_v19  ;;  %9023 = vmatprep.subr.bf16.mxu1 %v9022_v24  ;;  %v7326_v19 = vld [vmem:[%s12148_s11 + $0xe78] sm:$0xff] }
0x1f82   :  { %v7358_v24 = vld [vmem:[%s12148_s11 + $0xf78] sm:$0xff]  ;;  %v9008_v56 = vpack.c.bf16 %v7326_v19, %v7325_v41  ;;  %v5803_v33 = vadd.f32 %v11597_v32, %v5170_v57  ;;  %v5825_v48 = vmax.f32 %v5726_v18, 0.0 }
0x1f83   :  { %v9040_v20 = vpack.c.bf16 %v7358_v24, %v7357_v9 }
0x1f84   :  { %8993 = vmatpush3.bf16.msra.mxu0 %v8992_v29  ;;  %9025 = vmatpush3.bf16.msra.mxu1 %v9024_v1  ;;  %v5827_v27 = vmax.f32 %v5803_v33, 0.0  ;;  %v5732_v29 = vadd.f32 %v11629_v10, %v5162_v51  ;;  %v5809_v1 = vadd.f32 %v11631_v40, %v5170_v57 }
0x1f85   :  { %8995 = vmatprep.subr.bf16.mxu0 %v8994_v62  ;;  %9027 = vmatprep.subr.bf16.mxu1 %v9026_v31 }
0x1f86   :  { %v5841_v32 = vmax.f32 %v5732_v29, 0.0  ;;  %v5843_v17 = vmax.f32 %v5809_v1, 0.0 }
0x1f88   :  { %8997 = vmatpush3.bf16.msra.mxu0 %v8996_v14  ;;  %9029 = vmatpush3.bf16.msra.mxu1 %v9028_v44 }
0x1f89   :  { %8999 = vmatprep.subr.bf16.mxu0 %v8998_v11  ;;  %9031 = vmatprep.subr.bf16.mxu1 %v9030_v22 }
0x1f8c   :  { %9001 = vmatpush3.bf16.msra.mxu0 %v9000_v34  ;;  %9033 = vmatpush3.bf16.msra.mxu1 %v9032_v42 }
0x1f8d   :  { %9003 = vmatprep.subr.bf16.mxu0 %v9002_v45  ;;  %9035 = vmatprep.subr.bf16.mxu1 %v9034_v47 }
0x1f90   :  { %9005 = vmatpush3.bf16.msra.mxu0 %v9004_v8  ;;  %9037 = vmatpush3.bf16.msra.mxu1 %v9036_v6 }
0x1f91   :  { %9007 = vmatprep.subr.bf16.mxu0 %v9006_v30  ;;  %9039 = vmatprep.subr.bf16.mxu1 %v9038_v12 }
0x1f94   :  { %9009 = vmatpush3.bf16.msra.mxu0 %v9008_v56  ;;  %9041 = vmatpush3.bf16.msra.mxu1 %v9040_v20 }
0x1f97   :  { %6625 = vmatmul.mubr.f32.vlgmr.msra.gmra.mrb[92].mxu0 %v5825_v48  ;;  %6700 = vmatmul.mubr.f32.vlgmr.msra.gmra.mrb[102].mxu1 %v5827_v27 }
0x1f98   :  { %6629 = vmatprep.mubr.f32.mxu0 %v5842_v52  ;;  %6704 = vmatprep.mubr.f32.mxu1 %v5844_v26 }
0x1f9b   :  { %6630 = vmatmul.mubr.f32.gmra.mrb[94].mxu0 %v5841_v32  ;;  %6705 = vmatmul.mubr.f32.gmra.mrb[104].mxu1 %v5843_v17 }
0x2008   :  { %v7824_v23 = vpop.f32.mrb[80].mxu0  ;;  %v7862_v37 = vpop.f32.mrb[90].mxu1 }
0x2009   :  { %v7825_v16 = vpop.f32.mrb[81].mxu0  ;;  %v7863_v10 = vpop.f32.mrb[91].mxu1 }
0x200a   :  { %v7826_v62 = vadd.f32 %v7825_v16, %v7824_v23  ;;  %v7864_v40 = vadd.f32 %v7863_v10, %v7862_v37 }
0x200c   :  { %v6177_v31 = vadd.f32 %v7826_v62, %v7376_v39  ;;  %v7827_v59 = vpop.f32.mrb[82].mxu0  ;;  %v7865_v0 = vpop.f32.mrb[92].mxu1 }
0x200d   :  { %v7828_v13 = vpop.f32.mrb[83].mxu0  ;;  %v7866_v4 = vpop.f32.mrb[93].mxu1 }
0x200e   :  { %v6252_v5 = vadd.f32 %v7864_v40, %v6177_v31  ;;  %v7829_v61 = vadd.f32 %v7828_v13, %v7827_v59  ;;  %v7867_v14 = vadd.f32 %v7866_v4, %v7865_v0 }
0x2010   :  { %v6182_v44 = vadd.f32 %v7829_v61, %v7376_v39 }
0x2012   :  { %v6257_v55 = vadd.f32 %v7867_v14, %v6182_v44 }
0x2028   :  { %v7900_v58 = vpop.f32.mrb[84].mxu0  ;;  %v7938_v11 = vpop.f32.mrb[94].mxu1 }
0x2029   :  { %v7901_v22 = vpop.f32.mrb[85].mxu0  ;;  %v7939_v63 = vpop.f32.mrb[95].mxu1 }
0x202a   :  { %v7902_v36 = vadd.f32 %v7901_v22, %v7900_v58  ;;  %v7940_v60 = vadd.f32 %v7939_v63, %v7938_v11  ;;  %v6760_v11 = vld [vmem:[%s12153_s15 + $0x10] sm:$0xff]  ;;  %v6761_v22 = vld [vmem:[%s12153_s15 + $0x18] sm:$0xff] }
0x202b   :  { %v9046_v63 = vpack.c.bf16 %v6761_v22, %v6760_v11 }
0x202c   :  { %v6327_v35 = vadd.f32 %v7902_v36, %v6252_v5  ;;  %v7903_v3 = vpop.f32.mrb[86].mxu0  ;;  %v7941_v15 = vpop.f32.mrb[96].mxu1 }
0x202d   :  { %v7904_v34 = vpop.f32.mrb[87].mxu0  ;;  %v7942_v42 = vpop.f32.mrb[97].mxu1 }
0x202e   :  { %v6402_v53 = vadd.f32 %v7940_v60, %v6327_v35  ;;  %v7905_v54 = vadd.f32 %v7904_v34, %v7903_v3  ;;  %v7943_v45 = vadd.f32 %v7942_v42, %v7941_v15 }
0x2030   :  { %v6332_v47 = vadd.f32 %v7905_v54, %v6257_v55  ;;  %v6759_v55 = vld [vmem:[%s12153_s15 + $0x8] sm:$0xff] }
0x2032   :  { %v6407_v38 = vadd.f32 %v7943_v45, %v6332_v47  ;;  %v7380_v45 = vld [vmem:[%s12152_s14 + $0x1] ss:$0 sm:$0xff]  ;;  %s9191_s14 = smov 122  }
0x2049   :  { %v7976_v50 = vpop.f32.mrb[88].mxu0  ;;  %v8014_v28 = vpop.f32.mrb[98].mxu1 }
0x204a   :  { %v7977_v49 = vpop.f32.mrb[89].mxu0  ;;  %v8015_v46 = vpop.f32.mrb[99].mxu1 }
0x204b   :  { %v7978_v2 = vadd.f32 %v7977_v49, %v7976_v50  ;;  %v8016_v51 = vadd.f32 %v8015_v46, %v8014_v28 }
0x204d   :  { %v6477_v8 = vadd.f32 %v7978_v2, %v6402_v53  ;;  %v7979_v6 = vpop.f32.mrb[90].mxu0  ;;  %v8017_v41 = vpop.f32.mrb[100].mxu1  ;;  %v7379_v53 = vld [vmem:[%s12151_s13 + $0x1] ss:$0 sm:$0xff]  ;;  %v7381_v2 = vld [vmem:[%s12154_s16] ss:$0 sm:$0xff] }
0x204e   :  { %v7980_v57 = vpop.f32.mrb[91].mxu0  ;;  %v8018_v30 = vpop.f32.mrb[101].mxu1  ;;  %s9190_s13 = smov 125  }
0x204f   :  { %v6552_v12 = vadd.f32 %v8016_v51, %v6477_v8  ;;  %v7981_v19 = vadd.f32 %v7980_v57, %v7979_v6  ;;  %v8019_v9 = vadd.f32 %v8018_v30, %v8017_v41 }
0x2051   :  { %v6482_v24 = vadd.f32 %v7981_v19, %v6407_v38 }
0x2053   :  { %v6557_v56 = vadd.f32 %v8019_v9, %v6482_v24 }
0x206a   :  { %v8052_v20 = vpop.f32.mrb[92].mxu0  ;;  %v8090_v18 = vpop.f32.mrb[102].mxu1 }
0x206b   :  { %v8053_v33 = vpop.f32.mrb[93].mxu0  ;;  %v8091_v7 = vpop.f32.mrb[103].mxu1 }
0x206c   :  { %v8054_v21 = vadd.f32 %v8053_v33, %v8052_v20  ;;  %v8092_v48 = vadd.f32 %v8091_v7, %v8090_v18 }
0x206e   :  { %v6627_v27 = vadd.f32 %v8054_v21, %v6552_v12  ;;  %v8055_v29 = vpop.f32.mrb[94].mxu0  ;;  %v8093_v1 = vpop.f32.mrb[104].mxu1 }
0x206f   :  { %v8056_v52 = vpop.f32.mrb[95].mxu0  ;;  %v8094_v26 = vpop.f32.mrb[105].mxu1 }
0x2070   :  { %v6702_v32 = vadd.f32 %v8092_v48, %v6627_v27  ;;  %v8057_v17 = vadd.f32 %v8056_v52, %v8055_v29  ;;  %v8095_v23 = vadd.f32 %v8094_v26, %v8093_v1 }
0x2072   :  { %v6632_v37 = vadd.f32 %v8057_v17, %v6557_v56  ;;  %v6710_v39 = vadd.f32 %v6702_v32, %v11040_v43 }
0x2074   :  { %v6707_v16 = vadd.f32 %v8095_v23, %v6632_v37  ;;  %v6716_v10 = vsel %vm174_vm4, %v6710_v39, 0.0 }
0x2075   :  { %6717 = vadd.xlane.f32.xlu1 %v6716_v10 }
0x2076   :  { %v6711_v62 = vadd.f32 %v6707_v16, %v11071_v25  ;;  %v6758_v25 = vld [vmem:[%s12153_s15] sm:$0xff] }
0x2077   :  { %v9042_v58 = vpack.c.bf16 %v6759_v55, %v6758_v25 }
0x2078   :  { %v6719_v40 = vsel %vm174_vm4, %v6711_v62, 0.0 }
0x2079   :  { %6720 = vadd.xlane.f32.xlu0 %v6719_v40  ;;  %9043 = vmatprep.subr.bf16.mxu0 %v9042_v58 }
0x207a   :  { %9045 = vmatpush3.bf16.msra.mxu0 %v9042_v58 }
0x207b   :  { %9047 = vmatprep.subr.bf16.mxu0 %v9046_v63 }
0x207e   :  { %9049 = vmatpush3.bf16.msra.mxu0 %v9046_v63 }
0x2102   :  { %v6718_v31 = vpop.xlane.xlu1 %6717 }
0x2103   :  { %v6722_v59 = vmul.f32 0.03125, %v6718_v31 }
0x2105   :  { %v6724_v0 = vsub.f32 %v6710_v39, %v6722_v59 }
0x2106   :  { %v6721_v13 = vpop.xlane.xlu0 %6720 }
0x2107   :  { %v6723_v4 = vmul.f32 0.03125, %v6721_v13  ;;  %v6726_v5 = vmul.f32 %v6724_v0, %v6724_v0 }
0x2109   :  { %v6725_v61 = vsub.f32 %v6711_v62, %v6723_v4  ;;  %v6728_v14 = vsel %vm174_vm4, %v6726_v5, 0.0 }
0x210a   :  { %6729 = vadd.xlane.f32.xlu1 %v6728_v14 }
0x210b   :  { %v6727_v43 = vmul.f32 %v6725_v61, %v6725_v61 }
0x210d   :  { %v6731_v44 = vsel %vm174_vm4, %v6727_v43, 0.0 }
0x210e   :  { %6732 = vadd.xlane.f32.xlu0 %v6731_v44 }
0x2197   :  { %v6730_v36 = vpop.xlane.xlu1 %6729 }
0x2198   :  { %v6734_v60 = vmul.f32 0.03125, %v6730_v36 }
0x219a   :  { %v6736_v35 = vadd.f32 1e-05, %v6734_v60 }
0x219b   :  { %v6733_v3 = vpop.xlane.xlu0 %6732 }
0x219c   :  { %9145 = vrsqrt.f32 %v6736_v35  ;;  %v6735_v15 = vmul.f32 0.03125, %v6733_v3 }
0x219e   :  { %v6737_v34 = vadd.f32 1e-05, %v6735_v15 }
0x21a0   :  { %9147 = vrsqrt.f32 %v6737_v34 }
0x21a6   :  { %v9146_v42 = vpop.eup %9145 }
0x21a7   :  { %v6740_v54 = vmul.f32 %v9146_v42, %v6724_v0 }
0x21a9   :  { %v6748_v47 = vmul.f32 %v7379_v53, %v6740_v54 }
0x21aa   :  { %v9148_v38 = vpop.eup %9147 }
0x21ab   :  { %v6741_v50 = vmul.f32 %v9148_v38, %v6725_v61  ;;  %v6756_v28 = vadd.f32 %v7380_v45, %v6748_v47 }
0x21ad   :  { %v6749_v49 = vmul.f32 %v7379_v53, %v6741_v50  ;;  %8341 = vmatprep.mubr.msk.f32.mxu0 %vm174_vm4, %v6756_v28 }
0x21af   :  { %v6757_v46 = vadd.f32 %v7380_v45, %v6749_v49 }
0x21b1   :  { %8342 = vmatmul.mubr.msk.f32.vlgmr.msra.gmra.mrb[96].mxu0 %vm174_vm4, %v6757_v46 }
0x2284   :  { %v8343_v51 = vpop.f32.mrb[96].mxu0 }
0x2285   :  { %v6847_v8 = vadd.f32 %v8343_v51, %v7381_v2  ;;  %v6841_v6 = vpop.f32.mrb[97].mxu0 }
0x2286   :  { %v6842_v41 = vadd.f32 %v7381_v2, %v6841_v6 }
0x2287   :  { %v6866_v57 = vsel %vm6862_vm9, %v6847_v8, -inf  ;;  %v6898_v12 = vsel %vm6894_vm10, %v6847_v8, -inf  ;;  %v7385_v0 = vmul.f32 -1.442695, %v6847_v8 }
0x2288   :  { %6867 = vmax.xlane.f32.xlu0 %v6866_v57  ;;  %v6863_v30 = vsel %vm6862_vm9, %v6842_v41, -inf  ;;  %v6895_v19 = vsel %vm6894_vm10, %v6842_v41, -inf  ;;  %v7384_v59 = vmul.f32 -1.442695, %v6842_v41 }
0x2289   :  { %6864 = vmax.xlane.f32.xlu1 %v6863_v30 }
0x228c   :  { %6899 = vmax.xlane.f32.xlu0 %v6898_v12 }
0x228d   :  { %6896 = vmax.xlane.f32.xlu1 %v6895_v19 }
0x2315   :  { %v6868_v9 = vpop.xlane.xlu0 %6867 }
0x2316   :  { %v6870_v24 = vsub.f32 %v6847_v8, %v6868_v9  ;;  %v6865_v56 = vpop.xlane.xlu1 %6864 }
0x2317   :  { %v6869_v20 = vsub.f32 %v6842_v41, %v6865_v56 }
0x2318   :  { %v6873_v18 = vmul.f32 1.442695, %v6870_v24 }
0x2319   :  { %v6871_v33 = vmul.f32 1.442695, %v6869_v20  ;;  %v6900_v7 = vpop.xlane.xlu0 %6899 }
0x231a   :  { %9149 = vpow2.f32 %v6873_v18  ;;  %v6897_v21 = vpop.xlane.xlu1 %6896  ;;  %v6902_v48 = vsub.f32 %v6847_v8, %v6900_v7 }
0x231b   :  { %9151 = vpow2.f32 %v6871_v33  ;;  %v6901_v27 = vsub.f32 %v6842_v41, %v6897_v21 }
0x231c   :  { %v6905_v1 = vmul.f32 1.442695, %v6902_v48 }
0x231d   :  { %v6903_v29 = vmul.f32 1.442695, %v6901_v27 }
0x231f   :  { %9153 = vpow2.f32 %v6903_v29 }
0x2320   :  { %9155 = vpow2.f32 %v6905_v1 }
0x2321   :  { %9157 = vpow2.f32 %v7384_v59 }
0x2322   :  { %9159 = vpow2.f32 %v7385_v0 }
0x2324   :  { %v9150_v52 = vpop.eup %9149 }
0x2325   :  { %v9152_v26 = vpop.eup %9151  ;;  %6879 = vrot.lane.b32.xlu0 %v9150_v52, %s9190_s13 }
0x2326   :  { %6877 = vrot.lane.b32.xlu1 %v9152_v26, %s9190_s13 }
0x2329   :  { %v9154_v32 = vpop.eup %9153 }
0x232a   :  { %6909 = vrot.lane.b32.xlu1 %v9154_v32, %s9191_s14  ;;  %v9156_v17 = vpop.eup %9155 }
0x232b   :  { %v9158_v13 = vpop.eup %9157 }
0x232c   :  { %v6856_v61 = vadd.f32 1.0, %v9158_v13  ;;  %v9160_v14 = vpop.eup %9159 }
0x232d   :  { %v6857_v44 = vadd.f32 1.0, %v9160_v14 }
0x232e   :  { %6911 = vrot.lane.b32.xlu1 %v9156_v17, %s9191_s14 }
0x2397   :  { %v6880_v23 = vpop.permute.xlu0 %6879 }
0x2398   :  { %v6887_v37 = vsel %vm6883_vm11, %v6880_v23, 0.0  ;;  %v6878_v39 = vpop.permute.xlu1 %6877 }
0x2399   :  { %v6884_v16 = vsel %vm6883_vm11, %v6878_v39, 0.0  ;;  %6888 = vadd.xlane.f32.xlu1 %v6887_v37 }
0x239a   :  { %6885 = vadd.xlane.f32.xlu0 %v6884_v16 }
0x239c   :  { %v6910_v10 = vpop.permute.xlu1 %6909 }
0x239d   :  { %v6916_v62 = vsel %vm6915_vm12, %v6910_v10, 0.0 }
0x239e   :  { %6917 = vadd.xlane.f32.xlu0 %v6916_v62 }
0x23a0   :  { %v6912_v40 = vpop.permute.xlu1 %6911 }
0x23a1   :  { %v6919_v31 = vsel %vm6915_vm12, %v6912_v40, 0.0 }
0x23a2   :  { %6920 = vadd.xlane.f32.xlu0 %v6919_v31 }
0x2426   :  { %v6889_v5 = vpop.xlane.xlu1 %6888 }
0x2427   :  { %v6886_v4 = vpop.xlane.xlu0 %6885 }
0x2428   :  { %9161 = vrcp.f32 %v6886_v4 }
0x2429   :  { %9163 = vrcp.f32 %v6889_v5 }
0x242b   :  { %v6918_v43 = vpop.xlane.xlu0 %6917 }
0x242c   :  { %9165 = vrcp.f32 %v6918_v43 }
0x242d   :  { %9167 = vrcp.f32 %v6856_v61 }
0x242f   :  { %v6921_v25 = vpop.xlane.xlu0 %6920 }
0x2430   :  { %9169 = vrcp.f32 %v6921_v25 }
0x2431   :  { %9171 = vrcp.f32 %v6857_v44 }
0x2432   :  { %v9162_v55 = vpop.eup %9161 }
0x2433   :  { %v6892_v58 = vmul.f32 %v9162_v55, %v9152_v26  ;;  %v9164_v11 = vpop.eup %9163 }
0x2434   :  { %v6893_v60 = vmul.f32 %v9164_v11, %v9150_v52 }
0x2436   :  { %v9166_v22 = vpop.eup %9165 }
0x2437   :  { %v9168_v63 = vpop.eup %9167  ;;  %v6924_v36 = vmul.f32 %v9166_v22, %v9154_v32 }
0x2438   :  { %v6926_v35 = vsel %vm6883_vm11, %v9168_v63, %v6892_v58 }
0x2439   :  { %v6929_v3 = vsel %vm6928_vm13, %v6926_v35, %v6924_v36 }
0x243a   :  { %v9170_v15 = vpop.eup %9169  ;;  %6932 = vst.msk [vmem:[%s12155_s17] sm:$0xff] %vm6931_vm14, %v6929_v3 }
0x243b   :  { %v9172_v34 = vpop.eup %9171  ;;  %v6925_v42 = vmul.f32 %v9170_v15, %v9156_v17 }
0x243c   :  { %v6927_v53 = vsel %vm6883_vm11, %v9172_v34, %v6893_v60 }
0x243d   :  { %v6930_v54 = vsel %vm6928_vm13, %v6927_v53, %v6925_v42 }
0x243e   :  { %6933 = vst.msk [vmem:[%s12155_s17 + $0x8] sm:$0xff] %vm6931_vm14, %v6930_v54 }

</bundles_post_ra>
